<compile_context>
chip_gen: v6e
topology: v6e:2x2x1
jax: 0.10.0
libtpu: 0.0.40
codegen_flags: <defaults>
</compile_context>

<pallas_src>
import math
import functools

import jax
import jax.numpy as jnp
from jax import lax
from jax.experimental import pallas as pl
from jax.experimental.pallas import tpu as pltpu


_INV_SQRT2 = 1.0 / math.sqrt(2.0)


def _gelu_exact(x):
    # PyTorch nn.GELU() default: 0.5 * x * (1 + erf(x / sqrt(2)))
    return 0.5 * x * (1.0 + lax.erf(x * _INV_SQRT2))


def _pick_q_tile(L):
    for t in (512, 256, 128, 64, 32, 16, 8):
        if L % t == 0:
            return t
    return L


def encode_block_kernel(x_ref,                                   # (L, D) full sequence
                        wq_ref, bq_ref, wk_ref, bk_ref, wv_ref, bv_ref,
                        wp_ref, bp_ref, wm_ref, bm_ref,
                        o_ref,                                    # (TQ, D) q-tile output
                        k_sc, v_sc,                               # (H, L, hd) scratch
                        *, n_head, compute_dtype):
    L, D = x_ref.shape
    TQ = o_ref.shape[0]
    t = pl.program_id(1)

    # ---- K/V for the full sequence: computed once per batch row (q-tile 0) into VMEM
    #      scratch, reused by every later q-tile (scratch persists across the
    #      "arbitrary" q-tile grid axis). ----
    @pl.when(t == 0)
    def _():
        xf = x_ref[...].astype(compute_dtype)
        for h in range(n_head):
            k_h = jnp.dot(xf, wk_ref[h], preferred_element_type=jnp.float32) + bk_ref[h]
            v_h = jnp.dot(xf, wv_ref[h], preferred_element_type=jnp.float32) + bv_ref[h]
            k_sc[h] = k_h.astype(compute_dtype)
            v_sc[h] = v_h.astype(compute_dtype)

    row0 = pl.multiple_of(t * TQ, TQ)
    xq = x_ref[pl.ds(row0, TQ), :].astype(jnp.float32)   # residual / elementwise path in f32
    xqc = xq.astype(compute_dtype)                        # MXU operand dtype

    # ---- multi-head attention: per-head 2D MXU passes (contiguous leading-axis weight
    #      views), output projection accumulated over heads -> no head-merge scratch. ----
    acc = jnp.zeros((TQ, D), jnp.float32)
    for h in range(n_head):
        # NOTE: 1/sqrt(head_dim) is folded into wq/bq host-side.
        q_h = (jnp.dot(xqc, wq_ref[h], preferred_element_type=jnp.float32)
               + bq_ref[h]).astype(compute_dtype)                           # (TQ, hd)
        s = lax.dot_general(q_h, k_sc[h], (((1,), (1,)), ((), ())),
                            preferred_element_type=jnp.float32)             # (TQ, L)
        s = s - jnp.max(s, axis=-1, keepdims=True)                          # stable softmax
        p = jnp.exp(s)
        p = p * pl.reciprocal(jnp.sum(p, axis=-1, keepdims=True), approx=True)  # EUP recip
        y_h = jnp.dot(p.astype(compute_dtype), v_sc[h],
                      preferred_element_type=jnp.float32)                   # (TQ, hd)
        acc = acc + jnp.dot(y_h.astype(compute_dtype), wp_ref[h],
                            preferred_element_type=jnp.float32)             # (TQ, D)

    x1 = xq + acc + bp_ref[...]                     # residual 1 (proj bias added once)

    # ---- mlp = Linear(D, D) -> exact GELU ; residual 2 ----
    h1 = jnp.dot(x1.astype(compute_dtype), wm_ref[...],
                 preferred_element_type=jnp.float32) + bm_ref[...]
    o_ref[...] = (x1 + _gelu_exact(h1)).astype(o_ref.dtype)


def prepare_params(params, n_head, compute_dtype=jnp.bfloat16):
    """One-time host-side prep: head-major split, scale folding, MXU dtype cast."""
    wk, bk, wq, bq, wv, bv, wp, bp, wm, bm = params
    D = wk.shape[0]
    assert D % n_head == 0
    hd = D // n_head
    scale = 1.0 / math.sqrt(hd)

    def w_in_split(w):                       # (D, D) -> (H, D, hd), head-major out columns
        return jnp.transpose(w.reshape(D, n_head, hd), (1, 0, 2)).astype(compute_dtype)

    def b_split(b):                          # (1, D) -> (H, 1, hd)
        return b.reshape(n_head, 1, hd).astype(jnp.float32)

    wq3 = w_in_split(wq * scale)             # attention scale folded into Q projection
    bq3 = b_split(bq * scale)
    wk3, bk3 = w_in_split(wk), b_split(bk)
    wv3, bv3 = w_in_split(wv), b_split(bv)
    wp3 = wp.reshape(n_head, hd, D).astype(compute_dtype)   # head-major input rows
    return (wq3, bq3, wk3, bk3, wv3, bv3, wp3,
            bp.astype(jnp.float32), wm.astype(compute_dtype), bm.astype(jnp.float32))


def encode_block(x, prepared_params, n_head, compute_dtype=jnp.bfloat16, q_tile=None):
    B, L, D = x.shape
    assert D % n_head == 0
    hd = D // n_head
    weight_arrays = tuple(prepared_params)

    TQ = q_tile if q_tile is not None else _pick_q_tile(L)
    assert L % TQ == 0
    T = L // TQ

    x_spec = pl.BlockSpec((None, L, D), lambda b, t: (b, 0, 0))
    out_spec = pl.BlockSpec((None, TQ, D), lambda b, t: (b, t, 0))

    kernel = functools.partial(encode_block_kernel,
                               n_head=n_head, compute_dtype=compute_dtype)

    cd_b = jnp.dtype(compute_dtype).itemsize
    w_bytes = sum(int(a.size) * int(a.dtype.itemsize) for a in weight_arrays)
    est = (2 * w_bytes                               # weights (worst case double-buffered)
           + 2 * L * D * x.dtype.itemsize            # x block (double-buffered)
           + 2 * TQ * D * x.dtype.itemsize           # out tile (double-buffered)
           + 2 * L * D * cd_b                        # K/V scratch
           + 4 * TQ * L * 4                          # per-head score/softmax temporaries
           + 8 * TQ * D * 4)                         # residual / proj / mlp temporaries
    try:
        cap = int(pltpu.get_tpu_info().vmem_capacity_bytes)
    except Exception:
        cap = 64 * 1024 * 1024                       # safe lower bound (v7x physical VMEM)
    vmem_budget = int(max(32 * 1024 * 1024, min(cap * 7 // 8, est + (8 << 20))))

    cost = pl.CostEstimate(
        flops=int(B * (2 * L * D * 5 * D + 4 * L * L * D)),
        transcendentals=int(B * (n_head * L * L + L * D)),
        bytes_accessed=int(2 * B * L * D * x.dtype.itemsize + w_bytes),
    )

    def _const_spec(shape, single_buffer):
        idx = lambda b, t, n=len(shape): (0,) * n
        if single_buffer:
            # grid-invariant blocks: single-buffer to halve resident weight VMEM
            return pl.BlockSpec(shape, idx, pipeline_mode=pl.Buffered(1))
        return pl.BlockSpec(shape, idx)

    def _run(single_buffer):
        in_specs = [x_spec] + [_const_spec(tuple(a.shape), single_buffer)
                               for a in weight_arrays]
        return pl.pallas_call(
            kernel,
            out_shape=jax.ShapeDtypeStruct((B, L, D), x.dtype),
            grid_spec=pltpu.PrefetchScalarGridSpec(
                num_scalar_prefetch=0,
                grid=(B, T),
                in_specs=in_specs,
                out_specs=out_spec,
                scratch_shapes=[pltpu.VMEM((n_head, L, hd), compute_dtype),   # K
                                pltpu.VMEM((n_head, L, hd), compute_dtype)],  # V
            ),
            compiler_params=pltpu.CompilerParams(
                # q-tile axis is "arbitrary" because K/V scratch is filled at t==0 and
                # reused by later q-tiles.
                dimension_semantics=("parallel", "arbitrary"),
                vmem_limit_bytes=vmem_budget),
            cost_estimate=cost,
        )(x, *weight_arrays)

    try:
        return _run(True)
    except Exception:
        # fallback for jax versions without single-buffered pipeline_mode support
        return _run(False)


def encode_block_ref(x, params, n_head):
    """Pure-JAX reference (PyTorch module semantics) for correctness checking."""
    wk, bk, wq, bq, wv, bv, wp, bp, wm, bm = params
    B, L, D = x.shape
    hd = D // n_head

    def proj(a, w, b):
        return a @ w + b

    k = proj(x, wk, bk).reshape(B, L, n_head, hd).transpose(0, 2, 1, 3)
    q = proj(x, wq, bq).reshape(B, L, n_head, hd).transpose(0, 2, 1, 3)
    v = proj(x, wv, bv).reshape(B, L, n_head, hd).transpose(0, 2, 1, 3)
    att = jnp.einsum("bhld,bhmd->bhlm", q, k) / math.sqrt(hd)
    att = jax.nn.softmax(att, axis=-1)
    y = jnp.einsum("bhlm,bhmd->bhld", att, v)
    y = y.transpose(0, 2, 1, 3).reshape(B, L, D)
    y = proj(y, wp, bp)
    x1 = x + y
    h1 = jax.nn.gelu(proj(x1, wm, bm), approximate=False)
    return x1 + h1


def make_params(key, n_embd):
    """Deterministic synthetic nn.Linear params, stored as (in, out) plus (1, out) bias."""
    ks = jax.random.split(key, 10)
    bound = 1.0 / math.sqrt(n_embd)

    def w(k):
        return jax.random.uniform(k, (n_embd, n_embd), jnp.float32, -bound, bound)

    def b(k):
        return jax.random.uniform(k, (1, n_embd), jnp.float32, -bound, bound)

    return (w(ks[0]), b(ks[1]),   # key
            w(ks[2]), b(ks[3]),   # query
            w(ks[4]), b(ks[5]),   # value
            w(ks[6]), b(ks[7]),   # proj
            w(ks[8]), b(ks[9]))   # mlp linear


if __name__ == "__main__":
    B, L, D, n_head = 2, 8, 32, 4   # n_tokens=8, n_embd=32; dropout is identity at inference

    key = jax.random.PRNGKey(0)
    kx, kp = jax.random.split(key)
    x = jax.random.normal(kx, (B, L, D), dtype=jnp.float32)
    params = make_params(kp, D)

    ref = encode_block_ref(x, params, n_head)

    # f32 MXU operands: near-exact parity with the module semantics
    # (tolerance covers the approximate EUP reciprocal in the softmax).
    pp_f32 = prepare_params(params, n_head, compute_dtype=jnp.float32)
    out_f32 = jax.block_until_ready(
        encode_block(x, pp_f32, n_head, compute_dtype=jnp.float32))
    assert out_f32.shape == (B, L, D)
    assert jnp.allclose(out_f32, ref, atol=2e-3, rtol=2e-3), "f32 kernel mismatch vs reference"

    # bf16 MXU operands with f32 accumulation (fast path on every generation): looser tol.
    pp_bf16 = prepare_params(params, n_head, compute_dtype=jnp.bfloat16)
    out_bf16 = jax.block_until_ready(
        encode_block(x, pp_bf16, n_head, compute_dtype=jnp.bfloat16))
    assert out_bf16.shape == (B, L, D)
    assert jnp.allclose(out_bf16, ref, atol=6e-2, rtol=6e-2), "bf16 kernel mismatch vs reference"

    print("KERNEL_OK")
</pallas_src>

<mosaic_0001>
module attributes {stable_mosaic.version = 11 : i64} {
  func.func @encode_block_kernel(%arg0: i32, %arg1: i32, %arg2: memref<1x8x32xf32, #tpu.memory_space<vmem>>, %arg3: memref<4x32x8xf32, #tpu.memory_space<vmem>>, %arg4: memref<4x1x8xf32, #tpu.memory_space<vmem>>, %arg5: memref<4x32x8xf32, #tpu.memory_space<vmem>>, %arg6: memref<4x1x8xf32, #tpu.memory_space<vmem>>, %arg7: memref<4x32x8xf32, #tpu.memory_space<vmem>>, %arg8: memref<4x1x8xf32, #tpu.memory_space<vmem>>, %arg9: memref<4x8x32xf32, #tpu.memory_space<vmem>>, %arg10: memref<1x32xf32, #tpu.memory_space<vmem>>, %arg11: memref<32x32xf32, #tpu.memory_space<vmem>>, %arg12: memref<1x32xf32, #tpu.memory_space<vmem>>, %arg13: memref<1x8x32xf32, #tpu.memory_space<vmem>>, %arg14: memref<4x8x8xf32, #tpu.memory_space<vmem>>, %arg15: memref<4x8x8xf32, #tpu.memory_space<vmem>>) attributes {dimension_semantics = [#tpu.dimension_semantics<parallel>, #tpu.dimension_semantics<arbitrary>], iteration_bounds = array<i64: 2, 1>, scalar_prefetch = 0 : i64, scratch_operands = 2 : i64, tpu.core_type = #tpu.core_type<tc>, window_params = [{transform_indices = @transform_0, window_bounds = array<i64: 1, 8, 32>}, {pipeline_mode = #tpu.pipeline_mode<synchronous>, transform_indices = @transform_1, window_bounds = array<i64: 4, 32, 8>}, {pipeline_mode = #tpu.pipeline_mode<synchronous>, transform_indices = @transform_2, window_bounds = array<i64: 4, 1, 8>}, {pipeline_mode = #tpu.pipeline_mode<synchronous>, transform_indices = @transform_3, window_bounds = array<i64: 4, 32, 8>}, {pipeline_mode = #tpu.pipeline_mode<synchronous>, transform_indices = @transform_4, window_bounds = array<i64: 4, 1, 8>}, {pipeline_mode = #tpu.pipeline_mode<synchronous>, transform_indices = @transform_5, window_bounds = array<i64: 4, 32, 8>}, {pipeline_mode = #tpu.pipeline_mode<synchronous>, transform_indices = @transform_6, window_bounds = array<i64: 4, 1, 8>}, {pipeline_mode = #tpu.pipeline_mode<synchronous>, transform_indices = @transform_7, window_bounds = array<i64: 4, 8, 32>}, {pipeline_mode = #tpu.pipeline_mode<synchronous>, transform_indices = @transform_8, window_bounds = array<i64: 1, 32>}, {pipeline_mode = #tpu.pipeline_mode<synchronous>, transform_indices = @transform_9, window_bounds = array<i64: 32, 32>}, {pipeline_mode = #tpu.pipeline_mode<synchronous>, transform_indices = @transform_10, window_bounds = array<i64: 1, 32>}, {transform_indices = @transform_11, window_bounds = array<i64: 1, 8, 32>}]} {
    %c0_i32 = arith.constant 0 : i32
    %0 = arith.cmpi eq, %arg1, %c0_i32 : i32
    %1 = arith.extui %0 : i1 to i32
    %c0_i32_0 = arith.constant 0 : i32
    %2 = arith.cmpi ne, %1, %c0_i32_0 : i32
    scf.if %2 {
      %c0_96 = arith.constant 0 : index
      %c0_97 = arith.constant 0 : index
      %c0_98 = arith.constant 0 : index
      %138 = vector.load %arg2[%c0_96, %c0_97, %c0_98] : memref<1x8x32xf32, #tpu.memory_space<vmem>>, vector<1x8x32xf32>
      %139 = vector.shape_cast %138 : vector<1x8x32xf32> to vector<8x32xf32>
      %c0_99 = arith.constant 0 : index
      %c0_100 = arith.constant 0 : index
      %c0_101 = arith.constant 0 : index
      %140 = vector.load %arg5[%c0_99, %c0_100, %c0_101] : memref<4x32x8xf32, #tpu.memory_space<vmem>>, vector<1x32x8xf32>
      %141 = vector.shape_cast %140 : vector<1x32x8xf32> to vector<32x8xf32>
      %cst_102 = arith.constant dense<0.000000e+00> : vector<8x8xf32>
      %142 = tpu.matmul %139, %141, %cst_102 {dimension_numbers = #tpu.dot_dimension_numbers<[1], [0], [0], [1], [0, 0, 1, 1], [], []>} : vector<8x32xf32>, vector<32x8xf32>, vector<8x8xf32> -> vector<8x8xf32>
      %c0_103 = arith.constant 0 : index
      %c0_104 = arith.constant 0 : index
      %c0_105 = arith.constant 0 : index
      %143 = vector.load %arg6[%c0_103, %c0_104, %c0_105] : memref<4x1x8xf32, #tpu.memory_space<vmem>>, vector<1x1x8xf32>
      %144 = vector.shape_cast %143 : vector<1x1x8xf32> to vector<1x8xf32>
      %145 = vector.broadcast %144 : vector<1x8xf32> to vector<8x8xf32>
      %146 = arith.addf %142, %145 : vector<8x8xf32>
      %c0_106 = arith.constant 0 : index
      %c0_107 = arith.constant 0 : index
      %c0_108 = arith.constant 0 : index
      %147 = vector.load %arg7[%c0_106, %c0_107, %c0_108] : memref<4x32x8xf32, #tpu.memory_space<vmem>>, vector<1x32x8xf32>
      %148 = vector.shape_cast %147 : vector<1x32x8xf32> to vector<32x8xf32>
      %cst_109 = arith.constant dense<0.000000e+00> : vector<8x8xf32>
      %149 = tpu.matmul %139, %148, %cst_109 {dimension_numbers = #tpu.dot_dimension_numbers<[1], [0], [0], [1], [0, 0, 1, 1], [], []>} : vector<8x32xf32>, vector<32x8xf32>, vector<8x8xf32> -> vector<8x8xf32>
      %c0_110 = arith.constant 0 : index
      %c0_111 = arith.constant 0 : index
      %c0_112 = arith.constant 0 : index
      %150 = vector.load %arg8[%c0_110, %c0_111, %c0_112] : memref<4x1x8xf32, #tpu.memory_space<vmem>>, vector<1x1x8xf32>
      %151 = vector.shape_cast %150 : vector<1x1x8xf32> to vector<1x8xf32>
      %152 = vector.broadcast %151 : vector<1x8xf32> to vector<8x8xf32>
      %153 = arith.addf %149, %152 : vector<8x8xf32>
      %c0_113 = arith.constant 0 : index
      %c0_114 = arith.constant 0 : index
      %c0_115 = arith.constant 0 : index
      %154 = vector.load %arg14[%c0_113, %c0_114, %c0_115] : memref<4x8x8xf32, #tpu.memory_space<vmem>>, vector<1x8x8xf32>
      %155 = vector.shape_cast %154 : vector<1x8x8xf32> to vector<8x8xf32>
      %156 = vector.shape_cast %146 : vector<8x8xf32> to vector<1x8x8xf32>
      tpu.vector_store %arg14[%c0_113, %c0_114, %c0_115], %156 {strides = array<i32>} : memref<4x8x8xf32, #tpu.memory_space<vmem>>, vector<1x8x8xf32>,
      %c0_116 = arith.constant 0 : index
      %c0_117 = arith.constant 0 : index
      %c0_118 = arith.constant 0 : index
      %157 = vector.load %arg15[%c0_116, %c0_117, %c0_118] : memref<4x8x8xf32, #tpu.memory_space<vmem>>, vector<1x8x8xf32>
      %158 = vector.shape_cast %157 : vector<1x8x8xf32> to vector<8x8xf32>
      %159 = vector.shape_cast %153 : vector<8x8xf32> to vector<1x8x8xf32>
      tpu.vector_store %arg15[%c0_116, %c0_117, %c0_118], %159 {strides = array<i32>} : memref<4x8x8xf32, #tpu.memory_space<vmem>>, vector<1x8x8xf32>,
      %c1_119 = arith.constant 1 : index
      %c0_120 = arith.constant 0 : index
      %c0_121 = arith.constant 0 : index
      %160 = vector.load %arg5[%c1_119, %c0_120, %c0_121] : memref<4x32x8xf32, #tpu.memory_space<vmem>>, vector<1x32x8xf32>
      %161 = vector.shape_cast %160 : vector<1x32x8xf32> to vector<32x8xf32>
      %cst_122 = arith.constant dense<0.000000e+00> : vector<8x8xf32>
      %162 = tpu.matmul %139, %161, %cst_122 {dimension_numbers = #tpu.dot_dimension_numbers<[1], [0], [0], [1], [0, 0, 1, 1], [], []>} : vector<8x32xf32>, vector<32x8xf32>, vector<8x8xf32> -> vector<8x8xf32>
      %c1_123 = arith.constant 1 : index
      %c0_124 = arith.constant 0 : index
      %c0_125 = arith.constant 0 : index
      %163 = vector.load %arg6[%c1_123, %c0_124, %c0_125] : memref<4x1x8xf32, #tpu.memory_space<vmem>>, vector<1x1x8xf32>
      %164 = vector.shape_cast %163 : vector<1x1x8xf32> to vector<1x8xf32>
      %165 = vector.broadcast %164 : vector<1x8xf32> to vector<8x8xf32>
      %166 = arith.addf %162, %165 : vector<8x8xf32>
      %c1_126 = arith.constant 1 : index
      %c0_127 = arith.constant 0 : index
      %c0_128 = arith.constant 0 : index
      %167 = vector.load %arg7[%c1_126, %c0_127, %c0_128] : memref<4x32x8xf32, #tpu.memory_space<vmem>>, vector<1x32x8xf32>
      %168 = vector.shape_cast %167 : vector<1x32x8xf32> to vector<32x8xf32>
      %cst_129 = arith.constant dense<0.000000e+00> : vector<8x8xf32>
      %169 = tpu.matmul %139, %168, %cst_129 {dimension_numbers = #tpu.dot_dimension_numbers<[1], [0], [0], [1], [0, 0, 1, 1], [], []>} : vector<8x32xf32>, vector<32x8xf32>, vector<8x8xf32> -> vector<8x8xf32>
      %c1_130 = arith.constant 1 : index
      %c0_131 = arith.constant 0 : index
      %c0_132 = arith.constant 0 : index
      %170 = vector.load %arg8[%c1_130, %c0_131, %c0_132] : memref<4x1x8xf32, #tpu.memory_space<vmem>>, vector<1x1x8xf32>
      %171 = vector.shape_cast %170 : vector<1x1x8xf32> to vector<1x8xf32>
      %172 = vector.broadcast %171 : vector<1x8xf32> to vector<8x8xf32>
      %173 = arith.addf %169, %172 : vector<8x8xf32>
      %c1_133 = arith.constant 1 : index
      %c0_134 = arith.constant 0 : index
      %c0_135 = arith.constant 0 : index
      %174 = vector.load %arg14[%c1_133, %c0_134, %c0_135] : memref<4x8x8xf32, #tpu.memory_space<vmem>>, vector<1x8x8xf32>
      %175 = vector.shape_cast %174 : vector<1x8x8xf32> to vector<8x8xf32>
      %176 = vector.shape_cast %166 : vector<8x8xf32> to vector<1x8x8xf32>
      tpu.vector_store %arg14[%c1_133, %c0_134, %c0_135], %176 {strides = array<i32>} : memref<4x8x8xf32, #tpu.memory_space<vmem>>, vector<1x8x8xf32>,
      %c1_136 = arith.constant 1 : index
      %c0_137 = arith.constant 0 : index
      %c0_138 = arith.constant 0 : index
      %177 = vector.load %arg15[%c1_136, %c0_137, %c0_138] : memref<4x8x8xf32, #tpu.memory_space<vmem>>, vector<1x8x8xf32>
      %178 = vector.shape_cast %177 : vector<1x8x8xf32> to vector<8x8xf32>
      %179 = vector.shape_cast %173 : vector<8x8xf32> to vector<1x8x8xf32>
      tpu.vector_store %arg15[%c1_136, %c0_137, %c0_138], %179 {strides = array<i32>} : memref<4x8x8xf32, #tpu.memory_space<vmem>>, vector<1x8x8xf32>,
      %c2_139 = arith.constant 2 : index
      %c0_140 = arith.constant 0 : index
      %c0_141 = arith.constant 0 : index
      %180 = vector.load %arg5[%c2_139, %c0_140, %c0_141] : memref<4x32x8xf32, #tpu.memory_space<vmem>>, vector<1x32x8xf32>
      %181 = vector.shape_cast %180 : vector<1x32x8xf32> to vector<32x8xf32>
      %cst_142 = arith.constant dense<0.000000e+00> : vector<8x8xf32>
      %182 = tpu.matmul %139, %181, %cst_142 {dimension_numbers = #tpu.dot_dimension_numbers<[1], [0], [0], [1], [0, 0, 1, 1], [], []>} : vector<8x32xf32>, vector<32x8xf32>, vector<8x8xf32> -> vector<8x8xf32>
      %c2_143 = arith.constant 2 : index
      %c0_144 = arith.constant 0 : index
      %c0_145 = arith.constant 0 : index
      %183 = vector.load %arg6[%c2_143, %c0_144, %c0_145] : memref<4x1x8xf32, #tpu.memory_space<vmem>>, vector<1x1x8xf32>
      %184 = vector.shape_cast %183 : vector<1x1x8xf32> to vector<1x8xf32>
      %185 = vector.broadcast %184 : vector<1x8xf32> to vector<8x8xf32>
      %186 = arith.addf %182, %185 : vector<8x8xf32>
      %c2_146 = arith.constant 2 : index
      %c0_147 = arith.constant 0 : index
      %c0_148 = arith.constant 0 : index
      %187 = vector.load %arg7[%c2_146, %c0_147, %c0_148] : memref<4x32x8xf32, #tpu.memory_space<vmem>>, vector<1x32x8xf32>
      %188 = vector.shape_cast %187 : vector<1x32x8xf32> to vector<32x8xf32>
      %cst_149 = arith.constant dense<0.000000e+00> : vector<8x8xf32>
      %189 = tpu.matmul %139, %188, %cst_149 {dimension_numbers = #tpu.dot_dimension_numbers<[1], [0], [0], [1], [0, 0, 1, 1], [], []>} : vector<8x32xf32>, vector<32x8xf32>, vector<8x8xf32> -> vector<8x8xf32>
      %c2_150 = arith.constant 2 : index
      %c0_151 = arith.constant 0 : index
      %c0_152 = arith.constant 0 : index
      %190 = vector.load %arg8[%c2_150, %c0_151, %c0_152] : memref<4x1x8xf32, #tpu.memory_space<vmem>>, vector<1x1x8xf32>
      %191 = vector.shape_cast %190 : vector<1x1x8xf32> to vector<1x8xf32>
      %192 = vector.broadcast %191 : vector<1x8xf32> to vector<8x8xf32>
      %193 = arith.addf %189, %192 : vector<8x8xf32>
      %c2_153 = arith.constant 2 : index
      %c0_154 = arith.constant 0 : index
      %c0_155 = arith.constant 0 : index
      %194 = vector.load %arg14[%c2_153, %c0_154, %c0_155] : memref<4x8x8xf32, #tpu.memory_space<vmem>>, vector<1x8x8xf32>
      %195 = vector.shape_cast %194 : vector<1x8x8xf32> to vector<8x8xf32>
      %196 = vector.shape_cast %186 : vector<8x8xf32> to vector<1x8x8xf32>
      tpu.vector_store %arg14[%c2_153, %c0_154, %c0_155], %196 {strides = array<i32>} : memref<4x8x8xf32, #tpu.memory_space<vmem>>, vector<1x8x8xf32>,
      %c2_156 = arith.constant 2 : index
      %c0_157 = arith.constant 0 : index
      %c0_158 = arith.constant 0 : index
      %197 = vector.load %arg15[%c2_156, %c0_157, %c0_158] : memref<4x8x8xf32, #tpu.memory_space<vmem>>, vector<1x8x8xf32>
      %198 = vector.shape_cast %197 : vector<1x8x8xf32> to vector<8x8xf32>
      %199 = vector.shape_cast %193 : vector<8x8xf32> to vector<1x8x8xf32>
      tpu.vector_store %arg15[%c2_156, %c0_157, %c0_158], %199 {strides = array<i32>} : memref<4x8x8xf32, #tpu.memory_space<vmem>>, vector<1x8x8xf32>,
      %c3_159 = arith.constant 3 : index
      %c0_160 = arith.constant 0 : index
      %c0_161 = arith.constant 0 : index
      %200 = vector.load %arg5[%c3_159, %c0_160, %c0_161] : memref<4x32x8xf32, #tpu.memory_space<vmem>>, vector<1x32x8xf32>
      %201 = vector.shape_cast %200 : vector<1x32x8xf32> to vector<32x8xf32>
      %cst_162 = arith.constant dense<0.000000e+00> : vector<8x8xf32>
      %202 = tpu.matmul %139, %201, %cst_162 {dimension_numbers = #tpu.dot_dimension_numbers<[1], [0], [0], [1], [0, 0, 1, 1], [], []>} : vector<8x32xf32>, vector<32x8xf32>, vector<8x8xf32> -> vector<8x8xf32>
      %c3_163 = arith.constant 3 : index
      %c0_164 = arith.constant 0 : index
      %c0_165 = arith.constant 0 : index
      %203 = vector.load %arg6[%c3_163, %c0_164, %c0_165] : memref<4x1x8xf32, #tpu.memory_space<vmem>>, vector<1x1x8xf32>
      %204 = vector.shape_cast %203 : vector<1x1x8xf32> to vector<1x8xf32>
      %205 = vector.broadcast %204 : vector<1x8xf32> to vector<8x8xf32>
      %206 = arith.addf %202, %205 : vector<8x8xf32>
      %c3_166 = arith.constant 3 : index
      %c0_167 = arith.constant 0 : index
      %c0_168 = arith.constant 0 : index
      %207 = vector.load %arg7[%c3_166, %c0_167, %c0_168] : memref<4x32x8xf32, #tpu.memory_space<vmem>>, vector<1x32x8xf32>
      %208 = vector.shape_cast %207 : vector<1x32x8xf32> to vector<32x8xf32>
      %cst_169 = arith.constant dense<0.000000e+00> : vector<8x8xf32>
      %209 = tpu.matmul %139, %208, %cst_169 {dimension_numbers = #tpu.dot_dimension_numbers<[1], [0], [0], [1], [0, 0, 1, 1], [], []>} : vector<8x32xf32>, vector<32x8xf32>, vector<8x8xf32> -> vector<8x8xf32>
      %c3_170 = arith.constant 3 : index
      %c0_171 = arith.constant 0 : index
      %c0_172 = arith.constant 0 : index
      %210 = vector.load %arg8[%c3_170, %c0_171, %c0_172] : memref<4x1x8xf32, #tpu.memory_space<vmem>>, vector<1x1x8xf32>
      %211 = vector.shape_cast %210 : vector<1x1x8xf32> to vector<1x8xf32>
      %212 = vector.broadcast %211 : vector<1x8xf32> to vector<8x8xf32>
      %213 = arith.addf %209, %212 : vector<8x8xf32>
      %c3_173 = arith.constant 3 : index
      %c0_174 = arith.constant 0 : index
      %c0_175 = arith.constant 0 : index
      %214 = vector.load %arg14[%c3_173, %c0_174, %c0_175] : memref<4x8x8xf32, #tpu.memory_space<vmem>>, vector<1x8x8xf32>
      %215 = vector.shape_cast %214 : vector<1x8x8xf32> to vector<8x8xf32>
      %216 = vector.shape_cast %206 : vector<8x8xf32> to vector<1x8x8xf32>
      tpu.vector_store %arg14[%c3_173, %c0_174, %c0_175], %216 {strides = array<i32>} : memref<4x8x8xf32, #tpu.memory_space<vmem>>, vector<1x8x8xf32>,
      %c3_176 = arith.constant 3 : index
      %c0_177 = arith.constant 0 : index
      %c0_178 = arith.constant 0 : index
      %217 = vector.load %arg15[%c3_176, %c0_177, %c0_178] : memref<4x8x8xf32, #tpu.memory_space<vmem>>, vector<1x8x8xf32>
      %218 = vector.shape_cast %217 : vector<1x8x8xf32> to vector<8x8xf32>
      %219 = vector.shape_cast %213 : vector<8x8xf32> to vector<1x8x8xf32>
      tpu.vector_store %arg15[%c3_176, %c0_177, %c0_178], %219 {strides = array<i32>} : memref<4x8x8xf32, #tpu.memory_space<vmem>>, vector<1x8x8xf32>,
    } else {
    }
    %c8_i32 = arith.constant 8 : i32
    %3 = arith.muli %arg1, %c8_i32 : i32
    %4 = tpu.assume_multiple %3, 8 : i32
    %c0 = arith.constant 0 : index
    %5 = arith.index_cast %4 : i32 to index
    %c0_1 = arith.constant 0 : index
    %6 = vector.load %arg2[%c0, %5, %c0_1] : memref<1x8x32xf32, #tpu.memory_space<vmem>>, vector<1x8x32xf32>
    %7 = vector.shape_cast %6 : vector<1x8x32xf32> to vector<8x32xf32>
    %cst = arith.constant 0.000000e+00 : f32
    %8 = vector.broadcast %cst : f32 to vector<8x32xf32>
    %c0_2 = arith.constant 0 : index
    %c0_3 = arith.constant 0 : index
    %c0_4 = arith.constant 0 : index
    %9 = vector.load %arg3[%c0_2, %c0_3, %c0_4] : memref<4x32x8xf32, #tpu.memory_space<vmem>>, vector<1x32x8xf32>
    %10 = vector.shape_cast %9 : vector<1x32x8xf32> to vector<32x8xf32>
    %cst_5 = arith.constant dense<0.000000e+00> : vector<8x8xf32>
    %11 = tpu.matmul %7, %10, %cst_5 {dimension_numbers = #tpu.dot_dimension_numbers<[1], [0], [0], [1], [0, 0, 1, 1], [], []>} : vector<8x32xf32>, vector<32x8xf32>, vector<8x8xf32> -> vector<8x8xf32>
    %c0_6 = arith.constant 0 : index
    %c0_7 = arith.constant 0 : index
    %c0_8 = arith.constant 0 : index
    %12 = vector.load %arg4[%c0_6, %c0_7, %c0_8] : memref<4x1x8xf32, #tpu.memory_space<vmem>>, vector<1x1x8xf32>
    %13 = vector.shape_cast %12 : vector<1x1x8xf32> to vector<1x8xf32>
    %14 = vector.broadcast %13 : vector<1x8xf32> to vector<8x8xf32>
    %15 = arith.addf %11, %14 : vector<8x8xf32>
    %c0_9 = arith.constant 0 : index
    %c0_10 = arith.constant 0 : index
    %c0_11 = arith.constant 0 : index
    %16 = vector.load %arg14[%c0_9, %c0_10, %c0_11] : memref<4x8x8xf32, #tpu.memory_space<vmem>>, vector<1x8x8xf32>
    %17 = vector.shape_cast %16 : vector<1x8x8xf32> to vector<8x8xf32>
    %cst_12 = arith.constant dense<0.000000e+00> : vector<8x8xf32>
    %18 = tpu.matmul %15, %17, %cst_12 {dimension_numbers = #tpu.dot_dimension_numbers<[1], [1], [0], [0], [0, 0, 1, 0], [], []>} : vector<8x8xf32>, vector<8x8xf32>, vector<8x8xf32> -> vector<8x8xf32>
    %cst_13 = arith.constant dense<0xFF800000> : vector<8xf32>
    %19 = vector.multi_reduction <maximumf>, %18, %cst_13 [1] : vector<8x8xf32> to vector<8xf32>
    %20 = vector.shape_cast %19 : vector<8xf32> to vector<8x1xf32>
    %21 = vector.broadcast %20 : vector<8x1xf32> to vector<8x8xf32>
    %22 = arith.subf %18, %21 : vector<8x8xf32>
    %23 = math.exp %22 : vector<8x8xf32>
    %cst_14 = arith.constant dense<0.000000e+00> : vector<8xf32>
    %24 = vector.multi_reduction <add>, %23, %cst_14 [1] : vector<8x8xf32> to vector<8xf32>
    %25 = vector.shape_cast %24 : vector<8xf32> to vector<8x1xf32>
    %26 = tpu.reciprocal %25 {approx = true} : vector<8x1xf32> -> vector<8x1xf32>
    %27 = vector.broadcast %26 : vector<8x1xf32> to vector<8x8xf32>
    %28 = arith.mulf %23, %27 : vector<8x8xf32>
    %c0_15 = arith.constant 0 : index
    %c0_16 = arith.constant 0 : index
    %c0_17 = arith.constant 0 : index
    %29 = vector.load %arg15[%c0_15, %c0_16, %c0_17] : memref<4x8x8xf32, #tpu.memory_space<vmem>>, vector<1x8x8xf32>
    %30 = vector.shape_cast %29 : vector<1x8x8xf32> to vector<8x8xf32>
    %cst_18 = arith.constant dense<0.000000e+00> : vector<8x8xf32>
    %31 = tpu.matmul %28, %30, %cst_18 {dimension_numbers = #tpu.dot_dimension_numbers<[1], [0], [0], [1], [0, 0, 1, 1], [], []>} : vector<8x8xf32>, vector<8x8xf32>, vector<8x8xf32> -> vector<8x8xf32>
    %c0_19 = arith.constant 0 : index
    %c0_20 = arith.constant 0 : index
    %c0_21 = arith.constant 0 : index
    %32 = vector.load %arg9[%c0_19, %c0_20, %c0_21] : memref<4x8x32xf32, #tpu.memory_space<vmem>>, vector<1x8x32xf32>
    %33 = vector.shape_cast %32 : vector<1x8x32xf32> to vector<8x32xf32>
    %cst_22 = arith.constant dense<0.000000e+00> : vector<8x32xf32>
    %34 = tpu.matmul %31, %33, %cst_22 {dimension_numbers = #tpu.dot_dimension_numbers<[1], [0], [0], [1], [0, 0, 1, 1], [], []>} : vector<8x8xf32>, vector<8x32xf32>, vector<8x32xf32> -> vector<8x32xf32>
    %35 = arith.addf %8, %34 : vector<8x32xf32>
    %c1 = arith.constant 1 : index
    %c0_23 = arith.constant 0 : index
    %c0_24 = arith.constant 0 : index
    %36 = vector.load %arg3[%c1, %c0_23, %c0_24] : memref<4x32x8xf32, #tpu.memory_space<vmem>>, vector<1x32x8xf32>
    %37 = vector.shape_cast %36 : vector<1x32x8xf32> to vector<32x8xf32>
    %cst_25 = arith.constant dense<0.000000e+00> : vector<8x8xf32>
    %38 = tpu.matmul %7, %37, %cst_25 {dimension_numbers = #tpu.dot_dimension_numbers<[1], [0], [0], [1], [0, 0, 1, 1], [], []>} : vector<8x32xf32>, vector<32x8xf32>, vector<8x8xf32> -> vector<8x8xf32>
    %c1_26 = arith.constant 1 : index
    %c0_27 = arith.constant 0 : index
    %c0_28 = arith.constant 0 : index
    %39 = vector.load %arg4[%c1_26, %c0_27, %c0_28] : memref<4x1x8xf32, #tpu.memory_space<vmem>>, vector<1x1x8xf32>
    %40 = vector.shape_cast %39 : vector<1x1x8xf32> to vector<1x8xf32>
    %41 = vector.broadcast %40 : vector<1x8xf32> to vector<8x8xf32>
    %42 = arith.addf %38, %41 : vector<8x8xf32>
    %c1_29 = arith.constant 1 : index
    %c0_30 = arith.constant 0 : index
    %c0_31 = arith.constant 0 : index
    %43 = vector.load %arg14[%c1_29, %c0_30, %c0_31] : memref<4x8x8xf32, #tpu.memory_space<vmem>>, vector<1x8x8xf32>
    %44 = vector.shape_cast %43 : vector<1x8x8xf32> to vector<8x8xf32>
    %cst_32 = arith.constant dense<0.000000e+00> : vector<8x8xf32>
    %45 = tpu.matmul %42, %44, %cst_32 {dimension_numbers = #tpu.dot_dimension_numbers<[1], [1], [0], [0], [0, 0, 1, 0], [], []>} : vector<8x8xf32>, vector<8x8xf32>, vector<8x8xf32> -> vector<8x8xf32>
    %cst_33 = arith.constant dense<0xFF800000> : vector<8xf32>
    %46 = vector.multi_reduction <maximumf>, %45, %cst_33 [1] : vector<8x8xf32> to vector<8xf32>
    %47 = vector.shape_cast %46 : vector<8xf32> to vector<8x1xf32>
    %48 = vector.broadcast %47 : vector<8x1xf32> to vector<8x8xf32>
    %49 = arith.subf %45, %48 : vector<8x8xf32>
    %50 = math.exp %49 : vector<8x8xf32>
    %cst_34 = arith.constant dense<0.000000e+00> : vector<8xf32>
    %51 = vector.multi_reduction <add>, %50, %cst_34 [1] : vector<8x8xf32> to vector<8xf32>
    %52 = vector.shape_cast %51 : vector<8xf32> to vector<8x1xf32>
    %53 = tpu.reciprocal %52 {approx = true} : vector<8x1xf32> -> vector<8x1xf32>
    %54 = vector.broadcast %53 : vector<8x1xf32> to vector<8x8xf32>
    %55 = arith.mulf %50, %54 : vector<8x8xf32>
    %c1_35 = arith.constant 1 : index
    %c0_36 = arith.constant 0 : index
    %c0_37 = arith.constant 0 : index
    %56 = vector.load %arg15[%c1_35, %c0_36, %c0_37] : memref<4x8x8xf32, #tpu.memory_space<vmem>>, vector<1x8x8xf32>
    %57 = vector.shape_cast %56 : vector<1x8x8xf32> to vector<8x8xf32>
    %cst_38 = arith.constant dense<0.000000e+00> : vector<8x8xf32>
    %58 = tpu.matmul %55, %57, %cst_38 {dimension_numbers = #tpu.dot_dimension_numbers<[1], [0], [0], [1], [0, 0, 1, 1], [], []>} : vector<8x8xf32>, vector<8x8xf32>, vector<8x8xf32> -> vector<8x8xf32>
    %c1_39 = arith.constant 1 : index
    %c0_40 = arith.constant 0 : index
    %c0_41 = arith.constant 0 : index
    %59 = vector.load %arg9[%c1_39, %c0_40, %c0_41] : memref<4x8x32xf32, #tpu.memory_space<vmem>>, vector<1x8x32xf32>
    %60 = vector.shape_cast %59 : vector<1x8x32xf32> to vector<8x32xf32>
    %cst_42 = arith.constant dense<0.000000e+00> : vector<8x32xf32>
    %61 = tpu.matmul %58, %60, %cst_42 {dimension_numbers = #tpu.dot_dimension_numbers<[1], [0], [0], [1], [0, 0, 1, 1], [], []>} : vector<8x8xf32>, vector<8x32xf32>, vector<8x32xf32> -> vector<8x32xf32>
    %62 = arith.addf %35, %61 : vector<8x32xf32>
    %c2 = arith.constant 2 : index
    %c0_43 = arith.constant 0 : index
    %c0_44 = arith.constant 0 : index
    %63 = vector.load %arg3[%c2, %c0_43, %c0_44] : memref<4x32x8xf32, #tpu.memory_space<vmem>>, vector<1x32x8xf32>
    %64 = vector.shape_cast %63 : vector<1x32x8xf32> to vector<32x8xf32>
    %cst_45 = arith.constant dense<0.000000e+00> : vector<8x8xf32>
    %65 = tpu.matmul %7, %64, %cst_45 {dimension_numbers = #tpu.dot_dimension_numbers<[1], [0], [0], [1], [0, 0, 1, 1], [], []>} : vector<8x32xf32>, vector<32x8xf32>, vector<8x8xf32> -> vector<8x8xf32>
    %c2_46 = arith.constant 2 : index
    %c0_47 = arith.constant 0 : index
    %c0_48 = arith.constant 0 : index
    %66 = vector.load %arg4[%c2_46, %c0_47, %c0_48] : memref<4x1x8xf32, #tpu.memory_space<vmem>>, vector<1x1x8xf32>
    %67 = vector.shape_cast %66 : vector<1x1x8xf32> to vector<1x8xf32>
    %68 = vector.broadcast %67 : vector<1x8xf32> to vector<8x8xf32>
    %69 = arith.addf %65, %68 : vector<8x8xf32>
    %c2_49 = arith.constant 2 : index
    %c0_50 = arith.constant 0 : index
    %c0_51 = arith.constant 0 : index
    %70 = vector.load %arg14[%c2_49, %c0_50, %c0_51] : memref<4x8x8xf32, #tpu.memory_space<vmem>>, vector<1x8x8xf32>
    %71 = vector.shape_cast %70 : vector<1x8x8xf32> to vector<8x8xf32>
    %cst_52 = arith.constant dense<0.000000e+00> : vector<8x8xf32>
    %72 = tpu.matmul %69, %71, %cst_52 {dimension_numbers = #tpu.dot_dimension_numbers<[1], [1], [0], [0], [0, 0, 1, 0], [], []>} : vector<8x8xf32>, vector<8x8xf32>, vector<8x8xf32> -> vector<8x8xf32>
    %cst_53 = arith.constant dense<0xFF800000> : vector<8xf32>
    %73 = vector.multi_reduction <maximumf>, %72, %cst_53 [1] : vector<8x8xf32> to vector<8xf32>
    %74 = vector.shape_cast %73 : vector<8xf32> to vector<8x1xf32>
    %75 = vector.broadcast %74 : vector<8x1xf32> to vector<8x8xf32>
    %76 = arith.subf %72, %75 : vector<8x8xf32>
    %77 = math.exp %76 : vector<8x8xf32>
    %cst_54 = arith.constant dense<0.000000e+00> : vector<8xf32>
    %78 = vector.multi_reduction <add>, %77, %cst_54 [1] : vector<8x8xf32> to vector<8xf32>
    %79 = vector.shape_cast %78 : vector<8xf32> to vector<8x1xf32>
    %80 = tpu.reciprocal %79 {approx = true} : vector<8x1xf32> -> vector<8x1xf32>
    %81 = vector.broadcast %80 : vector<8x1xf32> to vector<8x8xf32>
    %82 = arith.mulf %77, %81 : vector<8x8xf32>
    %c2_55 = arith.constant 2 : index
    %c0_56 = arith.constant 0 : index
    %c0_57 = arith.constant 0 : index
    %83 = vector.load %arg15[%c2_55, %c0_56, %c0_57] : memref<4x8x8xf32, #tpu.memory_space<vmem>>, vector<1x8x8xf32>
    %84 = vector.shape_cast %83 : vector<1x8x8xf32> to vector<8x8xf32>
    %cst_58 = arith.constant dense<0.000000e+00> : vector<8x8xf32>
    %85 = tpu.matmul %82, %84, %cst_58 {dimension_numbers = #tpu.dot_dimension_numbers<[1], [0], [0], [1], [0, 0, 1, 1], [], []>} : vector<8x8xf32>, vector<8x8xf32>, vector<8x8xf32> -> vector<8x8xf32>
    %c2_59 = arith.constant 2 : index
    %c0_60 = arith.constant 0 : index
    %c0_61 = arith.constant 0 : index
    %86 = vector.load %arg9[%c2_59, %c0_60, %c0_61] : memref<4x8x32xf32, #tpu.memory_space<vmem>>, vector<1x8x32xf32>
    %87 = vector.shape_cast %86 : vector<1x8x32xf32> to vector<8x32xf32>
    %cst_62 = arith.constant dense<0.000000e+00> : vector<8x32xf32>
    %88 = tpu.matmul %85, %87, %cst_62 {dimension_numbers = #tpu.dot_dimension_numbers<[1], [0], [0], [1], [0, 0, 1, 1], [], []>} : vector<8x8xf32>, vector<8x32xf32>, vector<8x32xf32> -> vector<8x32xf32>
    %89 = arith.addf %62, %88 : vector<8x32xf32>
    %c3 = arith.constant 3 : index
    %c0_63 = arith.constant 0 : index
    %c0_64 = arith.constant 0 : index
    %90 = vector.load %arg3[%c3, %c0_63, %c0_64] : memref<4x32x8xf32, #tpu.memory_space<vmem>>, vector<1x32x8xf32>
    %91 = vector.shape_cast %90 : vector<1x32x8xf32> to vector<32x8xf32>
    %cst_65 = arith.constant dense<0.000000e+00> : vector<8x8xf32>
    %92 = tpu.matmul %7, %91, %cst_65 {dimension_numbers = #tpu.dot_dimension_numbers<[1], [0], [0], [1], [0, 0, 1, 1], [], []>} : vector<8x32xf32>, vector<32x8xf32>, vector<8x8xf32> -> vector<8x8xf32>
    %c3_66 = arith.constant 3 : index
    %c0_67 = arith.constant 0 : index
    %c0_68 = arith.constant 0 : index
    %93 = vector.load %arg4[%c3_66, %c0_67, %c0_68] : memref<4x1x8xf32, #tpu.memory_space<vmem>>, vector<1x1x8xf32>
    %94 = vector.shape_cast %93 : vector<1x1x8xf32> to vector<1x8xf32>
    %95 = vector.broadcast %94 : vector<1x8xf32> to vector<8x8xf32>
    %96 = arith.addf %92, %95 : vector<8x8xf32>
    %c3_69 = arith.constant 3 : index
    %c0_70 = arith.constant 0 : index
    %c0_71 = arith.constant 0 : index
    %97 = vector.load %arg14[%c3_69, %c0_70, %c0_71] : memref<4x8x8xf32, #tpu.memory_space<vmem>>, vector<1x8x8xf32>
    %98 = vector.shape_cast %97 : vector<1x8x8xf32> to vector<8x8xf32>
    %cst_72 = arith.constant dense<0.000000e+00> : vector<8x8xf32>
    %99 = tpu.matmul %96, %98, %cst_72 {dimension_numbers = #tpu.dot_dimension_numbers<[1], [1], [0], [0], [0, 0, 1, 0], [], []>} : vector<8x8xf32>, vector<8x8xf32>, vector<8x8xf32> -> vector<8x8xf32>
    %cst_73 = arith.constant dense<0xFF800000> : vector<8xf32>
    %100 = vector.multi_reduction <maximumf>, %99, %cst_73 [1] : vector<8x8xf32> to vector<8xf32>
    %101 = vector.shape_cast %100 : vector<8xf32> to vector<8x1xf32>
    %102 = vector.broadcast %101 : vector<8x1xf32> to vector<8x8xf32>
    %103 = arith.subf %99, %102 : vector<8x8xf32>
    %104 = math.exp %103 : vector<8x8xf32>
    %cst_74 = arith.constant dense<0.000000e+00> : vector<8xf32>
    %105 = vector.multi_reduction <add>, %104, %cst_74 [1] : vector<8x8xf32> to vector<8xf32>
    %106 = vector.shape_cast %105 : vector<8xf32> to vector<8x1xf32>
    %107 = tpu.reciprocal %106 {approx = true} : vector<8x1xf32> -> vector<8x1xf32>
    %108 = vector.broadcast %107 : vector<8x1xf32> to vector<8x8xf32>
    %109 = arith.mulf %104, %108 : vector<8x8xf32>
    %c3_75 = arith.constant 3 : index
    %c0_76 = arith.constant 0 : index
    %c0_77 = arith.constant 0 : index
    %110 = vector.load %arg15[%c3_75, %c0_76, %c0_77] : memref<4x8x8xf32, #tpu.memory_space<vmem>>, vector<1x8x8xf32>
    %111 = vector.shape_cast %110 : vector<1x8x8xf32> to vector<8x8xf32>
    %cst_78 = arith.constant dense<0.000000e+00> : vector<8x8xf32>
    %112 = tpu.matmul %109, %111, %cst_78 {dimension_numbers = #tpu.dot_dimension_numbers<[1], [0], [0], [1], [0, 0, 1, 1], [], []>} : vector<8x8xf32>, vector<8x8xf32>, vector<8x8xf32> -> vector<8x8xf32>
    %c3_79 = arith.constant 3 : index
    %c0_80 = arith.constant 0 : index
    %c0_81 = arith.constant 0 : index
    %113 = vector.load %arg9[%c3_79, %c0_80, %c0_81] : memref<4x8x32xf32, #tpu.memory_space<vmem>>, vector<1x8x32xf32>
    %114 = vector.shape_cast %113 : vector<1x8x32xf32> to vector<8x32xf32>
    %cst_82 = arith.constant dense<0.000000e+00> : vector<8x32xf32>
    %115 = tpu.matmul %112, %114, %cst_82 {dimension_numbers = #tpu.dot_dimension_numbers<[1], [0], [0], [1], [0, 0, 1, 1], [], []>} : vector<8x8xf32>, vector<8x32xf32>, vector<8x32xf32> -> vector<8x32xf32>
    %116 = arith.addf %89, %115 : vector<8x32xf32>
    %117 = arith.addf %7, %116 : vector<8x32xf32>
    %c0_83 = arith.constant 0 : index
    %c0_84 = arith.constant 0 : index
    %118 = vector.load %arg10[%c0_83, %c0_84] : memref<1x32xf32, #tpu.memory_space<vmem>>, vector<1x32xf32>
    %119 = vector.broadcast %118 : vector<1x32xf32> to vector<8x32xf32>
    %120 = arith.addf %117, %119 : vector<8x32xf32>
    %c0_85 = arith.constant 0 : index
    %c0_86 = arith.constant 0 : index
    %121 = vector.load %arg11[%c0_85, %c0_86] : memref<32x32xf32, #tpu.memory_space<vmem>>, vector<32x32xf32>
    %cst_87 = arith.constant dense<0.000000e+00> : vector<8x32xf32>
    %122 = tpu.matmul %120, %121, %cst_87 {dimension_numbers = #tpu.dot_dimension_numbers<[1], [0], [0], [1], [0, 0, 1, 1], [], []>} : vector<8x32xf32>, vector<32x32xf32>, vector<8x32xf32> -> vector<8x32xf32>
    %c0_88 = arith.constant 0 : index
    %c0_89 = arith.constant 0 : index
    %123 = vector.load %arg12[%c0_88, %c0_89] : memref<1x32xf32, #tpu.memory_space<vmem>>, vector<1x32xf32>
    %124 = vector.broadcast %123 : vector<1x32xf32> to vector<8x32xf32>
    %125 = arith.addf %122, %124 : vector<8x32xf32>
    %cst_90 = arith.constant 5.000000e-01 : f32
    %126 = vector.broadcast %cst_90 : f32 to vector<8x32xf32>
    %127 = arith.mulf %126, %125 : vector<8x32xf32>
    %cst_91 = arith.constant 0.707106769 : f32
    %128 = vector.broadcast %cst_91 : f32 to vector<8x32xf32>
    %129 = arith.mulf %125, %128 : vector<8x32xf32>
    %130 = math.erf %129 : vector<8x32xf32>
    %cst_92 = arith.constant 1.000000e+00 : f32
    %131 = vector.broadcast %cst_92 : f32 to vector<8x32xf32>
    %132 = arith.addf %131, %130 : vector<8x32xf32>
    %133 = arith.mulf %127, %132 : vector<8x32xf32>
    %134 = arith.addf %120, %133 : vector<8x32xf32>
    %c0_93 = arith.constant 0 : index
    %c0_94 = arith.constant 0 : index
    %c0_95 = arith.constant 0 : index
    %135 = vector.load %arg13[%c0_93, %c0_94, %c0_95] : memref<1x8x32xf32, #tpu.memory_space<vmem>>, vector<1x8x32xf32>
    %136 = vector.shape_cast %135 : vector<1x8x32xf32> to vector<8x32xf32>
    %137 = vector.shape_cast %134 : vector<8x32xf32> to vector<1x8x32xf32>
    tpu.vector_store %arg13[%c0_93, %c0_94, %c0_95], %137 {strides = array<i32>} : memref<1x8x32xf32, #tpu.memory_space<vmem>>, vector<1x8x32xf32>,
    return
  }
  func.func @transform_0(%arg0: i32, %arg1: i32) -> (i32, i32, i32) {
    %c0_i32 = arith.constant 0 : i32
    %c0_i32_0 = arith.constant 0 : i32
    %c0_i32_1 = arith.constant 0 : i32
    return %arg0, %c0_i32, %c0_i32_0 : i32, i32, i32
  }
  func.func @transform_1(%arg0: i32, %arg1: i32) -> (i32, i32, i32) {
    %c0_i32 = arith.constant 0 : i32
    %c0_i32_0 = arith.constant 0 : i32
    %c0_i32_1 = arith.constant 0 : i32
    %c0_i32_2 = arith.constant 0 : i32
    return %c0_i32, %c0_i32_0, %c0_i32_1 : i32, i32, i32
  }
  func.func @transform_2(%arg0: i32, %arg1: i32) -> (i32, i32, i32) {
    %c0_i32 = arith.constant 0 : i32
    %c0_i32_0 = arith.constant 0 : i32
    %c0_i32_1 = arith.constant 0 : i32
    %c0_i32_2 = arith.constant 0 : i32
    return %c0_i32, %c0_i32_0, %c0_i32_1 : i32, i32, i32
  }
  func.func @transform_3(%arg0: i32, %arg1: i32) -> (i32, i32, i32) {
    %c0_i32 = arith.constant 0 : i32
    %c0_i32_0 = arith.constant 0 : i32
    %c0_i32_1 = arith.constant 0 : i32
    %c0_i32_2 = arith.constant 0 : i32
    return %c0_i32, %c0_i32_0, %c0_i32_1 : i32, i32, i32
  }
  func.func @transform_4(%arg0: i32, %arg1: i32) -> (i32, i32, i32) {
    %c0_i32 = arith.constant 0 : i32
    %c0_i32_0 = arith.constant 0 : i32
    %c0_i32_1 = arith.constant 0 : i32
    %c0_i32_2 = arith.constant 0 : i32
    return %c0_i32, %c0_i32_0, %c0_i32_1 : i32, i32, i32
  }
  func.func @transform_5(%arg0: i32, %arg1: i32) -> (i32, i32, i32) {
    %c0_i32 = arith.constant 0 : i32
    %c0_i32_0 = arith.constant 0 : i32
    %c0_i32_1 = arith.constant 0 : i32
    %c0_i32_2 = arith.constant 0 : i32
    return %c0_i32, %c0_i32_0, %c0_i32_1 : i32, i32, i32
  }
  func.func @transform_6(%arg0: i32, %arg1: i32) -> (i32, i32, i32) {
    %c0_i32 = arith.constant 0 : i32
    %c0_i32_0 = arith.constant 0 : i32
    %c0_i32_1 = arith.constant 0 : i32
    %c0_i32_2 = arith.constant 0 : i32
    return %c0_i32, %c0_i32_0, %c0_i32_1 : i32, i32, i32
  }
  func.func @transform_7(%arg0: i32, %arg1: i32) -> (i32, i32, i32) {
    %c0_i32 = arith.constant 0 : i32
    %c0_i32_0 = arith.constant 0 : i32
    %c0_i32_1 = arith.constant 0 : i32
    %c0_i32_2 = arith.constant 0 : i32
    return %c0_i32, %c0_i32_0, %c0_i32_1 : i32, i32, i32
  }
  func.func @transform_8(%arg0: i32, %arg1: i32) -> (i32, i32) {
    %c0_i32 = arith.constant 0 : i32
    %c0_i32_0 = arith.constant 0 : i32
    %c0_i32_1 = arith.constant 0 : i32
    return %c0_i32, %c0_i32_0 : i32, i32
  }
  func.func @transform_9(%arg0: i32, %arg1: i32) -> (i32, i32) {
    %c0_i32 = arith.constant 0 : i32
    %c0_i32_0 = arith.constant 0 : i32
    %c0_i32_1 = arith.constant 0 : i32
    return %c0_i32, %c0_i32_0 : i32, i32
  }
  func.func @transform_10(%arg0: i32, %arg1: i32) -> (i32, i32) {
    %c0_i32 = arith.constant 0 : i32
    %c0_i32_0 = arith.constant 0 : i32
    %c0_i32_1 = arith.constant 0 : i32
    return %c0_i32, %c0_i32_0 : i32, i32
  }
  func.func @transform_11(%arg0: i32, %arg1: i32) -> (i32, i32, i32) {
    %c0_i32 = arith.constant 0 : i32
    %c0_i32_0 = arith.constant 0 : i32
    return %arg0, %arg1, %c0_i32 : i32, i32, i32
  }
}

module attributes {stable_mosaic.version = 11 : i64} {
  func.func @encode_block_kernel(%arg0: i32, %arg1: i32, %arg2: memref<1x8x32xf32, #tpu.memory_space<vmem>>, %arg3: memref<4x32x8xf32, #tpu.memory_space<vmem>>, %arg4: memref<4x1x8xf32, #tpu.memory_space<vmem>>, %arg5: memref<4x32x8xf32, #tpu.memory_space<vmem>>, %arg6: memref<4x1x8xf32, #tpu.memory_space<vmem>>, %arg7: memref<4x32x8xf32, #tpu.memory_space<vmem>>, %arg8: memref<4x1x8xf32, #tpu.memory_space<vmem>>, %arg9: memref<4x8x32xf32, #tpu.memory_space<vmem>>, %arg10: memref<1x32xf32, #tpu.memory_space<vmem>>, %arg11: memref<32x32xf32, #tpu.memory_space<vmem>>, %arg12: memref<1x32xf32, #tpu.memory_space<vmem>>, %arg13: memref<1x8x32xf32, #tpu.memory_space<vmem>>, %arg14: memref<4x8x8xf32, #tpu.memory_space<vmem>>, %arg15: memref<4x8x8xf32, #tpu.memory_space<vmem>>) attributes {dimension_semantics = [#tpu.dimension_semantics<parallel>, #tpu.dimension_semantics<arbitrary>], iteration_bounds = array<i64: 2, 1>, scalar_prefetch = 0 : i64, scratch_operands = 2 : i64, tpu.core_type = #tpu.core_type<tc>, window_params = [{transform_indices = @transform_0, window_bounds = array<i64: 1, 8, 32>}, {pipeline_mode = #tpu.pipeline_mode<synchronous>, transform_indices = @transform_1, window_bounds = array<i64: 4, 32, 8>}, {pipeline_mode = #tpu.pipeline_mode<synchronous>, transform_indices = @transform_2, window_bounds = array<i64: 4, 1, 8>}, {pipeline_mode = #tpu.pipeline_mode<synchronous>, transform_indices = @transform_3, window_bounds = array<i64: 4, 32, 8>}, {pipeline_mode = #tpu.pipeline_mode<synchronous>, transform_indices = @transform_4, window_bounds = array<i64: 4, 1, 8>}, {pipeline_mode = #tpu.pipeline_mode<synchronous>, transform_indices = @transform_5, window_bounds = array<i64: 4, 32, 8>}, {pipeline_mode = #tpu.pipeline_mode<synchronous>, transform_indices = @transform_6, window_bounds = array<i64: 4, 1, 8>}, {pipeline_mode = #tpu.pipeline_mode<synchronous>, transform_indices = @transform_7, window_bounds = array<i64: 4, 8, 32>}, {pipeline_mode = #tpu.pipeline_mode<synchronous>, transform_indices = @transform_8, window_bounds = array<i64: 1, 32>}, {pipeline_mode = #tpu.pipeline_mode<synchronous>, transform_indices = @transform_9, window_bounds = array<i64: 32, 32>}, {pipeline_mode = #tpu.pipeline_mode<synchronous>, transform_indices = @transform_10, window_bounds = array<i64: 1, 32>}, {transform_indices = @transform_11, window_bounds = array<i64: 1, 8, 32>}]} {
    %c0_i32 = arith.constant 0 : i32
    %0 = arith.cmpi eq, %arg1, %c0_i32 : i32
    %1 = arith.extui %0 : i1 to i32
    %c0_i32_0 = arith.constant 0 : i32
    %2 = arith.cmpi ne, %1, %c0_i32_0 : i32
    scf.if %2 {
      %c0_96 = arith.constant 0 : index
      %c0_97 = arith.constant 0 : index
      %c0_98 = arith.constant 0 : index
      %138 = vector.load %arg2[%c0_96, %c0_97, %c0_98] : memref<1x8x32xf32, #tpu.memory_space<vmem>>, vector<1x8x32xf32>
      %139 = vector.shape_cast %138 : vector<1x8x32xf32> to vector<8x32xf32>
      %c0_99 = arith.constant 0 : index
      %c0_100 = arith.constant 0 : index
      %c0_101 = arith.constant 0 : index
      %140 = vector.load %arg5[%c0_99, %c0_100, %c0_101] : memref<4x32x8xf32, #tpu.memory_space<vmem>>, vector<1x32x8xf32>
      %141 = vector.shape_cast %140 : vector<1x32x8xf32> to vector<32x8xf32>
      %cst_102 = arith.constant dense<0.000000e+00> : vector<8x8xf32>
      %142 = tpu.matmul %139, %141, %cst_102 {dimension_numbers = #tpu.dot_dimension_numbers<[1], [0], [0], [1], [0, 0, 1, 1], [], []>} : vector<8x32xf32>, vector<32x8xf32>, vector<8x8xf32> -> vector<8x8xf32>
      %c0_103 = arith.constant 0 : index
      %c0_104 = arith.constant 0 : index
      %c0_105 = arith.constant 0 : index
      %143 = vector.load %arg6[%c0_103, %c0_104, %c0_105] : memref<4x1x8xf32, #tpu.memory_space<vmem>>, vector<1x1x8xf32>
      %144 = vector.shape_cast %143 : vector<1x1x8xf32> to vector<1x8xf32>
      %145 = vector.broadcast %144 : vector<1x8xf32> to vector<8x8xf32>
      %146 = arith.addf %142, %145 : vector<8x8xf32>
      %c0_106 = arith.constant 0 : index
      %c0_107 = arith.constant 0 : index
      %c0_108 = arith.constant 0 : index
      %147 = vector.load %arg7[%c0_106, %c0_107, %c0_108] : memref<4x32x8xf32, #tpu.memory_space<vmem>>, vector<1x32x8xf32>
      %148 = vector.shape_cast %147 : vector<1x32x8xf32> to vector<32x8xf32>
      %cst_109 = arith.constant dense<0.000000e+00> : vector<8x8xf32>
      %149 = tpu.matmul %139, %148, %cst_109 {dimension_numbers = #tpu.dot_dimension_numbers<[1], [0], [0], [1], [0, 0, 1, 1], [], []>} : vector<8x32xf32>, vector<32x8xf32>, vector<8x8xf32> -> vector<8x8xf32>
      %c0_110 = arith.constant 0 : index
      %c0_111 = arith.constant 0 : index
      %c0_112 = arith.constant 0 : index
      %150 = vector.load %arg8[%c0_110, %c0_111, %c0_112] : memref<4x1x8xf32, #tpu.memory_space<vmem>>, vector<1x1x8xf32>
      %151 = vector.shape_cast %150 : vector<1x1x8xf32> to vector<1x8xf32>
      %152 = vector.broadcast %151 : vector<1x8xf32> to vector<8x8xf32>
      %153 = arith.addf %149, %152 : vector<8x8xf32>
      %c0_113 = arith.constant 0 : index
      %c0_114 = arith.constant 0 : index
      %c0_115 = arith.constant 0 : index
      %154 = vector.load %arg14[%c0_113, %c0_114, %c0_115] : memref<4x8x8xf32, #tpu.memory_space<vmem>>, vector<1x8x8xf32>
      %155 = vector.shape_cast %154 : vector<1x8x8xf32> to vector<8x8xf32>
      %156 = vector.shape_cast %146 : vector<8x8xf32> to vector<1x8x8xf32>
      tpu.vector_store %arg14[%c0_113, %c0_114, %c0_115], %156 {strides = array<i32>} : memref<4x8x8xf32, #tpu.memory_space<vmem>>, vector<1x8x8xf32>,
      %c0_116 = arith.constant 0 : index
      %c0_117 = arith.constant 0 : index
      %c0_118 = arith.constant 0 : index
      %157 = vector.load %arg15[%c0_116, %c0_117, %c0_118] : memref<4x8x8xf32, #tpu.memory_space<vmem>>, vector<1x8x8xf32>
      %158 = vector.shape_cast %157 : vector<1x8x8xf32> to vector<8x8xf32>
      %159 = vector.shape_cast %153 : vector<8x8xf32> to vector<1x8x8xf32>
      tpu.vector_store %arg15[%c0_116, %c0_117, %c0_118], %159 {strides = array<i32>} : memref<4x8x8xf32, #tpu.memory_space<vmem>>, vector<1x8x8xf32>,
      %c1_119 = arith.constant 1 : index
      %c0_120 = arith.constant 0 : index
      %c0_121 = arith.constant 0 : index
      %160 = vector.load %arg5[%c1_119, %c0_120, %c0_121] : memref<4x32x8xf32, #tpu.memory_space<vmem>>, vector<1x32x8xf32>
      %161 = vector.shape_cast %160 : vector<1x32x8xf32> to vector<32x8xf32>
      %cst_122 = arith.constant dense<0.000000e+00> : vector<8x8xf32>
      %162 = tpu.matmul %139, %161, %cst_122 {dimension_numbers = #tpu.dot_dimension_numbers<[1], [0], [0], [1], [0, 0, 1, 1], [], []>} : vector<8x32xf32>, vector<32x8xf32>, vector<8x8xf32> -> vector<8x8xf32>
      %c1_123 = arith.constant 1 : index
      %c0_124 = arith.constant 0 : index
      %c0_125 = arith.constant 0 : index
      %163 = vector.load %arg6[%c1_123, %c0_124, %c0_125] : memref<4x1x8xf32, #tpu.memory_space<vmem>>, vector<1x1x8xf32>
      %164 = vector.shape_cast %163 : vector<1x1x8xf32> to vector<1x8xf32>
      %165 = vector.broadcast %164 : vector<1x8xf32> to vector<8x8xf32>
      %166 = arith.addf %162, %165 : vector<8x8xf32>
      %c1_126 = arith.constant 1 : index
      %c0_127 = arith.constant 0 : index
      %c0_128 = arith.constant 0 : index
      %167 = vector.load %arg7[%c1_126, %c0_127, %c0_128] : memref<4x32x8xf32, #tpu.memory_space<vmem>>, vector<1x32x8xf32>
      %168 = vector.shape_cast %167 : vector<1x32x8xf32> to vector<32x8xf32>
      %cst_129 = arith.constant dense<0.000000e+00> : vector<8x8xf32>
      %169 = tpu.matmul %139, %168, %cst_129 {dimension_numbers = #tpu.dot_dimension_numbers<[1], [0], [0], [1], [0, 0, 1, 1], [], []>} : vector<8x32xf32>, vector<32x8xf32>, vector<8x8xf32> -> vector<8x8xf32>
      %c1_130 = arith.constant 1 : index
      %c0_131 = arith.constant 0 : index
      %c0_132 = arith.constant 0 : index
      %170 = vector.load %arg8[%c1_130, %c0_131, %c0_132] : memref<4x1x8xf32, #tpu.memory_space<vmem>>, vector<1x1x8xf32>
      %171 = vector.shape_cast %170 : vector<1x1x8xf32> to vector<1x8xf32>
      %172 = vector.broadcast %171 : vector<1x8xf32> to vector<8x8xf32>
      %173 = arith.addf %169, %172 : vector<8x8xf32>
      %c1_133 = arith.constant 1 : index
      %c0_134 = arith.constant 0 : index
      %c0_135 = arith.constant 0 : index
      %174 = vector.load %arg14[%c1_133, %c0_134, %c0_135] : memref<4x8x8xf32, #tpu.memory_space<vmem>>, vector<1x8x8xf32>
      %175 = vector.shape_cast %174 : vector<1x8x8xf32> to vector<8x8xf32>
      %176 = vector.shape_cast %166 : vector<8x8xf32> to vector<1x8x8xf32>
      tpu.vector_store %arg14[%c1_133, %c0_134, %c0_135], %176 {strides = array<i32>} : memref<4x8x8xf32, #tpu.memory_space<vmem>>, vector<1x8x8xf32>,
      %c1_136 = arith.constant 1 : index
      %c0_137 = arith.constant 0 : index
      %c0_138 = arith.constant 0 : index
      %177 = vector.load %arg15[%c1_136, %c0_137, %c0_138] : memref<4x8x8xf32, #tpu.memory_space<vmem>>, vector<1x8x8xf32>
      %178 = vector.shape_cast %177 : vector<1x8x8xf32> to vector<8x8xf32>
      %179 = vector.shape_cast %173 : vector<8x8xf32> to vector<1x8x8xf32>
      tpu.vector_store %arg15[%c1_136, %c0_137, %c0_138], %179 {strides = array<i32>} : memref<4x8x8xf32, #tpu.memory_space<vmem>>, vector<1x8x8xf32>,
      %c2_139 = arith.constant 2 : index
      %c0_140 = arith.constant 0 : index
      %c0_141 = arith.constant 0 : index
      %180 = vector.load %arg5[%c2_139, %c0_140, %c0_141] : memref<4x32x8xf32, #tpu.memory_space<vmem>>, vector<1x32x8xf32>
      %181 = vector.shape_cast %180 : vector<1x32x8xf32> to vector<32x8xf32>
      %cst_142 = arith.constant dense<0.000000e+00> : vector<8x8xf32>
      %182 = tpu.matmul %139, %181, %cst_142 {dimension_numbers = #tpu.dot_dimension_numbers<[1], [0], [0], [1], [0, 0, 1, 1], [], []>} : vector<8x32xf32>, vector<32x8xf32>, vector<8x8xf32> -> vector<8x8xf32>
      %c2_143 = arith.constant 2 : index
      %c0_144 = arith.constant 0 : index
      %c0_145 = arith.constant 0 : index
      %183 = vector.load %arg6[%c2_143, %c0_144, %c0_145] : memref<4x1x8xf32, #tpu.memory_space<vmem>>, vector<1x1x8xf32>
      %184 = vector.shape_cast %183 : vector<1x1x8xf32> to vector<1x8xf32>
      %185 = vector.broadcast %184 : vector<1x8xf32> to vector<8x8xf32>
      %186 = arith.addf %182, %185 : vector<8x8xf32>
      %c2_146 = arith.constant 2 : index
      %c0_147 = arith.constant 0 : index
      %c0_148 = arith.constant 0 : index
      %187 = vector.load %arg7[%c2_146, %c0_147, %c0_148] : memref<4x32x8xf32, #tpu.memory_space<vmem>>, vector<1x32x8xf32>
      %188 = vector.shape_cast %187 : vector<1x32x8xf32> to vector<32x8xf32>
      %cst_149 = arith.constant dense<0.000000e+00> : vector<8x8xf32>
      %189 = tpu.matmul %139, %188, %cst_149 {dimension_numbers = #tpu.dot_dimension_numbers<[1], [0], [0], [1], [0, 0, 1, 1], [], []>} : vector<8x32xf32>, vector<32x8xf32>, vector<8x8xf32> -> vector<8x8xf32>
      %c2_150 = arith.constant 2 : index
      %c0_151 = arith.constant 0 : index
      %c0_152 = arith.constant 0 : index
      %190 = vector.load %arg8[%c2_150, %c0_151, %c0_152] : memref<4x1x8xf32, #tpu.memory_space<vmem>>, vector<1x1x8xf32>
      %191 = vector.shape_cast %190 : vector<1x1x8xf32> to vector<1x8xf32>
      %192 = vector.broadcast %191 : vector<1x8xf32> to vector<8x8xf32>
      %193 = arith.addf %189, %192 : vector<8x8xf32>
      %c2_153 = arith.constant 2 : index
      %c0_154 = arith.constant 0 : index
      %c0_155 = arith.constant 0 : index
      %194 = vector.load %arg14[%c2_153, %c0_154, %c0_155] : memref<4x8x8xf32, #tpu.memory_space<vmem>>, vector<1x8x8xf32>
      %195 = vector.shape_cast %194 : vector<1x8x8xf32> to vector<8x8xf32>
      %196 = vector.shape_cast %186 : vector<8x8xf32> to vector<1x8x8xf32>
      tpu.vector_store %arg14[%c2_153, %c0_154, %c0_155], %196 {strides = array<i32>} : memref<4x8x8xf32, #tpu.memory_space<vmem>>, vector<1x8x8xf32>,
      %c2_156 = arith.constant 2 : index
      %c0_157 = arith.constant 0 : index
      %c0_158 = arith.constant 0 : index
      %197 = vector.load %arg15[%c2_156, %c0_157, %c0_158] : memref<4x8x8xf32, #tpu.memory_space<vmem>>, vector<1x8x8xf32>
      %198 = vector.shape_cast %197 : vector<1x8x8xf32> to vector<8x8xf32>
      %199 = vector.shape_cast %193 : vector<8x8xf32> to vector<1x8x8xf32>
      tpu.vector_store %arg15[%c2_156, %c0_157, %c0_158], %199 {strides = array<i32>} : memref<4x8x8xf32, #tpu.memory_space<vmem>>, vector<1x8x8xf32>,
      %c3_159 = arith.constant 3 : index
      %c0_160 = arith.constant 0 : index
      %c0_161 = arith.constant 0 : index
      %200 = vector.load %arg5[%c3_159, %c0_160, %c0_161] : memref<4x32x8xf32, #tpu.memory_space<vmem>>, vector<1x32x8xf32>
      %201 = vector.shape_cast %200 : vector<1x32x8xf32> to vector<32x8xf32>
      %cst_162 = arith.constant dense<0.000000e+00> : vector<8x8xf32>
      %202 = tpu.matmul %139, %201, %cst_162 {dimension_numbers = #tpu.dot_dimension_numbers<[1], [0], [0], [1], [0, 0, 1, 1], [], []>} : vector<8x32xf32>, vector<32x8xf32>, vector<8x8xf32> -> vector<8x8xf32>
      %c3_163 = arith.constant 3 : index
      %c0_164 = arith.constant 0 : index
      %c0_165 = arith.constant 0 : index
      %203 = vector.load %arg6[%c3_163, %c0_164, %c0_165] : memref<4x1x8xf32, #tpu.memory_space<vmem>>, vector<1x1x8xf32>
      %204 = vector.shape_cast %203 : vector<1x1x8xf32> to vector<1x8xf32>
      %205 = vector.broadcast %204 : vector<1x8xf32> to vector<8x8xf32>
      %206 = arith.addf %202, %205 : vector<8x8xf32>
      %c3_166 = arith.constant 3 : index
      %c0_167 = arith.constant 0 : index
      %c0_168 = arith.constant 0 : index
      %207 = vector.load %arg7[%c3_166, %c0_167, %c0_168] : memref<4x32x8xf32, #tpu.memory_space<vmem>>, vector<1x32x8xf32>
      %208 = vector.shape_cast %207 : vector<1x32x8xf32> to vector<32x8xf32>
      %cst_169 = arith.constant dense<0.000000e+00> : vector<8x8xf32>
      %209 = tpu.matmul %139, %208, %cst_169 {dimension_numbers = #tpu.dot_dimension_numbers<[1], [0], [0], [1], [0, 0, 1, 1], [], []>} : vector<8x32xf32>, vector<32x8xf32>, vector<8x8xf32> -> vector<8x8xf32>
      %c3_170 = arith.constant 3 : index
      %c0_171 = arith.constant 0 : index
      %c0_172 = arith.constant 0 : index
      %210 = vector.load %arg8[%c3_170, %c0_171, %c0_172] : memref<4x1x8xf32, #tpu.memory_space<vmem>>, vector<1x1x8xf32>
      %211 = vector.shape_cast %210 : vector<1x1x8xf32> to vector<1x8xf32>
      %212 = vector.broadcast %211 : vector<1x8xf32> to vector<8x8xf32>
      %213 = arith.addf %209, %212 : vector<8x8xf32>
      %c3_173 = arith.constant 3 : index
      %c0_174 = arith.constant 0 : index
      %c0_175 = arith.constant 0 : index
      %214 = vector.load %arg14[%c3_173, %c0_174, %c0_175] : memref<4x8x8xf32, #tpu.memory_space<vmem>>, vector<1x8x8xf32>
      %215 = vector.shape_cast %214 : vector<1x8x8xf32> to vector<8x8xf32>
      %216 = vector.shape_cast %206 : vector<8x8xf32> to vector<1x8x8xf32>
      tpu.vector_store %arg14[%c3_173, %c0_174, %c0_175], %216 {strides = array<i32>} : memref<4x8x8xf32, #tpu.memory_space<vmem>>, vector<1x8x8xf32>,
      %c3_176 = arith.constant 3 : index
      %c0_177 = arith.constant 0 : index
      %c0_178 = arith.constant 0 : index
      %217 = vector.load %arg15[%c3_176, %c0_177, %c0_178] : memref<4x8x8xf32, #tpu.memory_space<vmem>>, vector<1x8x8xf32>
      %218 = vector.shape_cast %217 : vector<1x8x8xf32> to vector<8x8xf32>
      %219 = vector.shape_cast %213 : vector<8x8xf32> to vector<1x8x8xf32>
      tpu.vector_store %arg15[%c3_176, %c0_177, %c0_178], %219 {strides = array<i32>} : memref<4x8x8xf32, #tpu.memory_space<vmem>>, vector<1x8x8xf32>,
    } else {
    }
    %c8_i32 = arith.constant 8 : i32
    %3 = arith.muli %arg1, %c8_i32 : i32
    %4 = tpu.assume_multiple %3, 8 : i32
    %c0 = arith.constant 0 : index
    %5 = arith.index_cast %4 : i32 to index
    %c0_1 = arith.constant 0 : index
    %6 = vector.load %arg2[%c0, %5, %c0_1] : memref<1x8x32xf32, #tpu.memory_space<vmem>>, vector<1x8x32xf32>
    %7 = vector.shape_cast %6 : vector<1x8x32xf32> to vector<8x32xf32>
    %cst = arith.constant 0.000000e+00 : f32
    %8 = vector.broadcast %cst : f32 to vector<8x32xf32>
    %c0_2 = arith.constant 0 : index
    %c0_3 = arith.constant 0 : index
    %c0_4 = arith.constant 0 : index
    %9 = vector.load %arg3[%c0_2, %c0_3, %c0_4] : memref<4x32x8xf32, #tpu.memory_space<vmem>>, vector<1x32x8xf32>
    %10 = vector.shape_cast %9 : vector<1x32x8xf32> to vector<32x8xf32>
    %cst_5 = arith.constant dense<0.000000e+00> : vector<8x8xf32>
    %11 = tpu.matmul %7, %10, %cst_5 {dimension_numbers = #tpu.dot_dimension_numbers<[1], [0], [0], [1], [0, 0, 1, 1], [], []>} : vector<8x32xf32>, vector<32x8xf32>, vector<8x8xf32> -> vector<8x8xf32>
    %c0_6 = arith.constant 0 : index
    %c0_7 = arith.constant 0 : index
    %c0_8 = arith.constant 0 : index
    %12 = vector.load %arg4[%c0_6, %c0_7, %c0_8] : memref<4x1x8xf32, #tpu.memory_space<vmem>>, vector<1x1x8xf32>
    %13 = vector.shape_cast %12 : vector<1x1x8xf32> to vector<1x8xf32>
    %14 = vector.broadcast %13 : vector<1x8xf32> to vector<8x8xf32>
    %15 = arith.addf %11, %14 : vector<8x8xf32>
    %c0_9 = arith.constant 0 : index
    %c0_10 = arith.constant 0 : index
    %c0_11 = arith.constant 0 : index
    %16 = vector.load %arg14[%c0_9, %c0_10, %c0_11] : memref<4x8x8xf32, #tpu.memory_space<vmem>>, vector<1x8x8xf32>
    %17 = vector.shape_cast %16 : vector<1x8x8xf32> to vector<8x8xf32>
    %cst_12 = arith.constant dense<0.000000e+00> : vector<8x8xf32>
    %18 = tpu.matmul %15, %17, %cst_12 {dimension_numbers = #tpu.dot_dimension_numbers<[1], [1], [0], [0], [0, 0, 1, 0], [], []>} : vector<8x8xf32>, vector<8x8xf32>, vector<8x8xf32> -> vector<8x8xf32>
    %cst_13 = arith.constant dense<0xFF800000> : vector<8xf32>
    %19 = vector.multi_reduction <maximumf>, %18, %cst_13 [1] : vector<8x8xf32> to vector<8xf32>
    %20 = vector.shape_cast %19 : vector<8xf32> to vector<8x1xf32>
    %21 = vector.broadcast %20 : vector<8x1xf32> to vector<8x8xf32>
    %22 = arith.subf %18, %21 : vector<8x8xf32>
    %23 = math.exp %22 : vector<8x8xf32>
    %cst_14 = arith.constant dense<0.000000e+00> : vector<8xf32>
    %24 = vector.multi_reduction <add>, %23, %cst_14 [1] : vector<8x8xf32> to vector<8xf32>
    %25 = vector.shape_cast %24 : vector<8xf32> to vector<8x1xf32>
    %26 = tpu.reciprocal %25 {approx = true} : vector<8x1xf32> -> vector<8x1xf32>
    %27 = vector.broadcast %26 : vector<8x1xf32> to vector<8x8xf32>
    %28 = arith.mulf %23, %27 : vector<8x8xf32>
    %c0_15 = arith.constant 0 : index
    %c0_16 = arith.constant 0 : index
    %c0_17 = arith.constant 0 : index
    %29 = vector.load %arg15[%c0_15, %c0_16, %c0_17] : memref<4x8x8xf32, #tpu.memory_space<vmem>>, vector<1x8x8xf32>
    %30 = vector.shape_cast %29 : vector<1x8x8xf32> to vector<8x8xf32>
    %cst_18 = arith.constant dense<0.000000e+00> : vector<8x8xf32>
    %31 = tpu.matmul %28, %30, %cst_18 {dimension_numbers = #tpu.dot_dimension_numbers<[1], [0], [0], [1], [0, 0, 1, 1], [], []>} : vector<8x8xf32>, vector<8x8xf32>, vector<8x8xf32> -> vector<8x8xf32>
    %c0_19 = arith.constant 0 : index
    %c0_20 = arith.constant 0 : index
    %c0_21 = arith.constant 0 : index
    %32 = vector.load %arg9[%c0_19, %c0_20, %c0_21] : memref<4x8x32xf32, #tpu.memory_space<vmem>>, vector<1x8x32xf32>
    %33 = vector.shape_cast %32 : vector<1x8x32xf32> to vector<8x32xf32>
    %cst_22 = arith.constant dense<0.000000e+00> : vector<8x32xf32>
    %34 = tpu.matmul %31, %33, %cst_22 {dimension_numbers = #tpu.dot_dimension_numbers<[1], [0], [0], [1], [0, 0, 1, 1], [], []>} : vector<8x8xf32>, vector<8x32xf32>, vector<8x32xf32> -> vector<8x32xf32>
    %35 = arith.addf %8, %34 : vector<8x32xf32>
    %c1 = arith.constant 1 : index
    %c0_23 = arith.constant 0 : index
    %c0_24 = arith.constant 0 : index
    %36 = vector.load %arg3[%c1, %c0_23, %c0_24] : memref<4x32x8xf32, #tpu.memory_space<vmem>>, vector<1x32x8xf32>
    %37 = vector.shape_cast %36 : vector<1x32x8xf32> to vector<32x8xf32>
    %cst_25 = arith.constant dense<0.000000e+00> : vector<8x8xf32>
    %38 = tpu.matmul %7, %37, %cst_25 {dimension_numbers = #tpu.dot_dimension_numbers<[1], [0], [0], [1], [0, 0, 1, 1], [], []>} : vector<8x32xf32>, vector<32x8xf32>, vector<8x8xf32> -> vector<8x8xf32>
    %c1_26 = arith.constant 1 : index
    %c0_27 = arith.constant 0 : index
    %c0_28 = arith.constant 0 : index
    %39 = vector.load %arg4[%c1_26, %c0_27, %c0_28] : memref<4x1x8xf32, #tpu.memory_space<vmem>>, vector<1x1x8xf32>
    %40 = vector.shape_cast %39 : vector<1x1x8xf32> to vector<1x8xf32>
    %41 = vector.broadcast %40 : vector<1x8xf32> to vector<8x8xf32>
    %42 = arith.addf %38, %41 : vector<8x8xf32>
    %c1_29 = arith.constant 1 : index
    %c0_30 = arith.constant 0 : index
    %c0_31 = arith.constant 0 : index
    %43 = vector.load %arg14[%c1_29, %c0_30, %c0_31] : memref<4x8x8xf32, #tpu.memory_space<vmem>>, vector<1x8x8xf32>
    %44 = vector.shape_cast %43 : vector<1x8x8xf32> to vector<8x8xf32>
    %cst_32 = arith.constant dense<0.000000e+00> : vector<8x8xf32>
    %45 = tpu.matmul %42, %44, %cst_32 {dimension_numbers = #tpu.dot_dimension_numbers<[1], [1], [0], [0], [0, 0, 1, 0], [], []>} : vector<8x8xf32>, vector<8x8xf32>, vector<8x8xf32> -> vector<8x8xf32>
    %cst_33 = arith.constant dense<0xFF800000> : vector<8xf32>
    %46 = vector.multi_reduction <maximumf>, %45, %cst_33 [1] : vector<8x8xf32> to vector<8xf32>
    %47 = vector.shape_cast %46 : vector<8xf32> to vector<8x1xf32>
    %48 = vector.broadcast %47 : vector<8x1xf32> to vector<8x8xf32>
    %49 = arith.subf %45, %48 : vector<8x8xf32>
    %50 = math.exp %49 : vector<8x8xf32>
    %cst_34 = arith.constant dense<0.000000e+00> : vector<8xf32>
    %51 = vector.multi_reduction <add>, %50, %cst_34 [1] : vector<8x8xf32> to vector<8xf32>
    %52 = vector.shape_cast %51 : vector<8xf32> to vector<8x1xf32>
    %53 = tpu.reciprocal %52 {approx = true} : vector<8x1xf32> -> vector<8x1xf32>
    %54 = vector.broadcast %53 : vector<8x1xf32> to vector<8x8xf32>
    %55 = arith.mulf %50, %54 : vector<8x8xf32>
    %c1_35 = arith.constant 1 : index
    %c0_36 = arith.constant 0 : index
    %c0_37 = arith.constant 0 : index
    %56 = vector.load %arg15[%c1_35, %c0_36, %c0_37] : memref<4x8x8xf32, #tpu.memory_space<vmem>>, vector<1x8x8xf32>
    %57 = vector.shape_cast %56 : vector<1x8x8xf32> to vector<8x8xf32>
    %cst_38 = arith.constant dense<0.000000e+00> : vector<8x8xf32>
    %58 = tpu.matmul %55, %57, %cst_38 {dimension_numbers = #tpu.dot_dimension_numbers<[1], [0], [0], [1], [0, 0, 1, 1], [], []>} : vector<8x8xf32>, vector<8x8xf32>, vector<8x8xf32> -> vector<8x8xf32>
    %c1_39 = arith.constant 1 : index
    %c0_40 = arith.constant 0 : index
    %c0_41 = arith.constant 0 : index
    %59 = vector.load %arg9[%c1_39, %c0_40, %c0_41] : memref<4x8x32xf32, #tpu.memory_space<vmem>>, vector<1x8x32xf32>
    %60 = vector.shape_cast %59 : vector<1x8x32xf32> to vector<8x32xf32>
    %cst_42 = arith.constant dense<0.000000e+00> : vector<8x32xf32>
    %61 = tpu.matmul %58, %60, %cst_42 {dimension_numbers = #tpu.dot_dimension_numbers<[1], [0], [0], [1], [0, 0, 1, 1], [], []>} : vector<8x8xf32>, vector<8x32xf32>, vector<8x32xf32> -> vector<8x32xf32>
    %62 = arith.addf %35, %61 : vector<8x32xf32>
    %c2 = arith.constant 2 : index
    %c0_43 = arith.constant 0 : index
    %c0_44 = arith.constant 0 : index
    %63 = vector.load %arg3[%c2, %c0_43, %c0_44] : memref<4x32x8xf32, #tpu.memory_space<vmem>>, vector<1x32x8xf32>
    %64 = vector.shape_cast %63 : vector<1x32x8xf32> to vector<32x8xf32>
    %cst_45 = arith.constant dense<0.000000e+00> : vector<8x8xf32>
    %65 = tpu.matmul %7, %64, %cst_45 {dimension_numbers = #tpu.dot_dimension_numbers<[1], [0], [0], [1], [0, 0, 1, 1], [], []>} : vector<8x32xf32>, vector<32x8xf32>, vector<8x8xf32> -> vector<8x8xf32>
    %c2_46 = arith.constant 2 : index
    %c0_47 = arith.constant 0 : index
    %c0_48 = arith.constant 0 : index
    %66 = vector.load %arg4[%c2_46, %c0_47, %c0_48] : memref<4x1x8xf32, #tpu.memory_space<vmem>>, vector<1x1x8xf32>
    %67 = vector.shape_cast %66 : vector<1x1x8xf32> to vector<1x8xf32>
    %68 = vector.broadcast %67 : vector<1x8xf32> to vector<8x8xf32>
    %69 = arith.addf %65, %68 : vector<8x8xf32>
    %c2_49 = arith.constant 2 : index
    %c0_50 = arith.constant 0 : index
    %c0_51 = arith.constant 0 : index
    %70 = vector.load %arg14[%c2_49, %c0_50, %c0_51] : memref<4x8x8xf32, #tpu.memory_space<vmem>>, vector<1x8x8xf32>
    %71 = vector.shape_cast %70 : vector<1x8x8xf32> to vector<8x8xf32>
    %cst_52 = arith.constant dense<0.000000e+00> : vector<8x8xf32>
    %72 = tpu.matmul %69, %71, %cst_52 {dimension_numbers = #tpu.dot_dimension_numbers<[1], [1], [0], [0], [0, 0, 1, 0], [], []>} : vector<8x8xf32>, vector<8x8xf32>, vector<8x8xf32> -> vector<8x8xf32>
    %cst_53 = arith.constant dense<0xFF800000> : vector<8xf32>
    %73 = vector.multi_reduction <maximumf>, %72, %cst_53 [1] : vector<8x8xf32> to vector<8xf32>
    %74 = vector.shape_cast %73 : vector<8xf32> to vector<8x1xf32>
    %75 = vector.broadcast %74 : vector<8x1xf32> to vector<8x8xf32>
    %76 = arith.subf %72, %75 : vector<8x8xf32>
    %77 = math.exp %76 : vector<8x8xf32>
    %cst_54 = arith.constant dense<0.000000e+00> : vector<8xf32>
    %78 = vector.multi_reduction <add>, %77, %cst_54 [1] : vector<8x8xf32> to vector<8xf32>
    %79 = vector.shape_cast %78 : vector<8xf32> to vector<8x1xf32>
    %80 = tpu.reciprocal %79 {approx = true} : vector<8x1xf32> -> vector<8x1xf32>
    %81 = vector.broadcast %80 : vector<8x1xf32> to vector<8x8xf32>
    %82 = arith.mulf %77, %81 : vector<8x8xf32>
    %c2_55 = arith.constant 2 : index
    %c0_56 = arith.constant 0 : index
    %c0_57 = arith.constant 0 : index
    %83 = vector.load %arg15[%c2_55, %c0_56, %c0_57] : memref<4x8x8xf32, #tpu.memory_space<vmem>>, vector<1x8x8xf32>
    %84 = vector.shape_cast %83 : vector<1x8x8xf32> to vector<8x8xf32>
    %cst_58 = arith.constant dense<0.000000e+00> : vector<8x8xf32>
    %85 = tpu.matmul %82, %84, %cst_58 {dimension_numbers = #tpu.dot_dimension_numbers<[1], [0], [0], [1], [0, 0, 1, 1], [], []>} : vector<8x8xf32>, vector<8x8xf32>, vector<8x8xf32> -> vector<8x8xf32>
    %c2_59 = arith.constant 2 : index
    %c0_60 = arith.constant 0 : index
    %c0_61 = arith.constant 0 : index
    %86 = vector.load %arg9[%c2_59, %c0_60, %c0_61] : memref<4x8x32xf32, #tpu.memory_space<vmem>>, vector<1x8x32xf32>
    %87 = vector.shape_cast %86 : vector<1x8x32xf32> to vector<8x32xf32>
    %cst_62 = arith.constant dense<0.000000e+00> : vector<8x32xf32>
    %88 = tpu.matmul %85, %87, %cst_62 {dimension_numbers = #tpu.dot_dimension_numbers<[1], [0], [0], [1], [0, 0, 1, 1], [], []>} : vector<8x8xf32>, vector<8x32xf32>, vector<8x32xf32> -> vector<8x32xf32>
    %89 = arith.addf %62, %88 : vector<8x32xf32>
    %c3 = arith.constant 3 : index
    %c0_63 = arith.constant 0 : index
    %c0_64 = arith.constant 0 : index
    %90 = vector.load %arg3[%c3, %c0_63, %c0_64] : memref<4x32x8xf32, #tpu.memory_space<vmem>>, vector<1x32x8xf32>
    %91 = vector.shape_cast %90 : vector<1x32x8xf32> to vector<32x8xf32>
    %cst_65 = arith.constant dense<0.000000e+00> : vector<8x8xf32>
    %92 = tpu.matmul %7, %91, %cst_65 {dimension_numbers = #tpu.dot_dimension_numbers<[1], [0], [0], [1], [0, 0, 1, 1], [], []>} : vector<8x32xf32>, vector<32x8xf32>, vector<8x8xf32> -> vector<8x8xf32>
    %c3_66 = arith.constant 3 : index
    %c0_67 = arith.constant 0 : index
    %c0_68 = arith.constant 0 : index
    %93 = vector.load %arg4[%c3_66, %c0_67, %c0_68] : memref<4x1x8xf32, #tpu.memory_space<vmem>>, vector<1x1x8xf32>
    %94 = vector.shape_cast %93 : vector<1x1x8xf32> to vector<1x8xf32>
    %95 = vector.broadcast %94 : vector<1x8xf32> to vector<8x8xf32>
    %96 = arith.addf %92, %95 : vector<8x8xf32>
    %c3_69 = arith.constant 3 : index
    %c0_70 = arith.constant 0 : index
    %c0_71 = arith.constant 0 : index
    %97 = vector.load %arg14[%c3_69, %c0_70, %c0_71] : memref<4x8x8xf32, #tpu.memory_space<vmem>>, vector<1x8x8xf32>
    %98 = vector.shape_cast %97 : vector<1x8x8xf32> to vector<8x8xf32>
    %cst_72 = arith.constant dense<0.000000e+00> : vector<8x8xf32>
    %99 = tpu.matmul %96, %98, %cst_72 {dimension_numbers = #tpu.dot_dimension_numbers<[1], [1], [0], [0], [0, 0, 1, 0], [], []>} : vector<8x8xf32>, vector<8x8xf32>, vector<8x8xf32> -> vector<8x8xf32>
    %cst_73 = arith.constant dense<0xFF800000> : vector<8xf32>
    %100 = vector.multi_reduction <maximumf>, %99, %cst_73 [1] : vector<8x8xf32> to vector<8xf32>
    %101 = vector.shape_cast %100 : vector<8xf32> to vector<8x1xf32>
    %102 = vector.broadcast %101 : vector<8x1xf32> to vector<8x8xf32>
    %103 = arith.subf %99, %102 : vector<8x8xf32>
    %104 = math.exp %103 : vector<8x8xf32>
    %cst_74 = arith.constant dense<0.000000e+00> : vector<8xf32>
    %105 = vector.multi_reduction <add>, %104, %cst_74 [1] : vector<8x8xf32> to vector<8xf32>
    %106 = vector.shape_cast %105 : vector<8xf32> to vector<8x1xf32>
    %107 = tpu.reciprocal %106 {approx = true} : vector<8x1xf32> -> vector<8x1xf32>
    %108 = vector.broadcast %107 : vector<8x1xf32> to vector<8x8xf32>
    %109 = arith.mulf %104, %108 : vector<8x8xf32>
    %c3_75 = arith.constant 3 : index
    %c0_76 = arith.constant 0 : index
    %c0_77 = arith.constant 0 : index
    %110 = vector.load %arg15[%c3_75, %c0_76, %c0_77] : memref<4x8x8xf32, #tpu.memory_space<vmem>>, vector<1x8x8xf32>
    %111 = vector.shape_cast %110 : vector<1x8x8xf32> to vector<8x8xf32>
    %cst_78 = arith.constant dense<0.000000e+00> : vector<8x8xf32>
    %112 = tpu.matmul %109, %111, %cst_78 {dimension_numbers = #tpu.dot_dimension_numbers<[1], [0], [0], [1], [0, 0, 1, 1], [], []>} : vector<8x8xf32>, vector<8x8xf32>, vector<8x8xf32> -> vector<8x8xf32>
    %c3_79 = arith.constant 3 : index
    %c0_80 = arith.constant 0 : index
    %c0_81 = arith.constant 0 : index
    %113 = vector.load %arg9[%c3_79, %c0_80, %c0_81] : memref<4x8x32xf32, #tpu.memory_space<vmem>>, vector<1x8x32xf32>
    %114 = vector.shape_cast %113 : vector<1x8x32xf32> to vector<8x32xf32>
    %cst_82 = arith.constant dense<0.000000e+00> : vector<8x32xf32>
    %115 = tpu.matmul %112, %114, %cst_82 {dimension_numbers = #tpu.dot_dimension_numbers<[1], [0], [0], [1], [0, 0, 1, 1], [], []>} : vector<8x8xf32>, vector<8x32xf32>, vector<8x32xf32> -> vector<8x32xf32>
    %116 = arith.addf %89, %115 : vector<8x32xf32>
    %117 = arith.addf %7, %116 : vector<8x32xf32>
    %c0_83 = arith.constant 0 : index
    %c0_84 = arith.constant 0 : index
    %118 = vector.load %arg10[%c0_83, %c0_84] : memref<1x32xf32, #tpu.memory_space<vmem>>, vector<1x32xf32>
    %119 = vector.broadcast %118 : vector<1x32xf32> to vector<8x32xf32>
    %120 = arith.addf %117, %119 : vector<8x32xf32>
    %c0_85 = arith.constant 0 : index
    %c0_86 = arith.constant 0 : index
    %121 = vector.load %arg11[%c0_85, %c0_86] : memref<32x32xf32, #tpu.memory_space<vmem>>, vector<32x32xf32>
    %cst_87 = arith.constant dense<0.000000e+00> : vector<8x32xf32>
    %122 = tpu.matmul %120, %121, %cst_87 {dimension_numbers = #tpu.dot_dimension_numbers<[1], [0], [0], [1], [0, 0, 1, 1], [], []>} : vector<8x32xf32>, vector<32x32xf32>, vector<8x32xf32> -> vector<8x32xf32>
    %c0_88 = arith.constant 0 : index
    %c0_89 = arith.constant 0 : index
    %123 = vector.load %arg12[%c0_88, %c0_89] : memref<1x32xf32, #tpu.memory_space<vmem>>, vector<1x32xf32>
    %124 = vector.broadcast %123 : vector<1x32xf32> to vector<8x32xf32>
    %125 = arith.addf %122, %124 : vector<8x32xf32>
    %cst_90 = arith.constant 5.000000e-01 : f32
    %126 = vector.broadcast %cst_90 : f32 to vector<8x32xf32>
    %127 = arith.mulf %126, %125 : vector<8x32xf32>
    %cst_91 = arith.constant 0.707106769 : f32
    %128 = vector.broadcast %cst_91 : f32 to vector<8x32xf32>
    %129 = arith.mulf %125, %128 : vector<8x32xf32>
    %130 = math.erf %129 : vector<8x32xf32>
    %cst_92 = arith.constant 1.000000e+00 : f32
    %131 = vector.broadcast %cst_92 : f32 to vector<8x32xf32>
    %132 = arith.addf %131, %130 : vector<8x32xf32>
    %133 = arith.mulf %127, %132 : vector<8x32xf32>
    %134 = arith.addf %120, %133 : vector<8x32xf32>
    %c0_93 = arith.constant 0 : index
    %c0_94 = arith.constant 0 : index
    %c0_95 = arith.constant 0 : index
    %135 = vector.load %arg13[%c0_93, %c0_94, %c0_95] : memref<1x8x32xf32, #tpu.memory_space<vmem>>, vector<1x8x32xf32>
    %136 = vector.shape_cast %135 : vector<1x8x32xf32> to vector<8x32xf32>
    %137 = vector.shape_cast %134 : vector<8x32xf32> to vector<1x8x32xf32>
    tpu.vector_store %arg13[%c0_93, %c0_94, %c0_95], %137 {strides = array<i32>} : memref<1x8x32xf32, #tpu.memory_space<vmem>>, vector<1x8x32xf32>,
    return
  }
  func.func @transform_0(%arg0: i32, %arg1: i32) -> (i32, i32, i32) {
    %c0_i32 = arith.constant 0 : i32
    %c0_i32_0 = arith.constant 0 : i32
    %c0_i32_1 = arith.constant 0 : i32
    return %arg0, %c0_i32, %c0_i32_0 : i32, i32, i32
  }
  func.func @transform_1(%arg0: i32, %arg1: i32) -> (i32, i32, i32) {
    %c0_i32 = arith.constant 0 : i32
    %c0_i32_0 = arith.constant 0 : i32
    %c0_i32_1 = arith.constant 0 : i32
    %c0_i32_2 = arith.constant 0 : i32
    return %c0_i32, %c0_i32_0, %c0_i32_1 : i32, i32, i32
  }
  func.func @transform_2(%arg0: i32, %arg1: i32) -> (i32, i32, i32) {
    %c0_i32 = arith.constant 0 : i32
    %c0_i32_0 = arith.constant 0 : i32
    %c0_i32_1 = arith.constant 0 : i32
    %c0_i32_2 = arith.constant 0 : i32
    return %c0_i32, %c0_i32_0, %c0_i32_1 : i32, i32, i32
  }
  func.func @transform_3(%arg0: i32, %arg1: i32) -> (i32, i32, i32) {
    %c0_i32 = arith.constant 0 : i32
    %c0_i32_0 = arith.constant 0 : i32
    %c0_i32_1 = arith.constant 0 : i32
    %c0_i32_2 = arith.constant 0 : i32
    return %c0_i32, %c0_i32_0, %c0_i32_1 : i32, i32, i32
  }
  func.func @transform_4(%arg0: i32, %arg1: i32) -> (i32, i32, i32) {
    %c0_i32 = arith.constant 0 : i32
    %c0_i32_0 = arith.constant 0 : i32
    %c0_i32_1 = arith.constant 0 : i32
    %c0_i32_2 = arith.constant 0 : i32
    return %c0_i32, %c0_i32_0, %c0_i32_1 : i32, i32, i32
  }
  func.func @transform_5(%arg0: i32, %arg1: i32) -> (i32, i32, i32) {
    %c0_i32 = arith.constant 0 : i32
    %c0_i32_0 = arith.constant 0 : i32
    %c0_i32_1 = arith.constant 0 : i32
    %c0_i32_2 = arith.constant 0 : i32
    return %c0_i32, %c0_i32_0, %c0_i32_1 : i32, i32, i32
  }
  func.func @transform_6(%arg0: i32, %arg1: i32) -> (i32, i32, i32) {
    %c0_i32 = arith.constant 0 : i32
    %c0_i32_0 = arith.constant 0 : i32
    %c0_i32_1 = arith.constant 0 : i32
    %c0_i32_2 = arith.constant 0 : i32
    return %c0_i32, %c0_i32_0, %c0_i32_1 : i32, i32, i32
  }
  func.func @transform_7(%arg0: i32, %arg1: i32) -> (i32, i32, i32) {
    %c0_i32 = arith.constant 0 : i32
    %c0_i32_0 = arith.constant 0 : i32
    %c0_i32_1 = arith.constant 0 : i32
    %c0_i32_2 = arith.constant 0 : i32
    return %c0_i32, %c0_i32_0, %c0_i32_1 : i32, i32, i32
  }
  func.func @transform_8(%arg0: i32, %arg1: i32) -> (i32, i32) {
    %c0_i32 = arith.constant 0 : i32
    %c0_i32_0 = arith.constant 0 : i32
    %c0_i32_1 = arith.constant 0 : i32
    return %c0_i32, %c0_i32_0 : i32, i32
  }
  func.func @transform_9(%arg0: i32, %arg1: i32) -> (i32, i32) {
    %c0_i32 = arith.constant 0 : i32
    %c0_i32_0 = arith.constant 0 : i32
    %c0_i32_1 = arith.constant 0 : i32
    return %c0_i32, %c0_i32_0 : i32, i32
  }
  func.func @transform_10(%arg0: i32, %arg1: i32) -> (i32, i32) {
    %c0_i32 = arith.constant 0 : i32
    %c0_i32_0 = arith.constant 0 : i32
    %c0_i32_1 = arith.constant 0 : i32
    return %c0_i32, %c0_i32_0 : i32, i32
  }
  func.func @transform_11(%arg0: i32, %arg1: i32) -> (i32, i32, i32) {
    %c0_i32 = arith.constant 0 : i32
    %c0_i32_0 = arith.constant 0 : i32
    return %arg0, %arg1, %c0_i32 : i32, i32, i32
  }
}

</mosaic_0001>

<bundles_post_ra>
// kernel: tpu_custom_call.1
= control target key start
LH: loop header
LB: loop body
LE: loop exit
PB: predicated region body
PF: predicated region fallthrough
CT: control target
= control target key end

     0   :  { %s3652_s0 = inlined_call_operand.vmem [shape: f32[2,8,32], index: 0, kind: input, shape index: {}]   ;;  %s3653_s1 = inlined_call_operand.vmem [shape: f32[4,32,8], index: 1, kind: input, shape index: {}]   ;;  %s3654_s2 = inlined_call_operand.vmem [shape: f32[4,1,8], index: 2, kind: input, shape index: {}]   ;;  %s3655_s3 = inlined_call_operand.vmem [shape: f32[4,32,8], index: 3, kind: input, shape index: {}]   ;;  %s3656_s4 = inlined_call_operand.vmem [shape: f32[4,1,8], index: 4, kind: input, shape index: {}]   ;;  %s3657_s5 = inlined_call_operand.vmem [shape: f32[4,32,8], index: 5, kind: input, shape index: {}]   ;;  %s3658_s6 = inlined_call_operand.vmem [shape: f32[4,1,8], index: 6, kind: input, shape index: {}]   ;;  %s3659_s7 = inlined_call_operand.vmem [shape: f32[4,8,32], index: 7, kind: input, shape index: {}]   ;;  %s3660_s8 = inlined_call_operand.vmem [shape: f32[1,32], index: 8, kind: input, shape index: {}]   ;;  %s3661_s9 = inlined_call_operand.vmem [shape: f32[32,32], index: 9, kind: input, shape index: {}]   ;;  %s3662_s10 = inlined_call_operand.vmem [shape: f32[1,32], index: 10, kind: input, shape index: {}]   ;;  %s3663_s11 = inlined_call_operand.hbm [shape: f32[2,8,32], index: 11, kind: output, shape index: {}]  }
   0x1   :  { %3665 = sst [smem:[#allocation8_spill]] %s3652_s0 }
   0x2   :  { %3666 = sst [smem:[#allocation9_spill]] %s3653_s1 }
   0x3   :  { %16 = vsyncpa [#allocation5], 0 }
   0x4   :  { %18 = vsyncpa [#allocation5 + $0x1], 0  ;;  %s3168_s17 = smov 0   ;;  %s3170_s18 = smov 0  }
   0x5   :  { %s3172_s19 = smov 0   ;;  %s3174_s20 = smov 0  }
   0x6   :  { %s3176_s21 = smov 0   ;;  %s3178_s22 = smov 0  }
   0x7 LB: > { %s2558_s23 = sadd.s32 4294967295, %s3103_s22   ;;  %s2559_s24 = sadd.s32 4294967294, %s3103_s22   ;;  %s3103_s22 = sphi %s3178_s22, %s24_s22   ;;  %s3099_s21 = sphi %s3176_s21, %s3677_s21   ;;  %s3095_s20 = sphi %s3174_s20, %s3676_s20   ;;  %s3091_s19 = sphi %s3172_s19, %s3675_s19   ;;  %s3087_s18 = sphi %s3170_s18, %s3674_s18   ;;  %s3083_s17 = sphi %s3168_s17, %s3673_s17  }
   0x8   : > { %s36_s25 = sadd.s32 1, %s3099_s21  ;;  %s281_s26 = sadd.s32 1, %s3091_s19 }
   0x9   : > { %p38_p0 = scmp.ge.s32.totalorder %s36_s25, 2  ;;  %p291_p1 = scmp.ne.s32.totalorder %s3091_s19, %s3087_s18 }
   0xa   : > { %p292_p2 = scmp.eq.s32.totalorder %s2558_s23, 1  ;;  %p297_p3 = scmp.ne.s32.totalorder %s3087_s18, %s3083_s17 }
   0xb   : > { %s3679_s25 = smov (%p38_p0, %s36_s25), 0  ;;  %p298_p5 = scmp.eq.s32.totalorder %s2559_s24, 1 }
   0xc   : > { %3667 = sst [smem:[#allocation7_spill]] %s3679_s25  ;;  %p3208_p4 = por %p292_p2, %p291_p1 }
   0xd   : > { %s276_s28 = ssub.s32 %s3099_s21, %s3679_s25  ;;  %p2562_p6 = scmp.ge.s32.totalorder %s3103_s22, 1 }
   0xe   : > { %p279_p7 = scmp.eq.s32.totalorder %s276_s28, 0  ;;  %p3215_p8 = por %p298_p5, %p297_p3 }
   0xf   : > { %p353_p9 = scmp.lt.s32.totalorder %s3103_s22, 3 }
  0x10   : > { %s3221_s30 = scalar_select %p279_p7, %s3091_s19, %s281_s26  }
  0x11   : > { %p354_p10 = pnand %p2562_p6, %p353_p9 }
  0x12   : > { %p392_p11 = scmp.lt.s32.totalorder (!%p354_p10), %s3095_s20, 1  ;;  %s3670_s0 = sld [smem:[#allocation8_spill]] (!%p354_p10) }
  0x13   : > { %357 = sbr.rel (%p354_p10) target bundleno = 3310 (0xcee), region = 64  ;;  %s3671_s1 = sld [smem:[#allocation9_spill]] (!%p354_p10) }
  0x14   : > { %s389_s24 = sand.u32 (!%p354_p10), 1, %s3087_s18  }
  0x18   : > { %v404_v0 = vld [vmem:[%s3655_s3 + $0x18] sm:$0xff]  ;;  %v3105_v1 = vmov 0.0   ;;  %v403_v2 = vld [vmem:[%s3655_s3 + $0x10] sm:$0xff]  ;;  %vm3106_vm0 = vmmov 0   ;;  %s393_s16 = scalar_select %p392_p11, %s3095_s20, 1  ;;  %v402_v3 = vld [vmem:[%s3655_s3 + $0x8] sm:$0xff] }
  0x19   : > { %2749 = vmatprep.subr.mxu0 %v3105_v1  ;;  %2757 = vmatprep.mubr.msk.f32.mxu0 %vm3106_vm0, %v3105_v1  ;;  %v401_v4 = vld [vmem:[%s3655_s3] sm:$0xff]  ;;  %vm412_vm1 = vcmask 261120   ;;  %v2572_v6 = vld [vmem:[%s3655_s3 + $0x38] sm:$0xff]  ;;  %v2571_v8 = vld [vmem:[%s3655_s3 + $0x30] sm:$0xff]  ;;  %vm567_vm2 = vcmask 64512  }
  0x1a   : > { %2750 = vmatpush3.msra.mxu0 %v404_v0  ;;  %2760 = vmatprep.subr.mxu1 %v3105_v1  ;;  %s2564_s26 = sshll.u32 %s393_s16, 3  ;;  %v489_v7 = vld [vmem:[%s3657_s5 + $0x18] sm:$0xff]  ;;  %v488_v9 = vld [vmem:[%s3657_s5 + $0x10] sm:$0xff]  ;;  %v2570_v10 = vld [vmem:[%s3655_s3 + $0x28] sm:$0xff]  ;;  %s2563_s16 = sshll.u32 %s389_s24, 3 }
  0x1b   : > { %2751 = vmatprep.subr.mxu0 %v3105_v1  ;;  %2768 = vmatprep.mubr.msk.f32.mxu1 %vm3106_vm0, %v3105_v1  ;;  %s395_s15 = scalar_lea.vmem %s3670_s0, %s2564_s26  ;;  %v487_v11 = vld [vmem:[%s3657_s5 + $0x8] sm:$0xff]  ;;  %v2569_v12 = vld [vmem:[%s3655_s3 + $0x20] sm:$0xff]  ;;  %v2586_v14 = vld [vmem:[%s3655_s3 + $0x58] sm:$0xff]  ;;  %s2657_s26 = sshll.u32 %s3095_s20, 7 }
  0x1c   : > { %2752 = vmatpush3.msra.mxu0 %v403_v2  ;;  %v3248_v5 = vld [vmem:[%s395_s15] sm:$0xff]  ;;  %2761 = vmatpush3.msra.mxu1 %v489_v7  ;;  %v2585_v15 = vld [vmem:[%s3655_s3 + $0x50] sm:$0xff]  ;;  %v2579_v16 = vld [vmem:[%s3657_s5 + $0x38] sm:$0xff]  ;;  %s391_s28 = scalar_lea.vmem [#allocation4], %s2563_s16  ;;  %s2486_s14 = scalar_lea.hbm %s3663_s11, %s2657_s26 }
  0x1d   : > { %2753 = vmatprep.subr.mxu0 %v3105_v1  ;;  %2762 = vmatprep.subr.mxu1 %v3105_v1  ;;  %v486_v13 = vld [vmem:[%s3657_s5] sm:$0xff]  ;;  %v2584_v17 = vld [vmem:[%s3655_s3 + $0x48] sm:$0xff]  ;;  %v2578_v18 = vld [vmem:[%s3657_s5 + $0x30] sm:$0xff]  ;;  %s2488_s12 = sshll.u32 %s391_s28, 4  ;;  %s2474_s15 = scalar_lea.sflag [#allocation5], %s389_s24  ;;  %s2489_s12 = int_to_ptr.vmem [resolvable:$true] %s2488_s12 }
  0x1e   : > { %2754 = vmatpush3.msra.mxu0 %v402_v3  ;;  %2763 = vmatpush3.msra.mxu1 %v488_v9  ;;  %v2583_v19 = vld [vmem:[%s3655_s3 + $0x40] sm:$0xff]  ;;  %v2600_v20 = vld [vmem:[%s3655_s3 + $0x78] sm:$0xff]  ;;  %v2577_v21 = vld [vmem:[%s3657_s5 + $0x28] sm:$0xff]  ;;  %s3027_s23 = scalar_lea.vmem %s2489_s12, 128  ;;  %s3107_s0 = smov [#allocation4]  }
  0x1f   : > { %2755 = vmatprep.subr.mxu0 %v3105_v1  ;;  %2764 = vmatprep.subr.mxu1 %v3105_v1  ;;  %v2599_v22 = vld [vmem:[%s3655_s3 + $0x70] sm:$0xff]  ;;  %v2576_v23 = vld [vmem:[%s3657_s5 + $0x20] sm:$0xff]  ;;  %v2598_v24 = vld [vmem:[%s3655_s3 + $0x68] sm:$0xff]  ;;  %p3028_p12 = scmp.ne.s32.totalorder %s2489_s12, %s3027_s23 }
  0x20   : > { %2756 = vmatpush3.msra.mxu0 %v401_v4  ;;  %2765 = vmatpush3.msra.mxu1 %v487_v11  ;;  %v2597_v25 = vld [vmem:[%s3655_s3 + $0x60] sm:$0xff]  ;;  %v1086_v26 = vld [vmem:[%s3671_s1 + $0x18] sm:$0xff]  ;;  %v1085_v28 = vld [vmem:[%s3671_s1 + $0x10] sm:$0xff] }
  0x21   : > { %2758 = vmatmul.mubr.msk.f32.vlgmr.msra.gmra.mxu0 %vm412_vm1, %v3248_v5  ;;  %2771 = vmatprep.subr.mxu0 %v3105_v1  ;;  %v2593_v27 = vld [vmem:[%s3657_s5 + $0x58] sm:$0xff]  ;;  %v2592_v29 = vld [vmem:[%s3657_s5 + $0x50] sm:$0xff]  ;;  %v1084_v30 = vld [vmem:[%s3671_s1 + $0x8] sm:$0xff]  ;;  %p3029_p13 = pnand %p3028_p12, %p3208_p4 }
  0x22   : > { %2772 = vmatpush3.msra.mxu0 %v2572_v6  ;;  %2779 = vmatprep.mubr.msk.f32.mxu0 %vm3106_vm0, %v3105_v1  ;;  %v1083_v31 = vld [vmem:[%s3671_s1] sm:$0xff]  ;;  %v2591_v32 = vld [vmem:[%s3657_s5 + $0x48] sm:$0xff]  ;;  %v2607_v34 = vld [vmem:[%s3657_s5 + $0x78] sm:$0xff] }
  0x23   : > { %2773 = vmatprep.subr.mxu0 %v3105_v1  ;;  %2766 = vmatprep.subr.mxu1 %v3105_v1  ;;  %v2590_v33 = vld [vmem:[%s3657_s5 + $0x40] sm:$0xff]  ;;  %v2606_v35 = vld [vmem:[%s3657_s5 + $0x70] sm:$0xff]  ;;  %v2605_v36 = vld [vmem:[%s3657_s5 + $0x68] sm:$0xff]  ;;  %p3030_p0 = pneg %p3029_p13 }
  0x24   : > { %2774 = vmatpush3.msra.mxu0 %v2571_v8  ;;  %2767 = vmatpush3.msra.mxu1 %v486_v13  ;;  %v2604_v37 = vld [vmem:[%s3657_s5 + $0x60] sm:$0xff] }
  0x25   : > { %2775 = vmatprep.subr.mxu0 %v3105_v1  ;;  %2782 = vmatprep.subr.mxu1 %v3105_v1  ;;  %v2565_v38 = vld [vmem:[%s3656_s4] ss:$0 sm:$0xff]  ;;  %v2574_v42 = vld [vmem:[%s3656_s4 + $0x1] ss:$0 sm:$0xff]  ;;  %v2588_v51 = vld [vmem:[%s3656_s4 + $0x2] ss:$0 sm:$0xff] }
  0x26   : > { %2776 = vmatpush3.msra.mxu0 %v2570_v10  ;;  %2769 = vmatmul.mubr.msk.f32.vlgmr.msra.gmra.mxu1 %vm412_vm1, %v3248_v5  ;;  %v2567_v45 = vld [vmem:[%s3658_s6] ss:$0 sm:$0xff]  ;;  %v2581_v55 = vld [vmem:[%s3658_s6 + $0x1] ss:$0 sm:$0xff]  ;;  %v2602_v56 = vld [vmem:[%s3656_s4 + $0x3] ss:$0 sm:$0xff] }
  0x27   : > { %2777 = vmatprep.subr.mxu0 %v3105_v1  ;;  %2783 = vmatpush3.msra.mxu1 %v2579_v16  ;;  %v2611_v63 = vld [vmem:[%s3654_s2] ss:$0 sm:$0xff]  ;;  %v2595_v6 = vld [vmem:[%s3658_s6 + $0x2] ss:$0 sm:$0xff]  ;;  %v2609_v10 = vld [vmem:[%s3658_s6 + $0x3] ss:$0 sm:$0xff] }
  0x28   : > { %2778 = vmatpush3.msra.mxu0 %v2569_v12  ;;  %2784 = vmatprep.subr.mxu1 %v3105_v1  ;;  %v2617_v16 = vld [vmem:[%s3671_s1 + $0x28] sm:$0xff] }
  0x29   : > { %2780 = vmatmul.mubr.msk.f32.vlgmr.msra.gmra.mxu0 %vm412_vm1, %v3248_v5  ;;  %2793 = vmatprep.subr.mxu0 %v3105_v1 }
  0x2a   : > { %2794 = vmatpush3.msra.mxu0 %v2586_v14  ;;  %2801 = vmatprep.mubr.msk.f32.mxu0 %vm3106_vm0, %v3105_v1  ;;  %v2619_v14 = vld [vmem:[%s3671_s1 + $0x38] sm:$0xff] }
  0x2b   : > { %2795 = vmatprep.subr.mxu0 %v3105_v1  ;;  %2785 = vmatpush3.msra.mxu1 %v2578_v18 }
  0x2c   : > { %2796 = vmatpush3.msra.mxu0 %v2585_v15  ;;  %2786 = vmatprep.subr.mxu1 %v3105_v1  ;;  %v2618_v15 = vld [vmem:[%s3671_s1 + $0x30] sm:$0xff] }
  0x2d   : > { %2797 = vmatprep.subr.mxu0 %v3105_v1  ;;  %2787 = vmatpush3.msra.mxu1 %v2577_v21 }
  0x2e   : > { %2798 = vmatpush3.msra.mxu0 %v2584_v17  ;;  %2788 = vmatprep.subr.mxu1 %v3105_v1  ;;  %v2616_v17 = vld [vmem:[%s3671_s1 + $0x20] sm:$0xff] }
  0x2f   : > { %2799 = vmatprep.subr.mxu0 %v3105_v1  ;;  %2789 = vmatpush3.msra.mxu1 %v2576_v23 }
  0x30   : > { %2800 = vmatpush3.msra.mxu0 %v2583_v19  ;;  %2790 = vmatprep.mubr.msk.f32.mxu1 %vm3106_vm0, %v3105_v1 }
  0x31   : > { %2802 = vmatmul.mubr.msk.f32.vlgmr.msra.gmra.mxu0 %vm412_vm1, %v3248_v5  ;;  %2815 = vmatprep.subr.mxu0 %v3105_v1 }
  0x32   : > { %2816 = vmatpush3.msra.mxu0 %v2600_v20  ;;  %2823 = vmatprep.mubr.msk.f32.mxu0 %vm3106_vm0, %v3105_v1 }
  0x33   : > { %2817 = vmatprep.subr.mxu0 %v3105_v1  ;;  %2804 = vmatprep.subr.mxu1 %v3105_v1 }
  0x34   : > { %2818 = vmatpush3.msra.mxu0 %v2599_v22  ;;  %2791 = vmatmul.mubr.msk.f32.vlgmr.msra.gmra.mxu1 %vm412_vm1, %v3248_v5 }
  0x35   : > { %2819 = vmatprep.subr.mxu0 %v3105_v1  ;;  %2805 = vmatpush3.msra.mxu1 %v2593_v27 }
  0x36   : > { %2820 = vmatpush3.msra.mxu0 %v2598_v24  ;;  %2806 = vmatprep.subr.mxu1 %v3105_v1 }
  0x37   : > { %2821 = vmatprep.subr.mxu0 %v3105_v1  ;;  %2807 = vmatpush3.msra.mxu1 %v2592_v29 }
  0x38   : > { %2822 = vmatpush3.msra.mxu0 %v2597_v25  ;;  %2808 = vmatprep.subr.mxu1 %v3105_v1 }
  0x39   : > { %2824 = vmatmul.mubr.msk.f32.vlgmr.msra.gmra.mxu0 %vm412_vm1, %v3248_v5  ;;  %2837 = vmatprep.subr.mxu0 %v3105_v1 }
  0x3a   : > { %2838 = vmatpush3.msra.mxu0 %v1086_v26  ;;  %2845 = vmatprep.mubr.msk.f32.mxu0 %vm3106_vm0, %v3105_v1 }
  0x3b   : > { %2839 = vmatprep.subr.mxu0 %v3105_v1  ;;  %2812 = vmatprep.mubr.msk.f32.mxu1 %vm3106_vm0, %v3105_v1 }
  0x3c   : > { %2840 = vmatpush3.msra.mxu0 %v1085_v28  ;;  %2809 = vmatpush3.msra.mxu1 %v2591_v32 }
  0x3d   : > { %2841 = vmatprep.subr.mxu0 %v3105_v1  ;;  %2810 = vmatprep.subr.mxu1 %v3105_v1 }
  0x3e   : > { %2842 = vmatpush3.msra.mxu0 %v1084_v30  ;;  %2811 = vmatpush3.msra.mxu1 %v2590_v33  ;;  %v2621_v30 = vld [vmem:[%s3654_s2 + $0x1] ss:$0 sm:$0xff] }
  0x3f   : > { %2843 = vmatprep.subr.mxu0 %v3105_v1  ;;  %2826 = vmatprep.subr.mxu1 %v3105_v1 }
  0x40   : > { %2844 = vmatpush3.msra.mxu0 %v1083_v31  ;;  %2813 = vmatmul.mubr.msk.f32.vlgmr.msra.gmra.mxu1 %vm412_vm1, %v3248_v5 }
  0x41   : > { %2846 = vmatmul.mubr.msk.f32.vlgmr.msra.gmra.mxu0 %vm412_vm1, %v3248_v5  ;;  %2858 = vmatprep.subr.mxu0 %v3105_v1 }
  0x42   : > { %2866 = vmatprep.mubr.msk.f32.mxu0 %vm3106_vm0, %v3105_v1  ;;  %2827 = vmatpush3.msra.mxu1 %v2607_v34 }
  0x43   : > { %2834 = vmatprep.mubr.msk.f32.mxu1 %vm3106_vm0, %v3105_v1  ;;  %2828 = vmatprep.subr.mxu1 %v3105_v1 }
  0x44   : > { %2829 = vmatpush3.msra.mxu1 %v2606_v35  ;;  %2859 = vmatpush3.msra.mxu0 %v2619_v14 }
  0x45   : > { %2830 = vmatprep.subr.mxu1 %v3105_v1  ;;  %2860 = vmatprep.subr.mxu0 %v3105_v1 }
  0x46   : > { %2831 = vmatpush3.msra.mxu1 %v2605_v36  ;;  %2861 = vmatpush3.msra.mxu0 %v2618_v15 }
  0x47   : > { %2832 = vmatprep.subr.mxu1 %v3105_v1  ;;  %2862 = vmatprep.subr.mxu0 %v3105_v1 }
  0x48   : > { %2833 = vmatpush3.msra.mxu1 %v2604_v37  ;;  %2863 = vmatpush3.msra.mxu0 %v2617_v16 }
  0x49   : > { %2848 = vmatprep.subr.mxu1 %v3105_v1  ;;  %2835 = vmatmul.mubr.msk.f32.vlgmr.msra.gmra.mxu1 %vm412_vm1, %v3248_v5 }
  0x4a   : > { %2850 = vmatprep.mubr.msk.f32.mxu1 %vm3106_vm0, %v3105_v1  ;;  %2864 = vmatprep.subr.mxu0 %v3105_v1 }
  0x4b   : > { %2865 = vmatpush3.msra.mxu0 %v2616_v17  ;;  %v2644_v17 = vld [vmem:[%s3671_s1 + $0x78] sm:$0xff] }
  0x4c   : > { %2867 = vmatmul.mubr.msk.f32.vlgmr.msra.gmra.mxu0 %vm412_vm1, %v3248_v5  ;;  %2889 = vmatprep.subr.mxu0 %v3105_v1 }
  0x4d   : > { %2897 = vmatprep.mubr.msk.f32.mxu0 %vm3106_vm0, %v3105_v1 }
  0xe1   : > { %v482_v39 = vpop.f32.mrf.mxu0 }
  0xe2   : > { %v483_v40 = vadd.f32 %v2565_v38, %v482_v39 }
  0xe3   : > { %v2759_v41 = vpop.f32.mrf.mxu0 }
  0xe4   : > { %568 = vst.msk [vmem:[#allocation2] sm:$0xff] %vm567_vm2, %v483_v40 }
  0xe6   : > { %v563_v48 = vpop.f32.mrf.mxu1 }
  0xe7   : > { %v564_v49 = vadd.f32 %v2567_v45, %v563_v48  ;;  %v2632_v45 = vld [vmem:[%s3671_s1 + $0x58] sm:$0xff]  ;;  %v2629_v48 = vld [vmem:[%s3671_s1 + $0x40] sm:$0xff] }
  0xe8   : > { %v2770_v50 = vpop.f32.mrf.mxu1  ;;  %2890 = vmatpush3.msra.mxu0 %v2632_v45 }
  0xe9   : > { %v649_v43 = vpop.f32.mrf.mxu0  ;;  %569 = vst.msk [vmem:[#allocation3] sm:$0xff] %vm567_vm2, %v564_v49  ;;  %2891 = vmatprep.subr.mxu0 %v3105_v1 }
  0xea   : > { %v650_v44 = vadd.f32 %v2574_v42, %v649_v43 }
  0xeb   : > { %v2781_v46 = vpop.f32.mrf.mxu0  ;;  %v1168_v47 = vld [vmem:[#allocation2] sm:$0xff] }
  0xec   : > { %737 = vst.msk [vmem:[#allocation2 + $0x8] sm:$0xff] %vm567_vm2, %v650_v44  ;;  %2849 = vmatpush3.xpose.msk.msra.mxu1 %vm567_vm2, %v1168_v47  ;;  %v2631_v46 = vld [vmem:[%s3671_s1 + $0x50] sm:$0xff]  ;;  %v2630_v47 = vld [vmem:[%s3671_s1 + $0x48] sm:$0xff] }
  0xed   : > { %2853 = vmatprep.subr.mxu1 %v3105_v1  ;;  %2892 = vmatpush3.msra.mxu0 %v2631_v46  ;;  %v2385_v46 = vld [vmem:[%s3661_s9 + $0x18] sm:$0xff] }
  0xee   : > { %2893 = vmatprep.subr.mxu0 %v3105_v1 }
  0xef   : > { %2894 = vmatpush3.msra.mxu0 %v2630_v47  ;;  %v2384_v47 = vld [vmem:[%s3661_s9 + $0x10] sm:$0xff] }
  0xf0   : > { %v1257_v3 = vld [vmem:[#allocation3] sm:$0xff]  ;;  %2895 = vmatprep.subr.mxu0 %v3105_v1 }
  0xf1   : > { %v819_v52 = vpop.f32.mrf.mxu0  ;;  %2896 = vmatpush3.msra.mxu0 %v2629_v48  ;;  %v2383_v48 = vld [vmem:[%s3661_s9 + $0x8] sm:$0xff] }
  0xf2   : > { %v820_v53 = vadd.f32 %v2588_v51, %v819_v52  ;;  %2898 = vmatmul.mubr.msk.f32.vlgmr.msra.gmra.mxu0 %vm412_vm1, %v3248_v5  ;;  %2910 = vmatprep.subr.mxu0 %v3105_v1  ;;  %v2626_v52 = vld [vmem:[%s3659_s7 + $0x8] sm:$0xff] }
  0xf3   : > { %v2803_v54 = vpop.f32.mrf.mxu0  ;;  %v1416_v33 = vld [vmem:[#allocation2 + $0x8] sm:$0xff]  ;;  %2912 = vmatprep.mubr.msk.f32.mxu0 %vm3106_vm0, %v3105_v1 }
  0xf4   : > { %907 = vst.msk [vmem:[#allocation2 + $0x10] sm:$0xff] %vm567_vm2, %v820_v53  ;;  %v732_v57 = vpop.f32.mrf.mxu1 }
  0xf5   : > { %v733_v59 = vadd.f32 %v2581_v55, %v732_v57  ;;  %v1331_v55 = vld [vmem:[%s3659_s7] sm:$0xff] }
  0xf6   : > { %v2792_v61 = vpop.f32.mrf.mxu1 }
  0xf7   : > { %739 = vst.msk [vmem:[#allocation3 + $0x8] sm:$0xff] %vm567_vm2, %v733_v59 }
  0xf9   : > { %v989_v58 = vpop.f32.mrf.mxu0 }
  0xfa   : > { %v990_v60 = vadd.f32 %v2602_v56, %v989_v58  ;;  %v2634_v58 = vld [vmem:[%s3654_s2 + $0x2] ss:$0 sm:$0xff] }
  0xfb   : > { %v2825_v62 = vpop.f32.mrf.mxu0 }
  0xfc   : > { %1077 = vst.msk [vmem:[#allocation2 + $0x18] sm:$0xff] %vm567_vm2, %v990_v60  ;;  %v1811_v60 = vld [vmem:[#allocation2 + $0x10] sm:$0xff] }
  0xfe   : > { %v1505_v34 = vld [vmem:[#allocation3 + $0x8] sm:$0xff] }
 0x100   : > { %v902_v7 = vpop.f32.mrf.mxu1 }
 0x101   : > { %v1164_v0 = vpop.f32.mrf.mxu0  ;;  %v903_v8 = vadd.f32 %v2595_v6, %v902_v7 }
 0x102   : > { %v1165_v2 = vadd.f32 %v2611_v63, %v1164_v0  ;;  %v2814_v9 = vpop.f32.mrf.mxu1 }
 0x103   : > { %v2847_v4 = vpop.f32.mrf.mxu0  ;;  %909 = vst.msk [vmem:[#allocation3 + $0x10] sm:$0xff] %vm567_vm2, %v903_v8 }
 0x104   : > { %2851 = vmatmul.mubr.msk.f32.vlgmr.msra.gmra.mxu1 %vm567_vm2, %v1165_v2 }
 0x105   : > { %2854 = vmatpush3.msra.mxu1 %v1257_v3  ;;  %2855 = vmatprep.mubr.msk.f32.mxu1 %vm3106_vm0, %v3105_v1 }
 0x106   : > { %2869 = vmatprep.subr.mxu1 %v3105_v1 }
 0x109   : > { %v1072_v11 = vpop.f32.mrf.mxu1 }
 0x10a   : > { %v1073_v12 = vadd.f32 %v2609_v10, %v1072_v11  ;;  %v1900_v61 = vld [vmem:[#allocation3 + $0x10] sm:$0xff] }
 0x10b   : > { %v2836_v13 = vpop.f32.mrf.mxu1 }
 0x10c   : > { %1079 = vst.msk [vmem:[#allocation3 + $0x18] sm:$0xff] %vm567_vm2, %v1073_v12  ;;  %v1411_v26 = vpop.f32.mrf.mxu0  ;;  %v2639_v13 = vld [vmem:[%s3659_s7 + $0x10] sm:$0xff] }
 0x10d   : > { %v1412_v32 = vadd.f32 %v2621_v30, %v1411_v26  ;;  %2911 = vmatpush3.msra.mxu0 %v2639_v13 }
 0x10e   : > { %v2868_v27 = vpop.f32.mrf.mxu0  ;;  %2926 = vmatprep.subr.mxu0 %v3105_v1 }
 0x1b2   : > { %v1806_v53 = vpop.f32.mrf.mxu0 }
 0x1b3   : > { %v1807_v59 = vadd.f32 %v2634_v58, %v1806_v53 }
 0x1b4   : > { %v2899_v54 = vpop.f32.mrf.mxu0 }
 0x1c4   : > { %v1242_v18 = vpop.f32.mrf.mxu1 }
 0x1c5   : > { %v1246_v19 = vsel %vm567_vm2, %v1242_v18, -inf }
 0x1c6   : > { %1247 = vmax.xlane.f32.xlu0 %v1246_v19  ;;  %v2852_v20 = vpop.f32.mrf.mxu1  ;;  %v2642_v19 = vld [vmem:[%s3671_s1 + $0x68] sm:$0xff] }
 0x1c7   : > { %v2641_v20 = vld [vmem:[%s3671_s1 + $0x60] sm:$0xff] }
 0x24f   : > { %v1248_v21 = vpop.xlane.xlu0 %1247 }
 0x250   : > { %v1249_v22 = vsub.f32 %v1242_v18, %v1248_v21  ;;  %v2643_v18 = vld [vmem:[%s3671_s1 + $0x70] sm:$0xff]  ;;  %s3031_s1 = sshll.u32 %s3107_s0, 4  ;;  %s3032_s1 = int_to_ptr.vmem [resolvable:$false] %s3031_s1 }
 0x251   : > { %s3033_s20 = scalar_lea.vmem %s3032_s1, 256  ;;  %p3034_p1 = scmp.lt.s32.totalorder %s2489_s12, %s3032_s1 }
 0x252   : > { %v1250_v23 = vmul.f32 1.442695, %v1249_v22  ;;  %v2134_v22 = vld [vmem:[#allocation2 + $0x18] sm:$0xff]  ;;  %p3035_p2 = scmp.lt.s32.totalorder %s3033_s20, %s3027_s23 }
 0x254   : > { %3009 = vpow2.f32 %v1250_v23  ;;  %p3036_p3 = por %p3035_p2, %p3034_p1 }
 0x256   : > { %p3037_p5 = pnand %p3036_p3, %p3030_p0 }
 0x261   : > { %v3010_v24 = vpop.eup %3009 }
 0x262   : > { %v1252_v25 = vsel %vm567_vm2, %v3010_v24, 0.0 }
 0x263   : > { %1253 = vadd.xlane.f32.xlu0 %v1252_v25 }
 0x2ec   : > { %v1254_v28 = vpop.xlane.xlu0 %1253 }
 0x2ed   : > { %3011 = vrcp.f32 %v1254_v28  ;;  %v2223_v28 = vld [vmem:[#allocation3 + $0x18] sm:$0xff] }
 0x2fa   : > { %v3012_v29 = vpop.eup %3011 }
 0x2fb   : > { %v1256_v31 = vmul.f32 %v3012_v29, %v3010_v24  ;;  %v2646_v24 = vld [vmem:[%s3654_s2 + $0x3] ss:$0 sm:$0xff] }
 0x2fd   : > { %2856 = vmatmul.mubr.msk.f32.vlgmr.msra.gmra.mxu1 %vm567_vm2, %v1256_v31 }
 0x2fe   : > { %2870 = vmatpush3.xpose.msk.msra.mxu1 %vm567_vm2, %v1416_v33  ;;  %2871 = vmatprep.mubr.msk.f32.mxu1 %vm3106_vm0, %v3105_v1 }
 0x2ff   : > { %2874 = vmatprep.subr.mxu1 %v3105_v1 }
 0x301   : > { %2872 = vmatmul.mubr.msk.f32.vlgmr.msra.gmra.mxu1 %vm567_vm2, %v1412_v32 }
 0x302   : > { %2875 = vmatpush3.msra.mxu1 %v1505_v34  ;;  %2876 = vmatprep.mubr.msk.f32.mxu1 %vm3106_vm0, %v3105_v1 }
 0x303   : > { %2879 = vmatprep.subr.mxu1 %v3105_v1 }
 0x3bd   : > { %v1327_v35 = vpop.f32.mrf.mxu1 }
 0x3bf   : > { %v2857_v36 = vpop.f32.mrf.mxu1 }
 0x3c1   : > { %v1489_v37 = vpop.f32.mrf.mxu1 }
 0x3c2   : > { %v1493_v38 = vsel %vm567_vm2, %v1489_v37, -inf }
 0x3c3   : > { %1494 = vmax.xlane.f32.xlu1 %v1493_v38  ;;  %v2873_v39 = vpop.f32.mrf.mxu1 }
 0x44c   : > { %v1495_v40 = vpop.xlane.xlu1 %1494 }
 0x44d   : > { %v1496_v41 = vsub.f32 %v1489_v37, %v1495_v40  ;;  %v2651_v40 = vld [vmem:[%s3659_s7 + $0x18] sm:$0xff] }
 0x44f   : > { %v1497_v42 = vmul.f32 1.442695, %v1496_v41 }
 0x451   : > { %3013 = vpow2.f32 %v1497_v42 }
 0x45e   : > { %v3014_v43 = vpop.eup %3013 }
 0x45f   : > { %v1499_v44 = vsel %vm567_vm2, %v3014_v43, 0.0 }
 0x460   : > { %1500 = vadd.xlane.f32.xlu1 %v1499_v44 }
 0x4e9   : > { %v1501_v49 = vpop.xlane.xlu1 %1500 }
 0x4ea   : > { %3015 = vrcp.f32 %v1501_v49  ;;  %v2382_v49 = vld [vmem:[%s3661_s9] sm:$0xff] }
 0x4f7   : > { %v3016_v50 = vpop.eup %3015 }
 0x4f8   : > { %v1503_v51 = vmul.f32 %v3016_v50, %v3014_v43 }
 0x4fa   : > { %2877 = vmatmul.mubr.msk.f32.vlgmr.msra.gmra.mxu1 %vm567_vm2, %v1503_v51 }
 0x4fb   : > { %2880 = vmatpush3.msra.mxu1 %v2626_v52  ;;  %2881 = vmatprep.mubr.msk.f32.mxu1 %vm3106_vm0, %v3105_v1  ;;  %v2653_v52 = vld [vmem:[%s3660_s8] ss:$0 sm:$0xff] }
 0x4fc   : > { %2884 = vmatprep.subr.mxu1 %v3105_v1 }
 0x5ba   : > { %v1575_v56 = vpop.f32.mrf.mxu1 }
 0x5bb   : > { %2882 = vmatmul.mubr.msk.f32.vlgmr.msra.gmra.mxu1 %vm567_vm2, %v1575_v56  ;;  %v2654_v56 = vld [vmem:[%s3662_s10] ss:$0 sm:$0xff] }
 0x5bc   : > { %2885 = vmatpush3.msra.mxu1 %v1331_v55  ;;  %v2878_v57 = vpop.f32.mrf.mxu1  ;;  %2886 = vmatprep.mubr.msk.f32.mxu1 %vm3106_vm0, %v3105_v1 }
 0x5bd   : > { %2900 = vmatprep.subr.mxu1 %v3105_v1 }
 0x5bf   : > { %2887 = vmatmul.mubr.msk.f32.vlgmr.msra.gmra.mxu1 %vm567_vm2, %v1327_v35 }
 0x5c0   : > { %2901 = vmatpush3.xpose.msk.msra.mxu1 %vm567_vm2, %v1811_v60  ;;  %2902 = vmatprep.mubr.msk.f32.mxu1 %vm3106_vm0, %v3105_v1 }
 0x5c1   : > { %2905 = vmatprep.subr.mxu1 %v3105_v1 }
 0x5c3   : > { %2903 = vmatmul.mubr.msk.f32.vlgmr.msra.gmra.mxu1 %vm567_vm2, %v1807_v59 }
 0x5c4   : > { %2906 = vmatpush3.msra.mxu1 %v1900_v61  ;;  %2907 = vmatprep.mubr.msk.f32.mxu1 %vm3106_vm0, %v3105_v1 }
 0x5c5   : > { %2915 = vmatprep.subr.mxu1 %v3105_v1 }
 0x67b   : > { %v1650_v62 = vpop.f32.mrf.mxu1 }
 0x67d   : > { %v2883_v63 = vpop.f32.mrf.mxu1 }
 0x67f   : > { %v1723_v0 = vpop.f32.mrf.mxu1 }
 0x680   : > { %v1724_v2 = vadd.f32 %v1723_v0, %v1650_v62 }
 0x681   : > { %v2888_v3 = vpop.f32.mrf.mxu1 }
 0x683   : > { %v1884_v4 = vpop.f32.mrf.mxu1 }
 0x684   : > { %v1888_v6 = vsel %vm567_vm2, %v1884_v4, -inf }
 0x685   : > { %1889 = vmax.xlane.f32.xlu0 %v1888_v6  ;;  %v2904_v7 = vpop.f32.mrf.mxu1 }
 0x70e   : > { %v1890_v8 = vpop.xlane.xlu0 %1889 }
 0x70f   : > { %v1891_v9 = vsub.f32 %v1884_v4, %v1890_v8 }
 0x711   : > { %v1892_v10 = vmul.f32 1.442695, %v1891_v9 }
 0x713   : > { %3017 = vpow2.f32 %v1892_v10 }
 0x720   : > { %v3018_v11 = vpop.eup %3017 }
 0x721   : > { %v1894_v12 = vsel %vm567_vm2, %v3018_v11, 0.0 }
 0x722   : > { %1895 = vadd.xlane.f32.xlu1 %v1894_v12 }
 0x7ab   : > { %v1896_v14 = vpop.xlane.xlu1 %1895 }
 0x7ac   : > { %3019 = vrcp.f32 %v1896_v14 }
 0x7b9   : > { %v3020_v15 = vpop.eup %3019 }
 0x7ba   : > { %v1898_v16 = vmul.f32 %v3020_v15, %v3018_v11 }
 0x7bc   : > { %2908 = vmatmul.mubr.msk.f32.vlgmr.msra.gmra.mxu1 %vm567_vm2, %v1898_v16 }
 0x7bd   : > { %2916 = vmatpush3.msra.mxu1 %v2644_v17  ;;  %2923 = vmatprep.mubr.msk.f32.mxu1 %vm3106_vm0, %v3105_v1 }
 0x7be   : > { %2917 = vmatprep.subr.mxu1 %v3105_v1 }
 0x7bf   : > { %2918 = vmatpush3.msra.mxu1 %v2643_v18 }
 0x7c0   : > { %2919 = vmatprep.subr.mxu1 %v3105_v1 }
 0x7c1   : > { %2920 = vmatpush3.msra.mxu1 %v2642_v19 }
 0x7c2   : > { %2921 = vmatprep.subr.mxu1 %v3105_v1 }
 0x7c3   : > { %2922 = vmatpush3.msra.mxu1 %v2641_v20 }
 0x7c4   : > { %2924 = vmatmul.mubr.msk.f32.vlgmr.msra.gmra.mxu1 %vm412_vm1, %v3248_v5  ;;  %2936 = vmatprep.subr.mxu1 %v3105_v1 }
 0x7c5   : > { %2938 = vmatprep.mubr.msk.f32.mxu1 %vm3106_vm0, %v3105_v1  ;;  %2937 = vmatpush3.msra.mxu1 %v2651_v40 }
 0x87c   : > { %v1970_v21 = vpop.f32.mrf.mxu1 }
 0x87d   : > { %2913 = vmatmul.mubr.msk.f32.vlgmr.msra.gmra.mxu0 %vm567_vm2, %v1970_v21 }
 0x87e   : > { %2927 = vmatpush3.xpose.msk.msra.mxu0 %vm567_vm2, %v2134_v22  ;;  %v2909_v23 = vpop.f32.mrf.mxu1  ;;  %2928 = vmatprep.mubr.msk.f32.mxu0 %vm3106_vm0, %v3105_v1 }
 0x87f   : > { %2931 = vmatprep.subr.mxu0 %v3105_v1 }
 0x884   : > { %v2129_v25 = vpop.f32.mrf.mxu1 }
 0x885   : > { %v2130_v26 = vadd.f32 %v2646_v24, %v2129_v25 }
 0x886   : > { %v2925_v27 = vpop.f32.mrf.mxu1 }
 0x887   : > { %2929 = vmatmul.mubr.msk.f32.vlgmr.msra.gmra.mxu0 %vm567_vm2, %v2130_v26 }
 0x888   : > { %2932 = vmatpush3.msra.mxu0 %v2223_v28  ;;  %2933 = vmatprep.mubr.msk.f32.mxu0 %vm3106_vm0, %v3105_v1 }
 0x889   : > { %2941 = vmatprep.subr.mxu0 %v3105_v1 }
 0x93d   : > { %v2045_v29 = vpop.f32.mrf.mxu0 }
 0x93e   : > { %v2049_v30 = vadd.f32 %v2045_v29, %v1724_v2 }
 0x93f   : > { %v2914_v31 = vpop.f32.mrf.mxu0 }
 0x947   : > { %v2207_v32 = vpop.f32.mrf.mxu0 }
 0x948   : > { %v2211_v33 = vsel %vm567_vm2, %v2207_v32, -inf }
 0x949   : > { %2212 = vmax.xlane.f32.xlu0 %v2211_v33  ;;  %v2930_v34 = vpop.f32.mrf.mxu0 }
 0x9d2   : > { %v2213_v35 = vpop.xlane.xlu0 %2212 }
 0x9d3   : > { %v2214_v36 = vsub.f32 %v2207_v32, %v2213_v35 }
 0x9d5   : > { %v2215_v37 = vmul.f32 1.442695, %v2214_v36 }
 0x9d7   : > { %3021 = vpow2.f32 %v2215_v37 }
 0x9e4   : > { %v3022_v38 = vpop.eup %3021 }
 0x9e5   : > { %v2217_v39 = vsel %vm567_vm2, %v3022_v38, 0.0 }
 0x9e6   : > { %2218 = vadd.xlane.f32.xlu1 %v2217_v39 }
 0xa6f   : > { %v2219_v41 = vpop.xlane.xlu1 %2218 }
 0xa70   : > { %3023 = vrcp.f32 %v2219_v41 }
 0xa7d   : > { %v3024_v42 = vpop.eup %3023 }
 0xa7e   : > { %v2221_v43 = vmul.f32 %v3024_v42, %v3022_v38 }
 0xa80   : > { %2934 = vmatmul.mubr.msk.f32.vlgmr.msra.gmra.mxu0 %vm567_vm2, %v2221_v43 }
 0xa81   : > { %2949 = vmatprep.mubr.msk.f32.mxu0 %vm3106_vm0, %v3105_v1  ;;  %2942 = vmatpush3.msra.mxu0 %v2385_v46 }
 0xa82   : > { %2943 = vmatprep.subr.mxu0 %v3105_v1 }
 0xa83   : > { %2944 = vmatpush3.msra.mxu0 %v2384_v47 }
 0xa84   : > { %2945 = vmatprep.subr.mxu0 %v3105_v1 }
 0xa85   : > { %2946 = vmatpush3.msra.mxu0 %v2383_v48 }
 0xa86   : > { %2947 = vmatprep.subr.mxu0 %v3105_v1 }
 0xa87   : > { %2948 = vmatpush3.msra.mxu0 %v2382_v49 }
 0xb40   : > { %v2293_v44 = vpop.f32.mrf.mxu0 }
 0xb41   : > { %2939 = vmatmul.mubr.msk.f32.vlgmr.msra.gmra.mxu1 %vm567_vm2, %v2293_v44 }
 0xb42   : > { %v2935_v45 = vpop.f32.mrf.mxu0 }
 0xc01   : > { %v2368_v50 = vpop.f32.mrf.mxu1 }
 0xc02   : > { %v2372_v51 = vadd.f32 %v2368_v50, %v2049_v30 }
 0xc03   : > { %v2940_v53 = vpop.f32.mrf.mxu1 }
 0xc04   : > { %v2373_v54 = vadd.f32 %v2372_v51, %v3248_v5 }
 0xc06   : > { %v2381_v55 = vadd.f32 %v2653_v52, %v2373_v54 }
 0xc08   : > { %2950 = vmatmul.mubr.msk.f32.vlgmr.msra.gmra.mxu0 %vm412_vm1, %v2381_v55 }
 0xcc8   : > { %v2462_v57 = vpop.f32.mrf.mxu0 }
 0xcc9   : > { %v2463_v1 = vadd.f32 %v2654_v56, %v2462_v57 }
 0xcca   : > { %v2951_v58 = vpop.f32.mrf.mxu0 }
 0xccb   : > { %v2467_v59 = vmul.f32 0.70710677, %v2463_v1  ;;  %v2466_v61 = vmul.f32 0.5, %v2463_v1 }
 0xccd   : > { %3025 = verf.f32 %v2467_v59 }
 0xcda   : > { %v3026_v60 = vpop.eup %3025 }
 0xcdb   : > { %v2469_v62 = vadd.f32 1.0, %v3026_v60 }
 0xcdd   : > { %v2470_v5 = vmul.f32 %v2469_v62, %v2466_v61 }
 0xcdf   : > { %v2471_v63 = vadd.f32 %v2470_v5, %v2381_v55 }
 0xce1   : > { %2472 = vst.msk [vmem:[%s391_s28] sm:$0xff] %vm412_vm1, %v2471_v63 }
 0xce2   : > { %3040 = shalt.err (!%p3037_p5)
}
 0xce3   : > { %s3041_s16 = scalar_lea.hbm %s2486_s14, 128  ;;  %s3045_s28 = scalar_lea.hbm %s3663_s11, 256 }
 0xce4   : > { %p3042_p6 = scmp.ne.s32.totalorder %s2486_s14, %s3041_s16  ;;  %p3046_p10 = scmp.lt.s32.totalorder %s2486_s14, %s3663_s11 }
 0xce5   : > { %p3047_p11 = scmp.lt.s32.totalorder %s3045_s28, %s3041_s16 }
 0xce6   : > { %p3043_p7 = pnand %p3042_p6, %p3208_p4 }
 0xce7   : > { %p3048_p12 = por %p3047_p11, %p3046_p10 }
 0xce8   : > { %p3044_p9 = pneg %p3043_p7 }
 0xcea   : > { %p3049_p13 = pnand %p3048_p12, %p3044_p9 }
 0xcec   : > { %3052 = shalt.err (!%p3049_p13)
}
 0xced   : > { %2952 = dma.vmem_to_hbm [thread:$0]  (%p3208_p4), %s2489_s12, 128, %s2486_s14, %s2474_s15  }
 0xcee PF: > { %p2958_p0 = scmp.ge.s32.totalorder %s3103_s22, 2  ;;  %s2500_s0 = sand.u32 1, %s3083_s17  }
 0xcef   : > { %s2501_s1 = scalar_lea.sflag [#allocation5], %s2500_s0 }
 0xcf0   : > { %p2955_p1 = pnand %p2958_p0, %p3215_p8 }
 0xcf2   : > { %p2956_p2 = pneg %p2955_p1 }
 0xcf4   : > { %3078 = dma.done.wait (%p2956_p2), %s2501_s1, 128  }
 0xcf5   : > { %3080 = vsyncadd (%p2956_p2), %s2501_s1, 4294967168  ;;  %s24_s22 = sadd.s32 1, %s3103_s22   ;;  %s3672_s27 = sld [smem:[#allocation7_spill]] }
 0xcf6   : > { %p21_p3 = scmp.ge.s32.totalorder %s24_s22, 4   ;;  %s3673_s17 = smov %s3087_s18 }
 0xcf7   : > { %s3674_s18 = smov %s3091_s19  ;;  %s3675_s19 = smov %s3221_s30 }
 0xcf8   : > { %s3676_s20 = smov %s3099_s21  ;;  %23 = sbr.rel (!%p21_p3) target bundleno = 7 (0x7), region = 137 }
 0xcfb   : > { %s3677_s21 = smov %s3672_s27 }
 0xcfd   :  { %2506 = vsyncpa [#allocation5], 1 }
 0xcfe   :  { %2508 = vsyncpa [#allocation5 + $0x1], 1 }

// kernel: tpu_custom_call.1
= control target key start
LH: loop header
LB: loop body
LE: loop exit
PB: predicated region body
PF: predicated region fallthrough
CT: control target
= control target key end

     0   :  { %s3652_s0 = inlined_call_operand.vmem [shape: f32[2,8,32], index: 0, kind: input, shape index: {}]   ;;  %s3653_s1 = inlined_call_operand.vmem [shape: f32[4,32,8], index: 1, kind: input, shape index: {}]   ;;  %s3654_s2 = inlined_call_operand.vmem [shape: f32[4,1,8], index: 2, kind: input, shape index: {}]   ;;  %s3655_s3 = inlined_call_operand.vmem [shape: f32[4,32,8], index: 3, kind: input, shape index: {}]   ;;  %s3656_s4 = inlined_call_operand.vmem [shape: f32[4,1,8], index: 4, kind: input, shape index: {}]   ;;  %s3657_s5 = inlined_call_operand.vmem [shape: f32[4,32,8], index: 5, kind: input, shape index: {}]   ;;  %s3658_s6 = inlined_call_operand.vmem [shape: f32[4,1,8], index: 6, kind: input, shape index: {}]   ;;  %s3659_s7 = inlined_call_operand.vmem [shape: f32[4,8,32], index: 7, kind: input, shape index: {}]   ;;  %s3660_s8 = inlined_call_operand.vmem [shape: f32[1,32], index: 8, kind: input, shape index: {}]   ;;  %s3661_s9 = inlined_call_operand.vmem [shape: f32[32,32], index: 9, kind: input, shape index: {}]   ;;  %s3662_s10 = inlined_call_operand.vmem [shape: f32[1,32], index: 10, kind: input, shape index: {}]   ;;  %s3663_s11 = inlined_call_operand.hbm [shape: f32[2,8,32], index: 11, kind: output, shape index: {}]  }
   0x1   :  { %3665 = sst [smem:[#allocation8_spill]] %s3652_s0 }
   0x2   :  { %3666 = sst [smem:[#allocation9_spill]] %s3653_s1 }
   0x3   :  { %16 = vsyncpa [#allocation5], 0 }
   0x4   :  { %18 = vsyncpa [#allocation5 + $0x1], 0  ;;  %s3168_s17 = smov 0   ;;  %s3170_s18 = smov 0  }
   0x5   :  { %s3172_s19 = smov 0   ;;  %s3174_s20 = smov 0  }
   0x6   :  { %s3176_s21 = smov 0   ;;  %s3178_s22 = smov 0  }
   0x7 LB: > { %s2558_s23 = sadd.s32 4294967295, %s3103_s22   ;;  %s2559_s24 = sadd.s32 4294967294, %s3103_s22   ;;  %s3103_s22 = sphi %s3178_s22, %s24_s22   ;;  %s3099_s21 = sphi %s3176_s21, %s3677_s21   ;;  %s3095_s20 = sphi %s3174_s20, %s3676_s20   ;;  %s3091_s19 = sphi %s3172_s19, %s3675_s19   ;;  %s3087_s18 = sphi %s3170_s18, %s3674_s18   ;;  %s3083_s17 = sphi %s3168_s17, %s3673_s17  }
   0x8   : > { %s36_s25 = sadd.s32 1, %s3099_s21  ;;  %s281_s26 = sadd.s32 1, %s3091_s19 }
   0x9   : > { %p38_p0 = scmp.ge.s32.totalorder %s36_s25, 2  ;;  %p291_p1 = scmp.ne.s32.totalorder %s3091_s19, %s3087_s18 }
   0xa   : > { %p292_p2 = scmp.eq.s32.totalorder %s2558_s23, 1  ;;  %p297_p3 = scmp.ne.s32.totalorder %s3087_s18, %s3083_s17 }
   0xb   : > { %s3679_s25 = smov (%p38_p0, %s36_s25), 0  ;;  %p298_p5 = scmp.eq.s32.totalorder %s2559_s24, 1 }
   0xc   : > { %3667 = sst [smem:[#allocation7_spill]] %s3679_s25  ;;  %p3208_p4 = por %p292_p2, %p291_p1 }
   0xd   : > { %s276_s28 = ssub.s32 %s3099_s21, %s3679_s25  ;;  %p2562_p6 = scmp.ge.s32.totalorder %s3103_s22, 1 }
   0xe   : > { %p279_p7 = scmp.eq.s32.totalorder %s276_s28, 0  ;;  %p3215_p8 = por %p298_p5, %p297_p3 }
   0xf   : > { %p353_p9 = scmp.lt.s32.totalorder %s3103_s22, 3 }
  0x10   : > { %s3221_s30 = scalar_select %p279_p7, %s3091_s19, %s281_s26  }
  0x11   : > { %p354_p10 = pnand %p2562_p6, %p353_p9 }
  0x12   : > { %p392_p11 = scmp.lt.s32.totalorder (!%p354_p10), %s3095_s20, 1  ;;  %s3670_s0 = sld [smem:[#allocation8_spill]] (!%p354_p10) }
  0x13   : > { %357 = sbr.rel (%p354_p10) target bundleno = 3310 (0xcee), region = 64  ;;  %s3671_s1 = sld [smem:[#allocation9_spill]] (!%p354_p10) }
  0x14   : > { %s389_s24 = sand.u32 (!%p354_p10), 1, %s3087_s18  }
  0x18   : > { %v404_v0 = vld [vmem:[%s3655_s3 + $0x18] sm:$0xff]  ;;  %v3105_v1 = vmov 0.0   ;;  %v403_v2 = vld [vmem:[%s3655_s3 + $0x10] sm:$0xff]  ;;  %vm3106_vm0 = vmmov 0   ;;  %s393_s16 = scalar_select %p392_p11, %s3095_s20, 1  ;;  %v402_v3 = vld [vmem:[%s3655_s3 + $0x8] sm:$0xff] }
  0x19   : > { %2749 = vmatprep.subr.mxu0 %v3105_v1  ;;  %2757 = vmatprep.mubr.msk.f32.mxu0 %vm3106_vm0, %v3105_v1  ;;  %v401_v4 = vld [vmem:[%s3655_s3] sm:$0xff]  ;;  %vm412_vm1 = vcmask 261120   ;;  %v2572_v6 = vld [vmem:[%s3655_s3 + $0x38] sm:$0xff]  ;;  %v2571_v8 = vld [vmem:[%s3655_s3 + $0x30] sm:$0xff]  ;;  %vm567_vm2 = vcmask 64512  }
  0x1a   : > { %2750 = vmatpush3.msra.mxu0 %v404_v0  ;;  %2760 = vmatprep.subr.mxu1 %v3105_v1  ;;  %s2564_s26 = sshll.u32 %s393_s16, 3  ;;  %v489_v7 = vld [vmem:[%s3657_s5 + $0x18] sm:$0xff]  ;;  %v488_v9 = vld [vmem:[%s3657_s5 + $0x10] sm:$0xff]  ;;  %v2570_v10 = vld [vmem:[%s3655_s3 + $0x28] sm:$0xff]  ;;  %s2563_s16 = sshll.u32 %s389_s24, 3 }
  0x1b   : > { %2751 = vmatprep.subr.mxu0 %v3105_v1  ;;  %2768 = vmatprep.mubr.msk.f32.mxu1 %vm3106_vm0, %v3105_v1  ;;  %s395_s15 = scalar_lea.vmem %s3670_s0, %s2564_s26  ;;  %v487_v11 = vld [vmem:[%s3657_s5 + $0x8] sm:$0xff]  ;;  %v2569_v12 = vld [vmem:[%s3655_s3 + $0x20] sm:$0xff]  ;;  %v2586_v14 = vld [vmem:[%s3655_s3 + $0x58] sm:$0xff]  ;;  %s2657_s26 = sshll.u32 %s3095_s20, 7 }
  0x1c   : > { %2752 = vmatpush3.msra.mxu0 %v403_v2  ;;  %v3248_v5 = vld [vmem:[%s395_s15] sm:$0xff]  ;;  %2761 = vmatpush3.msra.mxu1 %v489_v7  ;;  %v2585_v15 = vld [vmem:[%s3655_s3 + $0x50] sm:$0xff]  ;;  %v2579_v16 = vld [vmem:[%s3657_s5 + $0x38] sm:$0xff]  ;;  %s391_s28 = scalar_lea.vmem [#allocation4], %s2563_s16  ;;  %s2486_s14 = scalar_lea.hbm %s3663_s11, %s2657_s26 }
  0x1d   : > { %2753 = vmatprep.subr.mxu0 %v3105_v1  ;;  %2762 = vmatprep.subr.mxu1 %v3105_v1  ;;  %v486_v13 = vld [vmem:[%s3657_s5] sm:$0xff]  ;;  %v2584_v17 = vld [vmem:[%s3655_s3 + $0x48] sm:$0xff]  ;;  %v2578_v18 = vld [vmem:[%s3657_s5 + $0x30] sm:$0xff]  ;;  %s2488_s12 = sshll.u32 %s391_s28, 4  ;;  %s2474_s15 = scalar_lea.sflag [#allocation5], %s389_s24  ;;  %s2489_s12 = int_to_ptr.vmem [resolvable:$true] %s2488_s12 }
  0x1e   : > { %2754 = vmatpush3.msra.mxu0 %v402_v3  ;;  %2763 = vmatpush3.msra.mxu1 %v488_v9  ;;  %v2583_v19 = vld [vmem:[%s3655_s3 + $0x40] sm:$0xff]  ;;  %v2600_v20 = vld [vmem:[%s3655_s3 + $0x78] sm:$0xff]  ;;  %v2577_v21 = vld [vmem:[%s3657_s5 + $0x28] sm:$0xff]  ;;  %s3027_s23 = scalar_lea.vmem %s2489_s12, 128  ;;  %s3107_s0 = smov [#allocation4]  }
  0x1f   : > { %2755 = vmatprep.subr.mxu0 %v3105_v1  ;;  %2764 = vmatprep.subr.mxu1 %v3105_v1  ;;  %v2599_v22 = vld [vmem:[%s3655_s3 + $0x70] sm:$0xff]  ;;  %v2576_v23 = vld [vmem:[%s3657_s5 + $0x20] sm:$0xff]  ;;  %v2598_v24 = vld [vmem:[%s3655_s3 + $0x68] sm:$0xff]  ;;  %p3028_p12 = scmp.ne.s32.totalorder %s2489_s12, %s3027_s23 }
  0x20   : > { %2756 = vmatpush3.msra.mxu0 %v401_v4  ;;  %2765 = vmatpush3.msra.mxu1 %v487_v11  ;;  %v2597_v25 = vld [vmem:[%s3655_s3 + $0x60] sm:$0xff]  ;;  %v1086_v26 = vld [vmem:[%s3671_s1 + $0x18] sm:$0xff]  ;;  %v1085_v28 = vld [vmem:[%s3671_s1 + $0x10] sm:$0xff] }
  0x21   : > { %2758 = vmatmul.mubr.msk.f32.vlgmr.msra.gmra.mxu0 %vm412_vm1, %v3248_v5  ;;  %2771 = vmatprep.subr.mxu0 %v3105_v1  ;;  %v2593_v27 = vld [vmem:[%s3657_s5 + $0x58] sm:$0xff]  ;;  %v2592_v29 = vld [vmem:[%s3657_s5 + $0x50] sm:$0xff]  ;;  %v1084_v30 = vld [vmem:[%s3671_s1 + $0x8] sm:$0xff]  ;;  %p3029_p13 = pnand %p3028_p12, %p3208_p4 }
  0x22   : > { %2772 = vmatpush3.msra.mxu0 %v2572_v6  ;;  %2779 = vmatprep.mubr.msk.f32.mxu0 %vm3106_vm0, %v3105_v1  ;;  %v1083_v31 = vld [vmem:[%s3671_s1] sm:$0xff]  ;;  %v2591_v32 = vld [vmem:[%s3657_s5 + $0x48] sm:$0xff]  ;;  %v2607_v34 = vld [vmem:[%s3657_s5 + $0x78] sm:$0xff] }
  0x23   : > { %2773 = vmatprep.subr.mxu0 %v3105_v1  ;;  %2766 = vmatprep.subr.mxu1 %v3105_v1  ;;  %v2590_v33 = vld [vmem:[%s3657_s5 + $0x40] sm:$0xff]  ;;  %v2606_v35 = vld [vmem:[%s3657_s5 + $0x70] sm:$0xff]  ;;  %v2605_v36 = vld [vmem:[%s3657_s5 + $0x68] sm:$0xff]  ;;  %p3030_p0 = pneg %p3029_p13 }
  0x24   : > { %2774 = vmatpush3.msra.mxu0 %v2571_v8  ;;  %2767 = vmatpush3.msra.mxu1 %v486_v13  ;;  %v2604_v37 = vld [vmem:[%s3657_s5 + $0x60] sm:$0xff] }
  0x25   : > { %2775 = vmatprep.subr.mxu0 %v3105_v1  ;;  %2782 = vmatprep.subr.mxu1 %v3105_v1  ;;  %v2565_v38 = vld [vmem:[%s3656_s4] ss:$0 sm:$0xff]  ;;  %v2574_v42 = vld [vmem:[%s3656_s4 + $0x1] ss:$0 sm:$0xff]  ;;  %v2588_v51 = vld [vmem:[%s3656_s4 + $0x2] ss:$0 sm:$0xff] }
  0x26   : > { %2776 = vmatpush3.msra.mxu0 %v2570_v10  ;;  %2769 = vmatmul.mubr.msk.f32.vlgmr.msra.gmra.mxu1 %vm412_vm1, %v3248_v5  ;;  %v2567_v45 = vld [vmem:[%s3658_s6] ss:$0 sm:$0xff]  ;;  %v2581_v55 = vld [vmem:[%s3658_s6 + $0x1] ss:$0 sm:$0xff]  ;;  %v2602_v56 = vld [vmem:[%s3656_s4 + $0x3] ss:$0 sm:$0xff] }
  0x27   : > { %2777 = vmatprep.subr.mxu0 %v3105_v1  ;;  %2783 = vmatpush3.msra.mxu1 %v2579_v16  ;;  %v2611_v63 = vld [vmem:[%s3654_s2] ss:$0 sm:$0xff]  ;;  %v2595_v6 = vld [vmem:[%s3658_s6 + $0x2] ss:$0 sm:$0xff]  ;;  %v2609_v10 = vld [vmem:[%s3658_s6 + $0x3] ss:$0 sm:$0xff] }
  0x28   : > { %2778 = vmatpush3.msra.mxu0 %v2569_v12  ;;  %2784 = vmatprep.subr.mxu1 %v3105_v1  ;;  %v2617_v16 = vld [vmem:[%s3671_s1 + $0x28] sm:$0xff] }
  0x29   : > { %2780 = vmatmul.mubr.msk.f32.vlgmr.msra.gmra.mxu0 %vm412_vm1, %v3248_v5  ;;  %2793 = vmatprep.subr.mxu0 %v3105_v1 }
  0x2a   : > { %2794 = vmatpush3.msra.mxu0 %v2586_v14  ;;  %2801 = vmatprep.mubr.msk.f32.mxu0 %vm3106_vm0, %v3105_v1  ;;  %v2619_v14 = vld [vmem:[%s3671_s1 + $0x38] sm:$0xff] }
  0x2b   : > { %2795 = vmatprep.subr.mxu0 %v3105_v1  ;;  %2785 = vmatpush3.msra.mxu1 %v2578_v18 }
  0x2c   : > { %2796 = vmatpush3.msra.mxu0 %v2585_v15  ;;  %2786 = vmatprep.subr.mxu1 %v3105_v1  ;;  %v2618_v15 = vld [vmem:[%s3671_s1 + $0x30] sm:$0xff] }
  0x2d   : > { %2797 = vmatprep.subr.mxu0 %v3105_v1  ;;  %2787 = vmatpush3.msra.mxu1 %v2577_v21 }
  0x2e   : > { %2798 = vmatpush3.msra.mxu0 %v2584_v17  ;;  %2788 = vmatprep.subr.mxu1 %v3105_v1  ;;  %v2616_v17 = vld [vmem:[%s3671_s1 + $0x20] sm:$0xff] }
  0x2f   : > { %2799 = vmatprep.subr.mxu0 %v3105_v1  ;;  %2789 = vmatpush3.msra.mxu1 %v2576_v23 }
  0x30   : > { %2800 = vmatpush3.msra.mxu0 %v2583_v19  ;;  %2790 = vmatprep.mubr.msk.f32.mxu1 %vm3106_vm0, %v3105_v1 }
  0x31   : > { %2802 = vmatmul.mubr.msk.f32.vlgmr.msra.gmra.mxu0 %vm412_vm1, %v3248_v5  ;;  %2815 = vmatprep.subr.mxu0 %v3105_v1 }
  0x32   : > { %2816 = vmatpush3.msra.mxu0 %v2600_v20  ;;  %2823 = vmatprep.mubr.msk.f32.mxu0 %vm3106_vm0, %v3105_v1 }
  0x33   : > { %2817 = vmatprep.subr.mxu0 %v3105_v1  ;;  %2804 = vmatprep.subr.mxu1 %v3105_v1 }
  0x34   : > { %2818 = vmatpush3.msra.mxu0 %v2599_v22  ;;  %2791 = vmatmul.mubr.msk.f32.vlgmr.msra.gmra.mxu1 %vm412_vm1, %v3248_v5 }
  0x35   : > { %2819 = vmatprep.subr.mxu0 %v3105_v1  ;;  %2805 = vmatpush3.msra.mxu1 %v2593_v27 }
  0x36   : > { %2820 = vmatpush3.msra.mxu0 %v2598_v24  ;;  %2806 = vmatprep.subr.mxu1 %v3105_v1 }
  0x37   : > { %2821 = vmatprep.subr.mxu0 %v3105_v1  ;;  %2807 = vmatpush3.msra.mxu1 %v2592_v29 }
  0x38   : > { %2822 = vmatpush3.msra.mxu0 %v2597_v25  ;;  %2808 = vmatprep.subr.mxu1 %v3105_v1 }
  0x39   : > { %2824 = vmatmul.mubr.msk.f32.vlgmr.msra.gmra.mxu0 %vm412_vm1, %v3248_v5  ;;  %2837 = vmatprep.subr.mxu0 %v3105_v1 }
  0x3a   : > { %2838 = vmatpush3.msra.mxu0 %v1086_v26  ;;  %2845 = vmatprep.mubr.msk.f32.mxu0 %vm3106_vm0, %v3105_v1 }
  0x3b   : > { %2839 = vmatprep.subr.mxu0 %v3105_v1  ;;  %2812 = vmatprep.mubr.msk.f32.mxu1 %vm3106_vm0, %v3105_v1 }
  0x3c   : > { %2840 = vmatpush3.msra.mxu0 %v1085_v28  ;;  %2809 = vmatpush3.msra.mxu1 %v2591_v32 }
  0x3d   : > { %2841 = vmatprep.subr.mxu0 %v3105_v1  ;;  %2810 = vmatprep.subr.mxu1 %v3105_v1 }
  0x3e   : > { %2842 = vmatpush3.msra.mxu0 %v1084_v30  ;;  %2811 = vmatpush3.msra.mxu1 %v2590_v33  ;;  %v2621_v30 = vld [vmem:[%s3654_s2 + $0x1] ss:$0 sm:$0xff] }
  0x3f   : > { %2843 = vmatprep.subr.mxu0 %v3105_v1  ;;  %2826 = vmatprep.subr.mxu1 %v3105_v1 }
  0x40   : > { %2844 = vmatpush3.msra.mxu0 %v1083_v31  ;;  %2813 = vmatmul.mubr.msk.f32.vlgmr.msra.gmra.mxu1 %vm412_vm1, %v3248_v5 }
  0x41   : > { %2846 = vmatmul.mubr.msk.f32.vlgmr.msra.gmra.mxu0 %vm412_vm1, %v3248_v5  ;;  %2858 = vmatprep.subr.mxu0 %v3105_v1 }
  0x42   : > { %2866 = vmatprep.mubr.msk.f32.mxu0 %vm3106_vm0, %v3105_v1  ;;  %2827 = vmatpush3.msra.mxu1 %v2607_v34 }
  0x43   : > { %2834 = vmatprep.mubr.msk.f32.mxu1 %vm3106_vm0, %v3105_v1  ;;  %2828 = vmatprep.subr.mxu1 %v3105_v1 }
  0x44   : > { %2829 = vmatpush3.msra.mxu1 %v2606_v35  ;;  %2859 = vmatpush3.msra.mxu0 %v2619_v14 }
  0x45   : > { %2830 = vmatprep.subr.mxu1 %v3105_v1  ;;  %2860 = vmatprep.subr.mxu0 %v3105_v1 }
  0x46   : > { %2831 = vmatpush3.msra.mxu1 %v2605_v36  ;;  %2861 = vmatpush3.msra.mxu0 %v2618_v15 }
  0x47   : > { %2832 = vmatprep.subr.mxu1 %v3105_v1  ;;  %2862 = vmatprep.subr.mxu0 %v3105_v1 }
  0x48   : > { %2833 = vmatpush3.msra.mxu1 %v2604_v37  ;;  %2863 = vmatpush3.msra.mxu0 %v2617_v16 }
  0x49   : > { %2848 = vmatprep.subr.mxu1 %v3105_v1  ;;  %2835 = vmatmul.mubr.msk.f32.vlgmr.msra.gmra.mxu1 %vm412_vm1, %v3248_v5 }
  0x4a   : > { %2850 = vmatprep.mubr.msk.f32.mxu1 %vm3106_vm0, %v3105_v1  ;;  %2864 = vmatprep.subr.mxu0 %v3105_v1 }
  0x4b   : > { %2865 = vmatpush3.msra.mxu0 %v2616_v17  ;;  %v2644_v17 = vld [vmem:[%s3671_s1 + $0x78] sm:$0xff] }
  0x4c   : > { %2867 = vmatmul.mubr.msk.f32.vlgmr.msra.gmra.mxu0 %vm412_vm1, %v3248_v5  ;;  %2889 = vmatprep.subr.mxu0 %v3105_v1 }
  0x4d   : > { %2897 = vmatprep.mubr.msk.f32.mxu0 %vm3106_vm0, %v3105_v1 }
  0xe1   : > { %v482_v39 = vpop.f32.mrf.mxu0 }
  0xe2   : > { %v483_v40 = vadd.f32 %v2565_v38, %v482_v39 }
  0xe3   : > { %v2759_v41 = vpop.f32.mrf.mxu0 }
  0xe4   : > { %568 = vst.msk [vmem:[#allocation2] sm:$0xff] %vm567_vm2, %v483_v40 }
  0xe6   : > { %v563_v48 = vpop.f32.mrf.mxu1 }
  0xe7   : > { %v564_v49 = vadd.f32 %v2567_v45, %v563_v48  ;;  %v2632_v45 = vld [vmem:[%s3671_s1 + $0x58] sm:$0xff]  ;;  %v2629_v48 = vld [vmem:[%s3671_s1 + $0x40] sm:$0xff] }
  0xe8   : > { %v2770_v50 = vpop.f32.mrf.mxu1  ;;  %2890 = vmatpush3.msra.mxu0 %v2632_v45 }
  0xe9   : > { %v649_v43 = vpop.f32.mrf.mxu0  ;;  %569 = vst.msk [vmem:[#allocation3] sm:$0xff] %vm567_vm2, %v564_v49  ;;  %2891 = vmatprep.subr.mxu0 %v3105_v1 }
  0xea   : > { %v650_v44 = vadd.f32 %v2574_v42, %v649_v43 }
  0xeb   : > { %v2781_v46 = vpop.f32.mrf.mxu0  ;;  %v1168_v47 = vld [vmem:[#allocation2] sm:$0xff] }
  0xec   : > { %737 = vst.msk [vmem:[#allocation2 + $0x8] sm:$0xff] %vm567_vm2, %v650_v44  ;;  %2849 = vmatpush3.xpose.msk.msra.mxu1 %vm567_vm2, %v1168_v47  ;;  %v2631_v46 = vld [vmem:[%s3671_s1 + $0x50] sm:$0xff]  ;;  %v2630_v47 = vld [vmem:[%s3671_s1 + $0x48] sm:$0xff] }
  0xed   : > { %2853 = vmatprep.subr.mxu1 %v3105_v1  ;;  %2892 = vmatpush3.msra.mxu0 %v2631_v46  ;;  %v2385_v46 = vld [vmem:[%s3661_s9 + $0x18] sm:$0xff] }
  0xee   : > { %2893 = vmatprep.subr.mxu0 %v3105_v1 }
  0xef   : > { %2894 = vmatpush3.msra.mxu0 %v2630_v47  ;;  %v2384_v47 = vld [vmem:[%s3661_s9 + $0x10] sm:$0xff] }
  0xf0   : > { %v1257_v3 = vld [vmem:[#allocation3] sm:$0xff]  ;;  %2895 = vmatprep.subr.mxu0 %v3105_v1 }
  0xf1   : > { %v819_v52 = vpop.f32.mrf.mxu0  ;;  %2896 = vmatpush3.msra.mxu0 %v2629_v48  ;;  %v2383_v48 = vld [vmem:[%s3661_s9 + $0x8] sm:$0xff] }
  0xf2   : > { %v820_v53 = vadd.f32 %v2588_v51, %v819_v52  ;;  %2898 = vmatmul.mubr.msk.f32.vlgmr.msra.gmra.mxu0 %vm412_vm1, %v3248_v5  ;;  %2910 = vmatprep.subr.mxu0 %v3105_v1  ;;  %v2626_v52 = vld [vmem:[%s3659_s7 + $0x8] sm:$0xff] }
  0xf3   : > { %v2803_v54 = vpop.f32.mrf.mxu0  ;;  %v1416_v33 = vld [vmem:[#allocation2 + $0x8] sm:$0xff]  ;;  %2912 = vmatprep.mubr.msk.f32.mxu0 %vm3106_vm0, %v3105_v1 }
  0xf4   : > { %907 = vst.msk [vmem:[#allocation2 + $0x10] sm:$0xff] %vm567_vm2, %v820_v53  ;;  %v732_v57 = vpop.f32.mrf.mxu1 }
  0xf5   : > { %v733_v59 = vadd.f32 %v2581_v55, %v732_v57  ;;  %v1331_v55 = vld [vmem:[%s3659_s7] sm:$0xff] }
  0xf6   : > { %v2792_v61 = vpop.f32.mrf.mxu1 }
  0xf7   : > { %739 = vst.msk [vmem:[#allocation3 + $0x8] sm:$0xff] %vm567_vm2, %v733_v59 }
  0xf9   : > { %v989_v58 = vpop.f32.mrf.mxu0 }
  0xfa   : > { %v990_v60 = vadd.f32 %v2602_v56, %v989_v58  ;;  %v2634_v58 = vld [vmem:[%s3654_s2 + $0x2] ss:$0 sm:$0xff] }
  0xfb   : > { %v2825_v62 = vpop.f32.mrf.mxu0 }
  0xfc   : > { %1077 = vst.msk [vmem:[#allocation2 + $0x18] sm:$0xff] %vm567_vm2, %v990_v60  ;;  %v1811_v60 = vld [vmem:[#allocation2 + $0x10] sm:$0xff] }
  0xfe   : > { %v1505_v34 = vld [vmem:[#allocation3 + $0x8] sm:$0xff] }
 0x100   : > { %v902_v7 = vpop.f32.mrf.mxu1 }
 0x101   : > { %v1164_v0 = vpop.f32.mrf.mxu0  ;;  %v903_v8 = vadd.f32 %v2595_v6, %v902_v7 }
 0x102   : > { %v1165_v2 = vadd.f32 %v2611_v63, %v1164_v0  ;;  %v2814_v9 = vpop.f32.mrf.mxu1 }
 0x103   : > { %v2847_v4 = vpop.f32.mrf.mxu0  ;;  %909 = vst.msk [vmem:[#allocation3 + $0x10] sm:$0xff] %vm567_vm2, %v903_v8 }
 0x104   : > { %2851 = vmatmul.mubr.msk.f32.vlgmr.msra.gmra.mxu1 %vm567_vm2, %v1165_v2 }
 0x105   : > { %2854 = vmatpush3.msra.mxu1 %v1257_v3  ;;  %2855 = vmatprep.mubr.msk.f32.mxu1 %vm3106_vm0, %v3105_v1 }
 0x106   : > { %2869 = vmatprep.subr.mxu1 %v3105_v1 }
 0x109   : > { %v1072_v11 = vpop.f32.mrf.mxu1 }
 0x10a   : > { %v1073_v12 = vadd.f32 %v2609_v10, %v1072_v11  ;;  %v1900_v61 = vld [vmem:[#allocation3 + $0x10] sm:$0xff] }
 0x10b   : > { %v2836_v13 = vpop.f32.mrf.mxu1 }
 0x10c   : > { %1079 = vst.msk [vmem:[#allocation3 + $0x18] sm:$0xff] %vm567_vm2, %v1073_v12  ;;  %v1411_v26 = vpop.f32.mrf.mxu0  ;;  %v2639_v13 = vld [vmem:[%s3659_s7 + $0x10] sm:$0xff] }
 0x10d   : > { %v1412_v32 = vadd.f32 %v2621_v30, %v1411_v26  ;;  %2911 = vmatpush3.msra.mxu0 %v2639_v13 }
 0x10e   : > { %v2868_v27 = vpop.f32.mrf.mxu0  ;;  %2926 = vmatprep.subr.mxu0 %v3105_v1 }
 0x1b2   : > { %v1806_v53 = vpop.f32.mrf.mxu0 }
 0x1b3   : > { %v1807_v59 = vadd.f32 %v2634_v58, %v1806_v53 }
 0x1b4   : > { %v2899_v54 = vpop.f32.mrf.mxu0 }
 0x1c4   : > { %v1242_v18 = vpop.f32.mrf.mxu1 }
 0x1c5   : > { %v1246_v19 = vsel %vm567_vm2, %v1242_v18, -inf }
 0x1c6   : > { %1247 = vmax.xlane.f32.xlu0 %v1246_v19  ;;  %v2852_v20 = vpop.f32.mrf.mxu1  ;;  %v2642_v19 = vld [vmem:[%s3671_s1 + $0x68] sm:$0xff] }
 0x1c7   : > { %v2641_v20 = vld [vmem:[%s3671_s1 + $0x60] sm:$0xff] }
 0x24f   : > { %v1248_v21 = vpop.xlane.xlu0 %1247 }
 0x250   : > { %v1249_v22 = vsub.f32 %v1242_v18, %v1248_v21  ;;  %v2643_v18 = vld [vmem:[%s3671_s1 + $0x70] sm:$0xff]  ;;  %s3031_s1 = sshll.u32 %s3107_s0, 4  ;;  %s3032_s1 = int_to_ptr.vmem [resolvable:$false] %s3031_s1 }
 0x251   : > { %s3033_s20 = scalar_lea.vmem %s3032_s1, 256  ;;  %p3034_p1 = scmp.lt.s32.totalorder %s2489_s12, %s3032_s1 }
 0x252   : > { %v1250_v23 = vmul.f32 1.442695, %v1249_v22  ;;  %v2134_v22 = vld [vmem:[#allocation2 + $0x18] sm:$0xff]  ;;  %p3035_p2 = scmp.lt.s32.totalorder %s3033_s20, %s3027_s23 }
 0x254   : > { %3009 = vpow2.f32 %v1250_v23  ;;  %p3036_p3 = por %p3035_p2, %p3034_p1 }
 0x256   : > { %p3037_p5 = pnand %p3036_p3, %p3030_p0 }
 0x261   : > { %v3010_v24 = vpop.eup %3009 }
 0x262   : > { %v1252_v25 = vsel %vm567_vm2, %v3010_v24, 0.0 }
 0x263   : > { %1253 = vadd.xlane.f32.xlu0 %v1252_v25 }
 0x2ec   : > { %v1254_v28 = vpop.xlane.xlu0 %1253 }
 0x2ed   : > { %3011 = vrcp.f32 %v1254_v28  ;;  %v2223_v28 = vld [vmem:[#allocation3 + $0x18] sm:$0xff] }
 0x2fa   : > { %v3012_v29 = vpop.eup %3011 }
 0x2fb   : > { %v1256_v31 = vmul.f32 %v3012_v29, %v3010_v24  ;;  %v2646_v24 = vld [vmem:[%s3654_s2 + $0x3] ss:$0 sm:$0xff] }
 0x2fd   : > { %2856 = vmatmul.mubr.msk.f32.vlgmr.msra.gmra.mxu1 %vm567_vm2, %v1256_v31 }
 0x2fe   : > { %2870 = vmatpush3.xpose.msk.msra.mxu1 %vm567_vm2, %v1416_v33  ;;  %2871 = vmatprep.mubr.msk.f32.mxu1 %vm3106_vm0, %v3105_v1 }
 0x2ff   : > { %2874 = vmatprep.subr.mxu1 %v3105_v1 }
 0x301   : > { %2872 = vmatmul.mubr.msk.f32.vlgmr.msra.gmra.mxu1 %vm567_vm2, %v1412_v32 }
 0x302   : > { %2875 = vmatpush3.msra.mxu1 %v1505_v34  ;;  %2876 = vmatprep.mubr.msk.f32.mxu1 %vm3106_vm0, %v3105_v1 }
 0x303   : > { %2879 = vmatprep.subr.mxu1 %v3105_v1 }
 0x3bd   : > { %v1327_v35 = vpop.f32.mrf.mxu1 }
 0x3bf   : > { %v2857_v36 = vpop.f32.mrf.mxu1 }
 0x3c1   : > { %v1489_v37 = vpop.f32.mrf.mxu1 }
 0x3c2   : > { %v1493_v38 = vsel %vm567_vm2, %v1489_v37, -inf }
 0x3c3   : > { %1494 = vmax.xlane.f32.xlu1 %v1493_v38  ;;  %v2873_v39 = vpop.f32.mrf.mxu1 }
 0x44c   : > { %v1495_v40 = vpop.xlane.xlu1 %1494 }
 0x44d   : > { %v1496_v41 = vsub.f32 %v1489_v37, %v1495_v40  ;;  %v2651_v40 = vld [vmem:[%s3659_s7 + $0x18] sm:$0xff] }
 0x44f   : > { %v1497_v42 = vmul.f32 1.442695, %v1496_v41 }
 0x451   : > { %3013 = vpow2.f32 %v1497_v42 }
 0x45e   : > { %v3014_v43 = vpop.eup %3013 }
 0x45f   : > { %v1499_v44 = vsel %vm567_vm2, %v3014_v43, 0.0 }
 0x460   : > { %1500 = vadd.xlane.f32.xlu1 %v1499_v44 }
 0x4e9   : > { %v1501_v49 = vpop.xlane.xlu1 %1500 }
 0x4ea   : > { %3015 = vrcp.f32 %v1501_v49  ;;  %v2382_v49 = vld [vmem:[%s3661_s9] sm:$0xff] }
 0x4f7   : > { %v3016_v50 = vpop.eup %3015 }
 0x4f8   : > { %v1503_v51 = vmul.f32 %v3016_v50, %v3014_v43 }
 0x4fa   : > { %2877 = vmatmul.mubr.msk.f32.vlgmr.msra.gmra.mxu1 %vm567_vm2, %v1503_v51 }
 0x4fb   : > { %2880 = vmatpush3.msra.mxu1 %v2626_v52  ;;  %2881 = vmatprep.mubr.msk.f32.mxu1 %vm3106_vm0, %v3105_v1  ;;  %v2653_v52 = vld [vmem:[%s3660_s8] ss:$0 sm:$0xff] }
 0x4fc   : > { %2884 = vmatprep.subr.mxu1 %v3105_v1 }
 0x5ba   : > { %v1575_v56 = vpop.f32.mrf.mxu1 }
 0x5bb   : > { %2882 = vmatmul.mubr.msk.f32.vlgmr.msra.gmra.mxu1 %vm567_vm2, %v1575_v56  ;;  %v2654_v56 = vld [vmem:[%s3662_s10] ss:$0 sm:$0xff] }
 0x5bc   : > { %2885 = vmatpush3.msra.mxu1 %v1331_v55  ;;  %v2878_v57 = vpop.f32.mrf.mxu1  ;;  %2886 = vmatprep.mubr.msk.f32.mxu1 %vm3106_vm0, %v3105_v1 }
 0x5bd   : > { %2900 = vmatprep.subr.mxu1 %v3105_v1 }
 0x5bf   : > { %2887 = vmatmul.mubr.msk.f32.vlgmr.msra.gmra.mxu1 %vm567_vm2, %v1327_v35 }
 0x5c0   : > { %2901 = vmatpush3.xpose.msk.msra.mxu1 %vm567_vm2, %v1811_v60  ;;  %2902 = vmatprep.mubr.msk.f32.mxu1 %vm3106_vm0, %v3105_v1 }
 0x5c1   : > { %2905 = vmatprep.subr.mxu1 %v3105_v1 }
 0x5c3   : > { %2903 = vmatmul.mubr.msk.f32.vlgmr.msra.gmra.mxu1 %vm567_vm2, %v1807_v59 }
 0x5c4   : > { %2906 = vmatpush3.msra.mxu1 %v1900_v61  ;;  %2907 = vmatprep.mubr.msk.f32.mxu1 %vm3106_vm0, %v3105_v1 }
 0x5c5   : > { %2915 = vmatprep.subr.mxu1 %v3105_v1 }
 0x67b   : > { %v1650_v62 = vpop.f32.mrf.mxu1 }
 0x67d   : > { %v2883_v63 = vpop.f32.mrf.mxu1 }
 0x67f   : > { %v1723_v0 = vpop.f32.mrf.mxu1 }
 0x680   : > { %v1724_v2 = vadd.f32 %v1723_v0, %v1650_v62 }
 0x681   : > { %v2888_v3 = vpop.f32.mrf.mxu1 }
 0x683   : > { %v1884_v4 = vpop.f32.mrf.mxu1 }
 0x684   : > { %v1888_v6 = vsel %vm567_vm2, %v1884_v4, -inf }
 0x685   : > { %1889 = vmax.xlane.f32.xlu0 %v1888_v6  ;;  %v2904_v7 = vpop.f32.mrf.mxu1 }
 0x70e   : > { %v1890_v8 = vpop.xlane.xlu0 %1889 }
 0x70f   : > { %v1891_v9 = vsub.f32 %v1884_v4, %v1890_v8 }
 0x711   : > { %v1892_v10 = vmul.f32 1.442695, %v1891_v9 }
 0x713   : > { %3017 = vpow2.f32 %v1892_v10 }
 0x720   : > { %v3018_v11 = vpop.eup %3017 }
 0x721   : > { %v1894_v12 = vsel %vm567_vm2, %v3018_v11, 0.0 }
 0x722   : > { %1895 = vadd.xlane.f32.xlu1 %v1894_v12 }
 0x7ab   : > { %v1896_v14 = vpop.xlane.xlu1 %1895 }
 0x7ac   : > { %3019 = vrcp.f32 %v1896_v14 }
 0x7b9   : > { %v3020_v15 = vpop.eup %3019 }
 0x7ba   : > { %v1898_v16 = vmul.f32 %v3020_v15, %v3018_v11 }
 0x7bc   : > { %2908 = vmatmul.mubr.msk.f32.vlgmr.msra.gmra.mxu1 %vm567_vm2, %v1898_v16 }
 0x7bd   : > { %2916 = vmatpush3.msra.mxu1 %v2644_v17  ;;  %2923 = vmatprep.mubr.msk.f32.mxu1 %vm3106_vm0, %v3105_v1 }
 0x7be   : > { %2917 = vmatprep.subr.mxu1 %v3105_v1 }
 0x7bf   : > { %2918 = vmatpush3.msra.mxu1 %v2643_v18 }
 0x7c0   : > { %2919 = vmatprep.subr.mxu1 %v3105_v1 }
 0x7c1   : > { %2920 = vmatpush3.msra.mxu1 %v2642_v19 }
 0x7c2   : > { %2921 = vmatprep.subr.mxu1 %v3105_v1 }
 0x7c3   : > { %2922 = vmatpush3.msra.mxu1 %v2641_v20 }
 0x7c4   : > { %2924 = vmatmul.mubr.msk.f32.vlgmr.msra.gmra.mxu1 %vm412_vm1, %v3248_v5  ;;  %2936 = vmatprep.subr.mxu1 %v3105_v1 }
 0x7c5   : > { %2938 = vmatprep.mubr.msk.f32.mxu1 %vm3106_vm0, %v3105_v1  ;;  %2937 = vmatpush3.msra.mxu1 %v2651_v40 }
 0x87c   : > { %v1970_v21 = vpop.f32.mrf.mxu1 }
 0x87d   : > { %2913 = vmatmul.mubr.msk.f32.vlgmr.msra.gmra.mxu0 %vm567_vm2, %v1970_v21 }
 0x87e   : > { %2927 = vmatpush3.xpose.msk.msra.mxu0 %vm567_vm2, %v2134_v22  ;;  %v2909_v23 = vpop.f32.mrf.mxu1  ;;  %2928 = vmatprep.mubr.msk.f32.mxu0 %vm3106_vm0, %v3105_v1 }
 0x87f   : > { %2931 = vmatprep.subr.mxu0 %v3105_v1 }
 0x884   : > { %v2129_v25 = vpop.f32.mrf.mxu1 }
 0x885   : > { %v2130_v26 = vadd.f32 %v2646_v24, %v2129_v25 }
 0x886   : > { %v2925_v27 = vpop.f32.mrf.mxu1 }
 0x887   : > { %2929 = vmatmul.mubr.msk.f32.vlgmr.msra.gmra.mxu0 %vm567_vm2, %v2130_v26 }
 0x888   : > { %2932 = vmatpush3.msra.mxu0 %v2223_v28  ;;  %2933 = vmatprep.mubr.msk.f32.mxu0 %vm3106_vm0, %v3105_v1 }
 0x889   : > { %2941 = vmatprep.subr.mxu0 %v3105_v1 }
 0x93d   : > { %v2045_v29 = vpop.f32.mrf.mxu0 }
 0x93e   : > { %v2049_v30 = vadd.f32 %v2045_v29, %v1724_v2 }
 0x93f   : > { %v2914_v31 = vpop.f32.mrf.mxu0 }
 0x947   : > { %v2207_v32 = vpop.f32.mrf.mxu0 }
 0x948   : > { %v2211_v33 = vsel %vm567_vm2, %v2207_v32, -inf }
 0x949   : > { %2212 = vmax.xlane.f32.xlu0 %v2211_v33  ;;  %v2930_v34 = vpop.f32.mrf.mxu0 }
 0x9d2   : > { %v2213_v35 = vpop.xlane.xlu0 %2212 }
 0x9d3   : > { %v2214_v36 = vsub.f32 %v2207_v32, %v2213_v35 }
 0x9d5   : > { %v2215_v37 = vmul.f32 1.442695, %v2214_v36 }
 0x9d7   : > { %3021 = vpow2.f32 %v2215_v37 }
 0x9e4   : > { %v3022_v38 = vpop.eup %3021 }
 0x9e5   : > { %v2217_v39 = vsel %vm567_vm2, %v3022_v38, 0.0 }
 0x9e6   : > { %2218 = vadd.xlane.f32.xlu1 %v2217_v39 }
 0xa6f   : > { %v2219_v41 = vpop.xlane.xlu1 %2218 }
 0xa70   : > { %3023 = vrcp.f32 %v2219_v41 }
 0xa7d   : > { %v3024_v42 = vpop.eup %3023 }
 0xa7e   : > { %v2221_v43 = vmul.f32 %v3024_v42, %v3022_v38 }
 0xa80   : > { %2934 = vmatmul.mubr.msk.f32.vlgmr.msra.gmra.mxu0 %vm567_vm2, %v2221_v43 }
 0xa81   : > { %2949 = vmatprep.mubr.msk.f32.mxu0 %vm3106_vm0, %v3105_v1  ;;  %2942 = vmatpush3.msra.mxu0 %v2385_v46 }
 0xa82   : > { %2943 = vmatprep.subr.mxu0 %v3105_v1 }
 0xa83   : > { %2944 = vmatpush3.msra.mxu0 %v2384_v47 }
 0xa84   : > { %2945 = vmatprep.subr.mxu0 %v3105_v1 }
 0xa85   : > { %2946 = vmatpush3.msra.mxu0 %v2383_v48 }
 0xa86   : > { %2947 = vmatprep.subr.mxu0 %v3105_v1 }
 0xa87   : > { %2948 = vmatpush3.msra.mxu0 %v2382_v49 }
 0xb40   : > { %v2293_v44 = vpop.f32.mrf.mxu0 }
 0xb41   : > { %2939 = vmatmul.mubr.msk.f32.vlgmr.msra.gmra.mxu1 %vm567_vm2, %v2293_v44 }
 0xb42   : > { %v2935_v45 = vpop.f32.mrf.mxu0 }
 0xc01   : > { %v2368_v50 = vpop.f32.mrf.mxu1 }
 0xc02   : > { %v2372_v51 = vadd.f32 %v2368_v50, %v2049_v30 }
 0xc03   : > { %v2940_v53 = vpop.f32.mrf.mxu1 }
 0xc04   : > { %v2373_v54 = vadd.f32 %v2372_v51, %v3248_v5 }
 0xc06   : > { %v2381_v55 = vadd.f32 %v2653_v52, %v2373_v54 }
 0xc08   : > { %2950 = vmatmul.mubr.msk.f32.vlgmr.msra.gmra.mxu0 %vm412_vm1, %v2381_v55 }
 0xcc8   : > { %v2462_v57 = vpop.f32.mrf.mxu0 }
 0xcc9   : > { %v2463_v1 = vadd.f32 %v2654_v56, %v2462_v57 }
 0xcca   : > { %v2951_v58 = vpop.f32.mrf.mxu0 }
 0xccb   : > { %v2467_v59 = vmul.f32 0.70710677, %v2463_v1  ;;  %v2466_v61 = vmul.f32 0.5, %v2463_v1 }
 0xccd   : > { %3025 = verf.f32 %v2467_v59 }
 0xcda   : > { %v3026_v60 = vpop.eup %3025 }
 0xcdb   : > { %v2469_v62 = vadd.f32 1.0, %v3026_v60 }
 0xcdd   : > { %v2470_v5 = vmul.f32 %v2469_v62, %v2466_v61 }
 0xcdf   : > { %v2471_v63 = vadd.f32 %v2470_v5, %v2381_v55 }
 0xce1   : > { %2472 = vst.msk [vmem:[%s391_s28] sm:$0xff] %vm412_vm1, %v2471_v63 }
 0xce2   : > { %3040 = shalt.err (!%p3037_p5)
}
 0xce3   : > { %s3041_s16 = scalar_lea.hbm %s2486_s14, 128  ;;  %s3045_s28 = scalar_lea.hbm %s3663_s11, 256 }
 0xce4   : > { %p3042_p6 = scmp.ne.s32.totalorder %s2486_s14, %s3041_s16  ;;  %p3046_p10 = scmp.lt.s32.totalorder %s2486_s14, %s3663_s11 }
 0xce5   : > { %p3047_p11 = scmp.lt.s32.totalorder %s3045_s28, %s3041_s16 }
 0xce6   : > { %p3043_p7 = pnand %p3042_p6, %p3208_p4 }
 0xce7   : > { %p3048_p12 = por %p3047_p11, %p3046_p10 }
 0xce8   : > { %p3044_p9 = pneg %p3043_p7 }
 0xcea   : > { %p3049_p13 = pnand %p3048_p12, %p3044_p9 }
 0xcec   : > { %3052 = shalt.err (!%p3049_p13)
}
 0xced   : > { %2952 = dma.vmem_to_hbm [thread:$0]  (%p3208_p4), %s2489_s12, 128, %s2486_s14, %s2474_s15  }
 0xcee PF: > { %p2958_p0 = scmp.ge.s32.totalorder %s3103_s22, 2  ;;  %s2500_s0 = sand.u32 1, %s3083_s17  }
 0xcef   : > { %s2501_s1 = scalar_lea.sflag [#allocation5], %s2500_s0 }
 0xcf0   : > { %p2955_p1 = pnand %p2958_p0, %p3215_p8 }
 0xcf2   : > { %p2956_p2 = pneg %p2955_p1 }
 0xcf4   : > { %3078 = dma.done.wait (%p2956_p2), %s2501_s1, 128  }
 0xcf5   : > { %3080 = vsyncadd (%p2956_p2), %s2501_s1, 4294967168  ;;  %s24_s22 = sadd.s32 1, %s3103_s22   ;;  %s3672_s27 = sld [smem:[#allocation7_spill]] }
 0xcf6   : > { %p21_p3 = scmp.ge.s32.totalorder %s24_s22, 4   ;;  %s3673_s17 = smov %s3087_s18 }
 0xcf7   : > { %s3674_s18 = smov %s3091_s19  ;;  %s3675_s19 = smov %s3221_s30 }
 0xcf8   : > { %s3676_s20 = smov %s3099_s21  ;;  %23 = sbr.rel (!%p21_p3) target bundleno = 7 (0x7), region = 137 }
 0xcfb   : > { %s3677_s21 = smov %s3672_s27 }
 0xcfd   :  { %2506 = vsyncpa [#allocation5], 1 }
 0xcfe   :  { %2508 = vsyncpa [#allocation5 + $0x1], 1 }

</bundles_post_ra>
